<compile_context>
chip_gen: v7x
topology: tpu7x:2x2x1
jax: 0.10.0
libtpu: 0.0.40
codegen_flags: <defaults>
</compile_context>

<pallas_src>
import math

import jax
import jax.numpy as jnp
from jax import lax
from jax.experimental import pallas as pl
from jax.experimental.pallas import tpu as pltpu

B, C, H, W = 2, 4, 16, 16          # batch, channels, spatial
KH = KW = 3                        # conv kernel
NSTEPS = 8                         # fixed-step RK4 steps over t in [0, 1]
DT = 1.0 / NSTEPS
LANES = B * W * C                  # 128: lane axis = (batch, width, channel)


def _ode_rk4_kernel(x_ref, w_ref, b_ref, o_ref):
    """Integrates dy/dt = tanh(conv3x3(y) + b) from t=0 to t=1 with RK4.

    x_ref : (H, LANES)           initial state, lane l = b*W*C + w*C + c
    w_ref : (LANES, KH*LANES)    fused band-block weights [W_kh0 | W_kh1 | W_kh2]
    b_ref : (H, LANES)           bias, pre-broadcast on the host
    o_ref : (H, LANES)           final state at t = 1
    """
    bias = b_ref[...]                                   # hoisted, 2 vregs

    # Row masks that zero the wrapped row produced by the sublane rotations
    # (these encode the SAME zero padding along h). Hoisted above the loop.
    row = lax.broadcasted_iota(jnp.int32, (H, LANES), 0)
    mask_top = (row > 0).astype(jnp.float32)            # kills row 0   (after +1 roll)
    mask_bot = (row < H - 1).astype(jnp.float32)        # kills row H-1 (after -1 roll)

    def f(y):
        # f(t, y) = tanh(conv3x3(y) + b); autonomous, so t is unused.
        # One fused MXU matmul: (H,128)@(128,384). Column group kh holds
        # y @ W_kh; the h-offset of the stencil is applied to the OUTPUT via
        # XLU sublane rolls + zero-masking, so the state never leaves vregs.
        u = jnp.dot(y, w_ref[...], preferred_element_type=jnp.float32)
        up = pltpu.roll(u[:, 0:LANES], shift=1, axis=0)              # -> y[h-1] @ W0
        dn = pltpu.roll(u[:, 2 * LANES:3 * LANES], shift=H - 1, axis=0)  # -> y[h+1] @ W2
        acc = u[:, LANES:2 * LANES] + bias + mask_top * up + mask_bot * dn
        return jnp.tanh(acc)

    # Fully unrolled, register-resident RK4 with incremental k accumulation.
    y = x_ref[...]
    for _ in range(NSTEPS):
        k = f(y)                                       # k1
        ksum = k
        k = f(y + (0.5 * DT) * k)                      # k2
        ksum = ksum + 2.0 * k
        k = f(y + (0.5 * DT) * k)                      # k3
        ksum = ksum + 2.0 * k
        k = f(y + DT * k)                              # k4
        y = y + (DT / 6.0) * (ksum + k)

    o_ref[...] = y                                     # single VMEM write


def _build_band_weights(w_hwio):
    """Fold (kw, ci->co) into per-kh (LANES, LANES) band-block matrices and
    concatenate them along the output axis -> (LANES, KH*LANES).

    mat_kh[in_lane(b, w_in, ci), out_lane(b, w_out, co)] =
        w_hwio[kh, kw, ci, co]  where kw = w_in - w_out + 1 in [0, KW),
        zero otherwise (this also encodes SAME zero padding along w and
        keeps the batch elements isolated).
    """
    lane = jnp.arange(LANES)
    b_idx = lane // (W * C)
    w_idx = (lane % (W * C)) // C
    c_idx = lane % C
    bi, bo = b_idx[:, None], b_idx[None, :]
    wi, wo = w_idx[:, None], w_idx[None, :]
    ci, co = c_idx[:, None], c_idx[None, :]
    kw = wi - wo + 1
    valid = (bi == bo) & (kw >= 0) & (kw < KW)
    kw_safe = jnp.clip(kw, 0, KW - 1)
    mats = []
    for kh in range(KH):
        vals = w_hwio[kh][kw_safe, ci, co]             # (LANES, LANES)
        mats.append(jnp.where(valid, vals, 0.0))
    return jnp.concatenate(mats, axis=1).astype(jnp.float32)   # (LANES, KH*LANES)


def ode_block_forward(x_nchw, w_hwio, bias):
    """ODEBlock.forward: returns the ODE state at t = 1. Input/output NCHW."""
    # Lane-dense repack: NCHW -> (H, B*W*C) so the full 128-lane width is used.
    x_lanes = jnp.transpose(x_nchw.astype(jnp.float32),
                            (2, 0, 3, 1)).reshape(H, LANES)
    w_cat = _build_band_weights(w_hwio.astype(jnp.float32))
    b_lanes = jnp.broadcast_to(
        jnp.tile(bias.reshape(-1).astype(jnp.float32), B * W), (H, LANES))

    out_lanes = pl.pallas_call(
        _ode_rk4_kernel,
        out_shape=jax.ShapeDtypeStruct((H, LANES), jnp.float32),
        in_specs=[
            pl.BlockSpec(memory_space=pltpu.MemorySpace.VMEM),   # x (lane slab)
            pl.BlockSpec(memory_space=pltpu.MemorySpace.VMEM),   # fused band weights
            pl.BlockSpec(memory_space=pltpu.MemorySpace.VMEM),   # bias (H, LANES)
        ],
        out_specs=pl.BlockSpec(memory_space=pltpu.MemorySpace.VMEM),
    )(x_lanes, w_cat, b_lanes)

    out_hbwc = out_lanes.reshape(H, B, W, C)
    return jnp.transpose(out_hbwc, (1, 3, 0, 2))       # -> (B, C, H, W)


def _reference(x_nchw, w_hwio, bias):
    """Pure-JAX reference: same RK4 / conv3x3+tanh math, via lax.conv."""
    y = jnp.transpose(x_nchw, (0, 2, 3, 1)).astype(jnp.float32)

    def f(y):
        z = lax.conv_general_dilated(
            y, w_hwio, (1, 1), "SAME",
            dimension_numbers=("NHWC", "HWIO", "NHWC"))
        return jnp.tanh(z + bias)

    for _ in range(NSTEPS):
        k1 = f(y)
        k2 = f(y + 0.5 * DT * k1)
        k3 = f(y + 0.5 * DT * k2)
        k4 = f(y + DT * k3)
        y = y + (DT / 6.0) * (k1 + 2.0 * k2 + 2.0 * k3 + k4)
    return jnp.transpose(y, (0, 3, 1, 2))


if __name__ == "__main__":
    key = jax.random.PRNGKey(0)
    kx, kw, kb = jax.random.split(key, 3)
    x = jax.random.normal(kx, (B, C, H, W), jnp.float32)
    w = jax.random.normal(kw, (KH, KW, C, C), jnp.float32) * (
        1.0 / math.sqrt(KH * KW * C))
    bias = jax.random.normal(kb, (1, C), jnp.float32) * 0.1

    out = jax.block_until_ready(ode_block_forward(x, w, bias))
    ref = jax.block_until_ready(_reference(x, w, bias))

    assert out.shape == (B, C, H, W), out.shape
    assert out.dtype == jnp.float32
    assert float(jnp.max(jnp.abs(out - ref))) < 5e-3

    print("KERNEL_OK")
</pallas_src>

<mosaic_0001>
module attributes {stable_mosaic.version = 11 : i64} {
  func.func @_ode_rk4_kernel(%arg0: memref<16x128xf32, #tpu.memory_space<vmem>>, %arg1: memref<128x384xf32, #tpu.memory_space<vmem>>, %arg2: memref<16x128xf32, #tpu.memory_space<vmem>>, %arg3: memref<16x128xf32, #tpu.memory_space<vmem>>) attributes {dimension_semantics = [], scalar_prefetch = 0 : i64, scratch_operands = 0 : i64, tpu.core_type = #tpu.core_type<tc>} {
    %c0 = arith.constant 0 : index
    %c0_0 = arith.constant 0 : index
    %0 = vector.load %arg2[%c0, %c0_0] : memref<16x128xf32, #tpu.memory_space<vmem>>, vector<16x128xf32>
    %1 = tpu.iota {dimensions = array<i32: 0>} : vector<16x128xi32>
    %c0_i32 = arith.constant 0 : i32
    %2 = vector.broadcast %c0_i32 : i32 to vector<16x128xi32>
    %3 = arith.cmpi sgt, %1, %2 : vector<16x128xi32>
    %4 = arith.extui %3 : vector<16x128xi1> to vector<16x128xi32>
    %5 = arith.sitofp %4 : vector<16x128xi32> to vector<16x128xf32>
    %c15_i32 = arith.constant 15 : i32
    %6 = vector.broadcast %c15_i32 : i32 to vector<16x128xi32>
    %7 = arith.cmpi slt, %1, %6 : vector<16x128xi32>
    %8 = arith.extui %7 : vector<16x128xi1> to vector<16x128xi32>
    %9 = arith.sitofp %8 : vector<16x128xi32> to vector<16x128xf32>
    %c0_1 = arith.constant 0 : index
    %c0_2 = arith.constant 0 : index
    %10 = vector.load %arg0[%c0_1, %c0_2] : memref<16x128xf32, #tpu.memory_space<vmem>>, vector<16x128xf32>
    %c0_3 = arith.constant 0 : index
    %c0_4 = arith.constant 0 : index
    %11 = vector.load %arg1[%c0_3, %c0_4] : memref<128x384xf32, #tpu.memory_space<vmem>>, vector<128x384xf32>
    %cst = arith.constant dense<0.000000e+00> : vector<16x384xf32>
    %12 = tpu.matmul %10, %11, %cst {dimension_numbers = #tpu.dot_dimension_numbers<[1], [0], [0], [1], [0, 0, 1, 1], [], []>} : vector<16x128xf32>, vector<128x384xf32>, vector<16x384xf32> -> vector<16x384xf32>
    %13 = vector.extract_strided_slice %12 {offsets = [0, 0], sizes = [16, 128], strides = [1, 1]} : vector<16x384xf32> to vector<16x128xf32>
    %c1_i32 = arith.constant 1 : i32
    %14 = tpu.dynamic_rotate %13 by %c1_i32 dim 0 : vector<16x128xf32>, i32 -> vector<16x128xf32>
    %15 = vector.extract_strided_slice %12 {offsets = [0, 256], sizes = [16, 128], strides = [1, 1]} : vector<16x384xf32> to vector<16x128xf32>
    %c15_i32_5 = arith.constant 15 : i32
    %16 = tpu.dynamic_rotate %15 by %c15_i32_5 dim 0 : vector<16x128xf32>, i32 -> vector<16x128xf32>
    %17 = vector.extract_strided_slice %12 {offsets = [0, 128], sizes = [16, 128], strides = [1, 1]} : vector<16x384xf32> to vector<16x128xf32>
    %18 = arith.addf %17, %0 : vector<16x128xf32>
    %19 = arith.mulf %5, %14 : vector<16x128xf32>
    %20 = arith.addf %18, %19 : vector<16x128xf32>
    %21 = arith.mulf %9, %16 : vector<16x128xf32>
    %22 = arith.addf %20, %21 : vector<16x128xf32>
    %23 = math.tanh %22 : vector<16x128xf32>
    %cst_6 = arith.constant 6.250000e-02 : f32
    %24 = vector.broadcast %cst_6 : f32 to vector<16x128xf32>
    %25 = arith.mulf %24, %23 : vector<16x128xf32>
    %26 = arith.addf %10, %25 : vector<16x128xf32>
    %c0_7 = arith.constant 0 : index
    %c0_8 = arith.constant 0 : index
    %27 = vector.load %arg1[%c0_7, %c0_8] : memref<128x384xf32, #tpu.memory_space<vmem>>, vector<128x384xf32>
    %cst_9 = arith.constant dense<0.000000e+00> : vector<16x384xf32>
    %28 = tpu.matmul %26, %27, %cst_9 {dimension_numbers = #tpu.dot_dimension_numbers<[1], [0], [0], [1], [0, 0, 1, 1], [], []>} : vector<16x128xf32>, vector<128x384xf32>, vector<16x384xf32> -> vector<16x384xf32>
    %29 = vector.extract_strided_slice %28 {offsets = [0, 0], sizes = [16, 128], strides = [1, 1]} : vector<16x384xf32> to vector<16x128xf32>
    %c1_i32_10 = arith.constant 1 : i32
    %30 = tpu.dynamic_rotate %29 by %c1_i32_10 dim 0 : vector<16x128xf32>, i32 -> vector<16x128xf32>
    %31 = vector.extract_strided_slice %28 {offsets = [0, 256], sizes = [16, 128], strides = [1, 1]} : vector<16x384xf32> to vector<16x128xf32>
    %c15_i32_11 = arith.constant 15 : i32
    %32 = tpu.dynamic_rotate %31 by %c15_i32_11 dim 0 : vector<16x128xf32>, i32 -> vector<16x128xf32>
    %33 = vector.extract_strided_slice %28 {offsets = [0, 128], sizes = [16, 128], strides = [1, 1]} : vector<16x384xf32> to vector<16x128xf32>
    %34 = arith.addf %33, %0 : vector<16x128xf32>
    %35 = arith.mulf %5, %30 : vector<16x128xf32>
    %36 = arith.addf %34, %35 : vector<16x128xf32>
    %37 = arith.mulf %9, %32 : vector<16x128xf32>
    %38 = arith.addf %36, %37 : vector<16x128xf32>
    %39 = math.tanh %38 : vector<16x128xf32>
    %cst_12 = arith.constant 2.000000e+00 : f32
    %40 = vector.broadcast %cst_12 : f32 to vector<16x128xf32>
    %41 = arith.mulf %40, %39 : vector<16x128xf32>
    %42 = arith.addf %23, %41 : vector<16x128xf32>
    %cst_13 = arith.constant 6.250000e-02 : f32
    %43 = vector.broadcast %cst_13 : f32 to vector<16x128xf32>
    %44 = arith.mulf %43, %39 : vector<16x128xf32>
    %45 = arith.addf %10, %44 : vector<16x128xf32>
    %c0_14 = arith.constant 0 : index
    %c0_15 = arith.constant 0 : index
    %46 = vector.load %arg1[%c0_14, %c0_15] : memref<128x384xf32, #tpu.memory_space<vmem>>, vector<128x384xf32>
    %cst_16 = arith.constant dense<0.000000e+00> : vector<16x384xf32>
    %47 = tpu.matmul %45, %46, %cst_16 {dimension_numbers = #tpu.dot_dimension_numbers<[1], [0], [0], [1], [0, 0, 1, 1], [], []>} : vector<16x128xf32>, vector<128x384xf32>, vector<16x384xf32> -> vector<16x384xf32>
    %48 = vector.extract_strided_slice %47 {offsets = [0, 0], sizes = [16, 128], strides = [1, 1]} : vector<16x384xf32> to vector<16x128xf32>
    %c1_i32_17 = arith.constant 1 : i32
    %49 = tpu.dynamic_rotate %48 by %c1_i32_17 dim 0 : vector<16x128xf32>, i32 -> vector<16x128xf32>
    %50 = vector.extract_strided_slice %47 {offsets = [0, 256], sizes = [16, 128], strides = [1, 1]} : vector<16x384xf32> to vector<16x128xf32>
    %c15_i32_18 = arith.constant 15 : i32
    %51 = tpu.dynamic_rotate %50 by %c15_i32_18 dim 0 : vector<16x128xf32>, i32 -> vector<16x128xf32>
    %52 = vector.extract_strided_slice %47 {offsets = [0, 128], sizes = [16, 128], strides = [1, 1]} : vector<16x384xf32> to vector<16x128xf32>
    %53 = arith.addf %52, %0 : vector<16x128xf32>
    %54 = arith.mulf %5, %49 : vector<16x128xf32>
    %55 = arith.addf %53, %54 : vector<16x128xf32>
    %56 = arith.mulf %9, %51 : vector<16x128xf32>
    %57 = arith.addf %55, %56 : vector<16x128xf32>
    %58 = math.tanh %57 : vector<16x128xf32>
    %cst_19 = arith.constant 2.000000e+00 : f32
    %59 = vector.broadcast %cst_19 : f32 to vector<16x128xf32>
    %60 = arith.mulf %59, %58 : vector<16x128xf32>
    %61 = arith.addf %42, %60 : vector<16x128xf32>
    %cst_20 = arith.constant 1.250000e-01 : f32
    %62 = vector.broadcast %cst_20 : f32 to vector<16x128xf32>
    %63 = arith.mulf %62, %58 : vector<16x128xf32>
    %64 = arith.addf %10, %63 : vector<16x128xf32>
    %c0_21 = arith.constant 0 : index
    %c0_22 = arith.constant 0 : index
    %65 = vector.load %arg1[%c0_21, %c0_22] : memref<128x384xf32, #tpu.memory_space<vmem>>, vector<128x384xf32>
    %cst_23 = arith.constant dense<0.000000e+00> : vector<16x384xf32>
    %66 = tpu.matmul %64, %65, %cst_23 {dimension_numbers = #tpu.dot_dimension_numbers<[1], [0], [0], [1], [0, 0, 1, 1], [], []>} : vector<16x128xf32>, vector<128x384xf32>, vector<16x384xf32> -> vector<16x384xf32>
    %67 = vector.extract_strided_slice %66 {offsets = [0, 0], sizes = [16, 128], strides = [1, 1]} : vector<16x384xf32> to vector<16x128xf32>
    %c1_i32_24 = arith.constant 1 : i32
    %68 = tpu.dynamic_rotate %67 by %c1_i32_24 dim 0 : vector<16x128xf32>, i32 -> vector<16x128xf32>
    %69 = vector.extract_strided_slice %66 {offsets = [0, 256], sizes = [16, 128], strides = [1, 1]} : vector<16x384xf32> to vector<16x128xf32>
    %c15_i32_25 = arith.constant 15 : i32
    %70 = tpu.dynamic_rotate %69 by %c15_i32_25 dim 0 : vector<16x128xf32>, i32 -> vector<16x128xf32>
    %71 = vector.extract_strided_slice %66 {offsets = [0, 128], sizes = [16, 128], strides = [1, 1]} : vector<16x384xf32> to vector<16x128xf32>
    %72 = arith.addf %71, %0 : vector<16x128xf32>
    %73 = arith.mulf %5, %68 : vector<16x128xf32>
    %74 = arith.addf %72, %73 : vector<16x128xf32>
    %75 = arith.mulf %9, %70 : vector<16x128xf32>
    %76 = arith.addf %74, %75 : vector<16x128xf32>
    %77 = math.tanh %76 : vector<16x128xf32>
    %78 = arith.addf %61, %77 : vector<16x128xf32>
    %cst_26 = arith.constant 0.020833334 : f32
    %79 = vector.broadcast %cst_26 : f32 to vector<16x128xf32>
    %80 = arith.mulf %79, %78 : vector<16x128xf32>
    %81 = arith.addf %10, %80 : vector<16x128xf32>
    %c0_27 = arith.constant 0 : index
    %c0_28 = arith.constant 0 : index
    %82 = vector.load %arg1[%c0_27, %c0_28] : memref<128x384xf32, #tpu.memory_space<vmem>>, vector<128x384xf32>
    %cst_29 = arith.constant dense<0.000000e+00> : vector<16x384xf32>
    %83 = tpu.matmul %81, %82, %cst_29 {dimension_numbers = #tpu.dot_dimension_numbers<[1], [0], [0], [1], [0, 0, 1, 1], [], []>} : vector<16x128xf32>, vector<128x384xf32>, vector<16x384xf32> -> vector<16x384xf32>
    %84 = vector.extract_strided_slice %83 {offsets = [0, 0], sizes = [16, 128], strides = [1, 1]} : vector<16x384xf32> to vector<16x128xf32>
    %c1_i32_30 = arith.constant 1 : i32
    %85 = tpu.dynamic_rotate %84 by %c1_i32_30 dim 0 : vector<16x128xf32>, i32 -> vector<16x128xf32>
    %86 = vector.extract_strided_slice %83 {offsets = [0, 256], sizes = [16, 128], strides = [1, 1]} : vector<16x384xf32> to vector<16x128xf32>
    %c15_i32_31 = arith.constant 15 : i32
    %87 = tpu.dynamic_rotate %86 by %c15_i32_31 dim 0 : vector<16x128xf32>, i32 -> vector<16x128xf32>
    %88 = vector.extract_strided_slice %83 {offsets = [0, 128], sizes = [16, 128], strides = [1, 1]} : vector<16x384xf32> to vector<16x128xf32>
    %89 = arith.addf %88, %0 : vector<16x128xf32>
    %90 = arith.mulf %5, %85 : vector<16x128xf32>
    %91 = arith.addf %89, %90 : vector<16x128xf32>
    %92 = arith.mulf %9, %87 : vector<16x128xf32>
    %93 = arith.addf %91, %92 : vector<16x128xf32>
    %94 = math.tanh %93 : vector<16x128xf32>
    %cst_32 = arith.constant 6.250000e-02 : f32
    %95 = vector.broadcast %cst_32 : f32 to vector<16x128xf32>
    %96 = arith.mulf %95, %94 : vector<16x128xf32>
    %97 = arith.addf %81, %96 : vector<16x128xf32>
    %c0_33 = arith.constant 0 : index
    %c0_34 = arith.constant 0 : index
    %98 = vector.load %arg1[%c0_33, %c0_34] : memref<128x384xf32, #tpu.memory_space<vmem>>, vector<128x384xf32>
    %cst_35 = arith.constant dense<0.000000e+00> : vector<16x384xf32>
    %99 = tpu.matmul %97, %98, %cst_35 {dimension_numbers = #tpu.dot_dimension_numbers<[1], [0], [0], [1], [0, 0, 1, 1], [], []>} : vector<16x128xf32>, vector<128x384xf32>, vector<16x384xf32> -> vector<16x384xf32>
    %100 = vector.extract_strided_slice %99 {offsets = [0, 0], sizes = [16, 128], strides = [1, 1]} : vector<16x384xf32> to vector<16x128xf32>
    %c1_i32_36 = arith.constant 1 : i32
    %101 = tpu.dynamic_rotate %100 by %c1_i32_36 dim 0 : vector<16x128xf32>, i32 -> vector<16x128xf32>
    %102 = vector.extract_strided_slice %99 {offsets = [0, 256], sizes = [16, 128], strides = [1, 1]} : vector<16x384xf32> to vector<16x128xf32>
    %c15_i32_37 = arith.constant 15 : i32
    %103 = tpu.dynamic_rotate %102 by %c15_i32_37 dim 0 : vector<16x128xf32>, i32 -> vector<16x128xf32>
    %104 = vector.extract_strided_slice %99 {offsets = [0, 128], sizes = [16, 128], strides = [1, 1]} : vector<16x384xf32> to vector<16x128xf32>
    %105 = arith.addf %104, %0 : vector<16x128xf32>
    %106 = arith.mulf %5, %101 : vector<16x128xf32>
    %107 = arith.addf %105, %106 : vector<16x128xf32>
    %108 = arith.mulf %9, %103 : vector<16x128xf32>
    %109 = arith.addf %107, %108 : vector<16x128xf32>
    %110 = math.tanh %109 : vector<16x128xf32>
    %cst_38 = arith.constant 2.000000e+00 : f32
    %111 = vector.broadcast %cst_38 : f32 to vector<16x128xf32>
    %112 = arith.mulf %111, %110 : vector<16x128xf32>
    %113 = arith.addf %94, %112 : vector<16x128xf32>
    %cst_39 = arith.constant 6.250000e-02 : f32
    %114 = vector.broadcast %cst_39 : f32 to vector<16x128xf32>
    %115 = arith.mulf %114, %110 : vector<16x128xf32>
    %116 = arith.addf %81, %115 : vector<16x128xf32>
    %c0_40 = arith.constant 0 : index
    %c0_41 = arith.constant 0 : index
    %117 = vector.load %arg1[%c0_40, %c0_41] : memref<128x384xf32, #tpu.memory_space<vmem>>, vector<128x384xf32>
    %cst_42 = arith.constant dense<0.000000e+00> : vector<16x384xf32>
    %118 = tpu.matmul %116, %117, %cst_42 {dimension_numbers = #tpu.dot_dimension_numbers<[1], [0], [0], [1], [0, 0, 1, 1], [], []>} : vector<16x128xf32>, vector<128x384xf32>, vector<16x384xf32> -> vector<16x384xf32>
    %119 = vector.extract_strided_slice %118 {offsets = [0, 0], sizes = [16, 128], strides = [1, 1]} : vector<16x384xf32> to vector<16x128xf32>
    %c1_i32_43 = arith.constant 1 : i32
    %120 = tpu.dynamic_rotate %119 by %c1_i32_43 dim 0 : vector<16x128xf32>, i32 -> vector<16x128xf32>
    %121 = vector.extract_strided_slice %118 {offsets = [0, 256], sizes = [16, 128], strides = [1, 1]} : vector<16x384xf32> to vector<16x128xf32>
    %c15_i32_44 = arith.constant 15 : i32
    %122 = tpu.dynamic_rotate %121 by %c15_i32_44 dim 0 : vector<16x128xf32>, i32 -> vector<16x128xf32>
    %123 = vector.extract_strided_slice %118 {offsets = [0, 128], sizes = [16, 128], strides = [1, 1]} : vector<16x384xf32> to vector<16x128xf32>
    %124 = arith.addf %123, %0 : vector<16x128xf32>
    %125 = arith.mulf %5, %120 : vector<16x128xf32>
    %126 = arith.addf %124, %125 : vector<16x128xf32>
    %127 = arith.mulf %9, %122 : vector<16x128xf32>
    %128 = arith.addf %126, %127 : vector<16x128xf32>
    %129 = math.tanh %128 : vector<16x128xf32>
    %cst_45 = arith.constant 2.000000e+00 : f32
    %130 = vector.broadcast %cst_45 : f32 to vector<16x128xf32>
    %131 = arith.mulf %130, %129 : vector<16x128xf32>
    %132 = arith.addf %113, %131 : vector<16x128xf32>
    %cst_46 = arith.constant 1.250000e-01 : f32
    %133 = vector.broadcast %cst_46 : f32 to vector<16x128xf32>
    %134 = arith.mulf %133, %129 : vector<16x128xf32>
    %135 = arith.addf %81, %134 : vector<16x128xf32>
    %c0_47 = arith.constant 0 : index
    %c0_48 = arith.constant 0 : index
    %136 = vector.load %arg1[%c0_47, %c0_48] : memref<128x384xf32, #tpu.memory_space<vmem>>, vector<128x384xf32>
    %cst_49 = arith.constant dense<0.000000e+00> : vector<16x384xf32>
    %137 = tpu.matmul %135, %136, %cst_49 {dimension_numbers = #tpu.dot_dimension_numbers<[1], [0], [0], [1], [0, 0, 1, 1], [], []>} : vector<16x128xf32>, vector<128x384xf32>, vector<16x384xf32> -> vector<16x384xf32>
    %138 = vector.extract_strided_slice %137 {offsets = [0, 0], sizes = [16, 128], strides = [1, 1]} : vector<16x384xf32> to vector<16x128xf32>
    %c1_i32_50 = arith.constant 1 : i32
    %139 = tpu.dynamic_rotate %138 by %c1_i32_50 dim 0 : vector<16x128xf32>, i32 -> vector<16x128xf32>
    %140 = vector.extract_strided_slice %137 {offsets = [0, 256], sizes = [16, 128], strides = [1, 1]} : vector<16x384xf32> to vector<16x128xf32>
    %c15_i32_51 = arith.constant 15 : i32
    %141 = tpu.dynamic_rotate %140 by %c15_i32_51 dim 0 : vector<16x128xf32>, i32 -> vector<16x128xf32>
    %142 = vector.extract_strided_slice %137 {offsets = [0, 128], sizes = [16, 128], strides = [1, 1]} : vector<16x384xf32> to vector<16x128xf32>
    %143 = arith.addf %142, %0 : vector<16x128xf32>
    %144 = arith.mulf %5, %139 : vector<16x128xf32>
    %145 = arith.addf %143, %144 : vector<16x128xf32>
    %146 = arith.mulf %9, %141 : vector<16x128xf32>
    %147 = arith.addf %145, %146 : vector<16x128xf32>
    %148 = math.tanh %147 : vector<16x128xf32>
    %149 = arith.addf %132, %148 : vector<16x128xf32>
    %cst_52 = arith.constant 0.020833334 : f32
    %150 = vector.broadcast %cst_52 : f32 to vector<16x128xf32>
    %151 = arith.mulf %150, %149 : vector<16x128xf32>
    %152 = arith.addf %81, %151 : vector<16x128xf32>
    %c0_53 = arith.constant 0 : index
    %c0_54 = arith.constant 0 : index
    %153 = vector.load %arg1[%c0_53, %c0_54] : memref<128x384xf32, #tpu.memory_space<vmem>>, vector<128x384xf32>
    %cst_55 = arith.constant dense<0.000000e+00> : vector<16x384xf32>
    %154 = tpu.matmul %152, %153, %cst_55 {dimension_numbers = #tpu.dot_dimension_numbers<[1], [0], [0], [1], [0, 0, 1, 1], [], []>} : vector<16x128xf32>, vector<128x384xf32>, vector<16x384xf32> -> vector<16x384xf32>
    %155 = vector.extract_strided_slice %154 {offsets = [0, 0], sizes = [16, 128], strides = [1, 1]} : vector<16x384xf32> to vector<16x128xf32>
    %c1_i32_56 = arith.constant 1 : i32
    %156 = tpu.dynamic_rotate %155 by %c1_i32_56 dim 0 : vector<16x128xf32>, i32 -> vector<16x128xf32>
    %157 = vector.extract_strided_slice %154 {offsets = [0, 256], sizes = [16, 128], strides = [1, 1]} : vector<16x384xf32> to vector<16x128xf32>
    %c15_i32_57 = arith.constant 15 : i32
    %158 = tpu.dynamic_rotate %157 by %c15_i32_57 dim 0 : vector<16x128xf32>, i32 -> vector<16x128xf32>
    %159 = vector.extract_strided_slice %154 {offsets = [0, 128], sizes = [16, 128], strides = [1, 1]} : vector<16x384xf32> to vector<16x128xf32>
    %160 = arith.addf %159, %0 : vector<16x128xf32>
    %161 = arith.mulf %5, %156 : vector<16x128xf32>
    %162 = arith.addf %160, %161 : vector<16x128xf32>
    %163 = arith.mulf %9, %158 : vector<16x128xf32>
    %164 = arith.addf %162, %163 : vector<16x128xf32>
    %165 = math.tanh %164 : vector<16x128xf32>
    %cst_58 = arith.constant 6.250000e-02 : f32
    %166 = vector.broadcast %cst_58 : f32 to vector<16x128xf32>
    %167 = arith.mulf %166, %165 : vector<16x128xf32>
    %168 = arith.addf %152, %167 : vector<16x128xf32>
    %c0_59 = arith.constant 0 : index
    %c0_60 = arith.constant 0 : index
    %169 = vector.load %arg1[%c0_59, %c0_60] : memref<128x384xf32, #tpu.memory_space<vmem>>, vector<128x384xf32>
    %cst_61 = arith.constant dense<0.000000e+00> : vector<16x384xf32>
    %170 = tpu.matmul %168, %169, %cst_61 {dimension_numbers = #tpu.dot_dimension_numbers<[1], [0], [0], [1], [0, 0, 1, 1], [], []>} : vector<16x128xf32>, vector<128x384xf32>, vector<16x384xf32> -> vector<16x384xf32>
    %171 = vector.extract_strided_slice %170 {offsets = [0, 0], sizes = [16, 128], strides = [1, 1]} : vector<16x384xf32> to vector<16x128xf32>
    %c1_i32_62 = arith.constant 1 : i32
    %172 = tpu.dynamic_rotate %171 by %c1_i32_62 dim 0 : vector<16x128xf32>, i32 -> vector<16x128xf32>
    %173 = vector.extract_strided_slice %170 {offsets = [0, 256], sizes = [16, 128], strides = [1, 1]} : vector<16x384xf32> to vector<16x128xf32>
    %c15_i32_63 = arith.constant 15 : i32
    %174 = tpu.dynamic_rotate %173 by %c15_i32_63 dim 0 : vector<16x128xf32>, i32 -> vector<16x128xf32>
    %175 = vector.extract_strided_slice %170 {offsets = [0, 128], sizes = [16, 128], strides = [1, 1]} : vector<16x384xf32> to vector<16x128xf32>
    %176 = arith.addf %175, %0 : vector<16x128xf32>
    %177 = arith.mulf %5, %172 : vector<16x128xf32>
    %178 = arith.addf %176, %177 : vector<16x128xf32>
    %179 = arith.mulf %9, %174 : vector<16x128xf32>
    %180 = arith.addf %178, %179 : vector<16x128xf32>
    %181 = math.tanh %180 : vector<16x128xf32>
    %cst_64 = arith.constant 2.000000e+00 : f32
    %182 = vector.broadcast %cst_64 : f32 to vector<16x128xf32>
    %183 = arith.mulf %182, %181 : vector<16x128xf32>
    %184 = arith.addf %165, %183 : vector<16x128xf32>
    %cst_65 = arith.constant 6.250000e-02 : f32
    %185 = vector.broadcast %cst_65 : f32 to vector<16x128xf32>
    %186 = arith.mulf %185, %181 : vector<16x128xf32>
    %187 = arith.addf %152, %186 : vector<16x128xf32>
    %c0_66 = arith.constant 0 : index
    %c0_67 = arith.constant 0 : index
    %188 = vector.load %arg1[%c0_66, %c0_67] : memref<128x384xf32, #tpu.memory_space<vmem>>, vector<128x384xf32>
    %cst_68 = arith.constant dense<0.000000e+00> : vector<16x384xf32>
    %189 = tpu.matmul %187, %188, %cst_68 {dimension_numbers = #tpu.dot_dimension_numbers<[1], [0], [0], [1], [0, 0, 1, 1], [], []>} : vector<16x128xf32>, vector<128x384xf32>, vector<16x384xf32> -> vector<16x384xf32>
    %190 = vector.extract_strided_slice %189 {offsets = [0, 0], sizes = [16, 128], strides = [1, 1]} : vector<16x384xf32> to vector<16x128xf32>
    %c1_i32_69 = arith.constant 1 : i32
    %191 = tpu.dynamic_rotate %190 by %c1_i32_69 dim 0 : vector<16x128xf32>, i32 -> vector<16x128xf32>
    %192 = vector.extract_strided_slice %189 {offsets = [0, 256], sizes = [16, 128], strides = [1, 1]} : vector<16x384xf32> to vector<16x128xf32>
    %c15_i32_70 = arith.constant 15 : i32
    %193 = tpu.dynamic_rotate %192 by %c15_i32_70 dim 0 : vector<16x128xf32>, i32 -> vector<16x128xf32>
    %194 = vector.extract_strided_slice %189 {offsets = [0, 128], sizes = [16, 128], strides = [1, 1]} : vector<16x384xf32> to vector<16x128xf32>
    %195 = arith.addf %194, %0 : vector<16x128xf32>
    %196 = arith.mulf %5, %191 : vector<16x128xf32>
    %197 = arith.addf %195, %196 : vector<16x128xf32>
    %198 = arith.mulf %9, %193 : vector<16x128xf32>
    %199 = arith.addf %197, %198 : vector<16x128xf32>
    %200 = math.tanh %199 : vector<16x128xf32>
    %cst_71 = arith.constant 2.000000e+00 : f32
    %201 = vector.broadcast %cst_71 : f32 to vector<16x128xf32>
    %202 = arith.mulf %201, %200 : vector<16x128xf32>
    %203 = arith.addf %184, %202 : vector<16x128xf32>
    %cst_72 = arith.constant 1.250000e-01 : f32
    %204 = vector.broadcast %cst_72 : f32 to vector<16x128xf32>
    %205 = arith.mulf %204, %200 : vector<16x128xf32>
    %206 = arith.addf %152, %205 : vector<16x128xf32>
    %c0_73 = arith.constant 0 : index
    %c0_74 = arith.constant 0 : index
    %207 = vector.load %arg1[%c0_73, %c0_74] : memref<128x384xf32, #tpu.memory_space<vmem>>, vector<128x384xf32>
    %cst_75 = arith.constant dense<0.000000e+00> : vector<16x384xf32>
    %208 = tpu.matmul %206, %207, %cst_75 {dimension_numbers = #tpu.dot_dimension_numbers<[1], [0], [0], [1], [0, 0, 1, 1], [], []>} : vector<16x128xf32>, vector<128x384xf32>, vector<16x384xf32> -> vector<16x384xf32>
    %209 = vector.extract_strided_slice %208 {offsets = [0, 0], sizes = [16, 128], strides = [1, 1]} : vector<16x384xf32> to vector<16x128xf32>
    %c1_i32_76 = arith.constant 1 : i32
    %210 = tpu.dynamic_rotate %209 by %c1_i32_76 dim 0 : vector<16x128xf32>, i32 -> vector<16x128xf32>
    %211 = vector.extract_strided_slice %208 {offsets = [0, 256], sizes = [16, 128], strides = [1, 1]} : vector<16x384xf32> to vector<16x128xf32>
    %c15_i32_77 = arith.constant 15 : i32
    %212 = tpu.dynamic_rotate %211 by %c15_i32_77 dim 0 : vector<16x128xf32>, i32 -> vector<16x128xf32>
    %213 = vector.extract_strided_slice %208 {offsets = [0, 128], sizes = [16, 128], strides = [1, 1]} : vector<16x384xf32> to vector<16x128xf32>
    %214 = arith.addf %213, %0 : vector<16x128xf32>
    %215 = arith.mulf %5, %210 : vector<16x128xf32>
    %216 = arith.addf %214, %215 : vector<16x128xf32>
    %217 = arith.mulf %9, %212 : vector<16x128xf32>
    %218 = arith.addf %216, %217 : vector<16x128xf32>
    %219 = math.tanh %218 : vector<16x128xf32>
    %220 = arith.addf %203, %219 : vector<16x128xf32>
    %cst_78 = arith.constant 0.020833334 : f32
    %221 = vector.broadcast %cst_78 : f32 to vector<16x128xf32>
    %222 = arith.mulf %221, %220 : vector<16x128xf32>
    %223 = arith.addf %152, %222 : vector<16x128xf32>
    %c0_79 = arith.constant 0 : index
    %c0_80 = arith.constant 0 : index
    %224 = vector.load %arg1[%c0_79, %c0_80] : memref<128x384xf32, #tpu.memory_space<vmem>>, vector<128x384xf32>
    %cst_81 = arith.constant dense<0.000000e+00> : vector<16x384xf32>
    %225 = tpu.matmul %223, %224, %cst_81 {dimension_numbers = #tpu.dot_dimension_numbers<[1], [0], [0], [1], [0, 0, 1, 1], [], []>} : vector<16x128xf32>, vector<128x384xf32>, vector<16x384xf32> -> vector<16x384xf32>
    %226 = vector.extract_strided_slice %225 {offsets = [0, 0], sizes = [16, 128], strides = [1, 1]} : vector<16x384xf32> to vector<16x128xf32>
    %c1_i32_82 = arith.constant 1 : i32
    %227 = tpu.dynamic_rotate %226 by %c1_i32_82 dim 0 : vector<16x128xf32>, i32 -> vector<16x128xf32>
    %228 = vector.extract_strided_slice %225 {offsets = [0, 256], sizes = [16, 128], strides = [1, 1]} : vector<16x384xf32> to vector<16x128xf32>
    %c15_i32_83 = arith.constant 15 : i32
    %229 = tpu.dynamic_rotate %228 by %c15_i32_83 dim 0 : vector<16x128xf32>, i32 -> vector<16x128xf32>
    %230 = vector.extract_strided_slice %225 {offsets = [0, 128], sizes = [16, 128], strides = [1, 1]} : vector<16x384xf32> to vector<16x128xf32>
    %231 = arith.addf %230, %0 : vector<16x128xf32>
    %232 = arith.mulf %5, %227 : vector<16x128xf32>
    %233 = arith.addf %231, %232 : vector<16x128xf32>
    %234 = arith.mulf %9, %229 : vector<16x128xf32>
    %235 = arith.addf %233, %234 : vector<16x128xf32>
    %236 = math.tanh %235 : vector<16x128xf32>
    %cst_84 = arith.constant 6.250000e-02 : f32
    %237 = vector.broadcast %cst_84 : f32 to vector<16x128xf32>
    %238 = arith.mulf %237, %236 : vector<16x128xf32>
    %239 = arith.addf %223, %238 : vector<16x128xf32>
    %c0_85 = arith.constant 0 : index
    %c0_86 = arith.constant 0 : index
    %240 = vector.load %arg1[%c0_85, %c0_86] : memref<128x384xf32, #tpu.memory_space<vmem>>, vector<128x384xf32>
    %cst_87 = arith.constant dense<0.000000e+00> : vector<16x384xf32>
    %241 = tpu.matmul %239, %240, %cst_87 {dimension_numbers = #tpu.dot_dimension_numbers<[1], [0], [0], [1], [0, 0, 1, 1], [], []>} : vector<16x128xf32>, vector<128x384xf32>, vector<16x384xf32> -> vector<16x384xf32>
    %242 = vector.extract_strided_slice %241 {offsets = [0, 0], sizes = [16, 128], strides = [1, 1]} : vector<16x384xf32> to vector<16x128xf32>
    %c1_i32_88 = arith.constant 1 : i32
    %243 = tpu.dynamic_rotate %242 by %c1_i32_88 dim 0 : vector<16x128xf32>, i32 -> vector<16x128xf32>
    %244 = vector.extract_strided_slice %241 {offsets = [0, 256], sizes = [16, 128], strides = [1, 1]} : vector<16x384xf32> to vector<16x128xf32>
    %c15_i32_89 = arith.constant 15 : i32
    %245 = tpu.dynamic_rotate %244 by %c15_i32_89 dim 0 : vector<16x128xf32>, i32 -> vector<16x128xf32>
    %246 = vector.extract_strided_slice %241 {offsets = [0, 128], sizes = [16, 128], strides = [1, 1]} : vector<16x384xf32> to vector<16x128xf32>
    %247 = arith.addf %246, %0 : vector<16x128xf32>
    %248 = arith.mulf %5, %243 : vector<16x128xf32>
    %249 = arith.addf %247, %248 : vector<16x128xf32>
    %250 = arith.mulf %9, %245 : vector<16x128xf32>
    %251 = arith.addf %249, %250 : vector<16x128xf32>
    %252 = math.tanh %251 : vector<16x128xf32>
    %cst_90 = arith.constant 2.000000e+00 : f32
    %253 = vector.broadcast %cst_90 : f32 to vector<16x128xf32>
    %254 = arith.mulf %253, %252 : vector<16x128xf32>
    %255 = arith.addf %236, %254 : vector<16x128xf32>
    %cst_91 = arith.constant 6.250000e-02 : f32
    %256 = vector.broadcast %cst_91 : f32 to vector<16x128xf32>
    %257 = arith.mulf %256, %252 : vector<16x128xf32>
    %258 = arith.addf %223, %257 : vector<16x128xf32>
    %c0_92 = arith.constant 0 : index
    %c0_93 = arith.constant 0 : index
    %259 = vector.load %arg1[%c0_92, %c0_93] : memref<128x384xf32, #tpu.memory_space<vmem>>, vector<128x384xf32>
    %cst_94 = arith.constant dense<0.000000e+00> : vector<16x384xf32>
    %260 = tpu.matmul %258, %259, %cst_94 {dimension_numbers = #tpu.dot_dimension_numbers<[1], [0], [0], [1], [0, 0, 1, 1], [], []>} : vector<16x128xf32>, vector<128x384xf32>, vector<16x384xf32> -> vector<16x384xf32>
    %261 = vector.extract_strided_slice %260 {offsets = [0, 0], sizes = [16, 128], strides = [1, 1]} : vector<16x384xf32> to vector<16x128xf32>
    %c1_i32_95 = arith.constant 1 : i32
    %262 = tpu.dynamic_rotate %261 by %c1_i32_95 dim 0 : vector<16x128xf32>, i32 -> vector<16x128xf32>
    %263 = vector.extract_strided_slice %260 {offsets = [0, 256], sizes = [16, 128], strides = [1, 1]} : vector<16x384xf32> to vector<16x128xf32>
    %c15_i32_96 = arith.constant 15 : i32
    %264 = tpu.dynamic_rotate %263 by %c15_i32_96 dim 0 : vector<16x128xf32>, i32 -> vector<16x128xf32>
    %265 = vector.extract_strided_slice %260 {offsets = [0, 128], sizes = [16, 128], strides = [1, 1]} : vector<16x384xf32> to vector<16x128xf32>
    %266 = arith.addf %265, %0 : vector<16x128xf32>
    %267 = arith.mulf %5, %262 : vector<16x128xf32>
    %268 = arith.addf %266, %267 : vector<16x128xf32>
    %269 = arith.mulf %9, %264 : vector<16x128xf32>
    %270 = arith.addf %268, %269 : vector<16x128xf32>
    %271 = math.tanh %270 : vector<16x128xf32>
    %cst_97 = arith.constant 2.000000e+00 : f32
    %272 = vector.broadcast %cst_97 : f32 to vector<16x128xf32>
    %273 = arith.mulf %272, %271 : vector<16x128xf32>
    %274 = arith.addf %255, %273 : vector<16x128xf32>
    %cst_98 = arith.constant 1.250000e-01 : f32
    %275 = vector.broadcast %cst_98 : f32 to vector<16x128xf32>
    %276 = arith.mulf %275, %271 : vector<16x128xf32>
    %277 = arith.addf %223, %276 : vector<16x128xf32>
    %c0_99 = arith.constant 0 : index
    %c0_100 = arith.constant 0 : index
    %278 = vector.load %arg1[%c0_99, %c0_100] : memref<128x384xf32, #tpu.memory_space<vmem>>, vector<128x384xf32>
    %cst_101 = arith.constant dense<0.000000e+00> : vector<16x384xf32>
    %279 = tpu.matmul %277, %278, %cst_101 {dimension_numbers = #tpu.dot_dimension_numbers<[1], [0], [0], [1], [0, 0, 1, 1], [], []>} : vector<16x128xf32>, vector<128x384xf32>, vector<16x384xf32> -> vector<16x384xf32>
    %280 = vector.extract_strided_slice %279 {offsets = [0, 0], sizes = [16, 128], strides = [1, 1]} : vector<16x384xf32> to vector<16x128xf32>
    %c1_i32_102 = arith.constant 1 : i32
    %281 = tpu.dynamic_rotate %280 by %c1_i32_102 dim 0 : vector<16x128xf32>, i32 -> vector<16x128xf32>
    %282 = vector.extract_strided_slice %279 {offsets = [0, 256], sizes = [16, 128], strides = [1, 1]} : vector<16x384xf32> to vector<16x128xf32>
    %c15_i32_103 = arith.constant 15 : i32
    %283 = tpu.dynamic_rotate %282 by %c15_i32_103 dim 0 : vector<16x128xf32>, i32 -> vector<16x128xf32>
    %284 = vector.extract_strided_slice %279 {offsets = [0, 128], sizes = [16, 128], strides = [1, 1]} : vector<16x384xf32> to vector<16x128xf32>
    %285 = arith.addf %284, %0 : vector<16x128xf32>
    %286 = arith.mulf %5, %281 : vector<16x128xf32>
    %287 = arith.addf %285, %286 : vector<16x128xf32>
    %288 = arith.mulf %9, %283 : vector<16x128xf32>
    %289 = arith.addf %287, %288 : vector<16x128xf32>
    %290 = math.tanh %289 : vector<16x128xf32>
    %291 = arith.addf %274, %290 : vector<16x128xf32>
    %cst_104 = arith.constant 0.020833334 : f32
    %292 = vector.broadcast %cst_104 : f32 to vector<16x128xf32>
    %293 = arith.mulf %292, %291 : vector<16x128xf32>
    %294 = arith.addf %223, %293 : vector<16x128xf32>
    %c0_105 = arith.constant 0 : index
    %c0_106 = arith.constant 0 : index
    %295 = vector.load %arg1[%c0_105, %c0_106] : memref<128x384xf32, #tpu.memory_space<vmem>>, vector<128x384xf32>
    %cst_107 = arith.constant dense<0.000000e+00> : vector<16x384xf32>
    %296 = tpu.matmul %294, %295, %cst_107 {dimension_numbers = #tpu.dot_dimension_numbers<[1], [0], [0], [1], [0, 0, 1, 1], [], []>} : vector<16x128xf32>, vector<128x384xf32>, vector<16x384xf32> -> vector<16x384xf32>
    %297 = vector.extract_strided_slice %296 {offsets = [0, 0], sizes = [16, 128], strides = [1, 1]} : vector<16x384xf32> to vector<16x128xf32>
    %c1_i32_108 = arith.constant 1 : i32
    %298 = tpu.dynamic_rotate %297 by %c1_i32_108 dim 0 : vector<16x128xf32>, i32 -> vector<16x128xf32>
    %299 = vector.extract_strided_slice %296 {offsets = [0, 256], sizes = [16, 128], strides = [1, 1]} : vector<16x384xf32> to vector<16x128xf32>
    %c15_i32_109 = arith.constant 15 : i32
    %300 = tpu.dynamic_rotate %299 by %c15_i32_109 dim 0 : vector<16x128xf32>, i32 -> vector<16x128xf32>
    %301 = vector.extract_strided_slice %296 {offsets = [0, 128], sizes = [16, 128], strides = [1, 1]} : vector<16x384xf32> to vector<16x128xf32>
    %302 = arith.addf %301, %0 : vector<16x128xf32>
    %303 = arith.mulf %5, %298 : vector<16x128xf32>
    %304 = arith.addf %302, %303 : vector<16x128xf32>
    %305 = arith.mulf %9, %300 : vector<16x128xf32>
    %306 = arith.addf %304, %305 : vector<16x128xf32>
    %307 = math.tanh %306 : vector<16x128xf32>
    %cst_110 = arith.constant 6.250000e-02 : f32
    %308 = vector.broadcast %cst_110 : f32 to vector<16x128xf32>
    %309 = arith.mulf %308, %307 : vector<16x128xf32>
    %310 = arith.addf %294, %309 : vector<16x128xf32>
    %c0_111 = arith.constant 0 : index
    %c0_112 = arith.constant 0 : index
    %311 = vector.load %arg1[%c0_111, %c0_112] : memref<128x384xf32, #tpu.memory_space<vmem>>, vector<128x384xf32>
    %cst_113 = arith.constant dense<0.000000e+00> : vector<16x384xf32>
    %312 = tpu.matmul %310, %311, %cst_113 {dimension_numbers = #tpu.dot_dimension_numbers<[1], [0], [0], [1], [0, 0, 1, 1], [], []>} : vector<16x128xf32>, vector<128x384xf32>, vector<16x384xf32> -> vector<16x384xf32>
    %313 = vector.extract_strided_slice %312 {offsets = [0, 0], sizes = [16, 128], strides = [1, 1]} : vector<16x384xf32> to vector<16x128xf32>
    %c1_i32_114 = arith.constant 1 : i32
    %314 = tpu.dynamic_rotate %313 by %c1_i32_114 dim 0 : vector<16x128xf32>, i32 -> vector<16x128xf32>
    %315 = vector.extract_strided_slice %312 {offsets = [0, 256], sizes = [16, 128], strides = [1, 1]} : vector<16x384xf32> to vector<16x128xf32>
    %c15_i32_115 = arith.constant 15 : i32
    %316 = tpu.dynamic_rotate %315 by %c15_i32_115 dim 0 : vector<16x128xf32>, i32 -> vector<16x128xf32>
    %317 = vector.extract_strided_slice %312 {offsets = [0, 128], sizes = [16, 128], strides = [1, 1]} : vector<16x384xf32> to vector<16x128xf32>
    %318 = arith.addf %317, %0 : vector<16x128xf32>
    %319 = arith.mulf %5, %314 : vector<16x128xf32>
    %320 = arith.addf %318, %319 : vector<16x128xf32>
    %321 = arith.mulf %9, %316 : vector<16x128xf32>
    %322 = arith.addf %320, %321 : vector<16x128xf32>
    %323 = math.tanh %322 : vector<16x128xf32>
    %cst_116 = arith.constant 2.000000e+00 : f32
    %324 = vector.broadcast %cst_116 : f32 to vector<16x128xf32>
    %325 = arith.mulf %324, %323 : vector<16x128xf32>
    %326 = arith.addf %307, %325 : vector<16x128xf32>
    %cst_117 = arith.constant 6.250000e-02 : f32
    %327 = vector.broadcast %cst_117 : f32 to vector<16x128xf32>
    %328 = arith.mulf %327, %323 : vector<16x128xf32>
    %329 = arith.addf %294, %328 : vector<16x128xf32>
    %c0_118 = arith.constant 0 : index
    %c0_119 = arith.constant 0 : index
    %330 = vector.load %arg1[%c0_118, %c0_119] : memref<128x384xf32, #tpu.memory_space<vmem>>, vector<128x384xf32>
    %cst_120 = arith.constant dense<0.000000e+00> : vector<16x384xf32>
    %331 = tpu.matmul %329, %330, %cst_120 {dimension_numbers = #tpu.dot_dimension_numbers<[1], [0], [0], [1], [0, 0, 1, 1], [], []>} : vector<16x128xf32>, vector<128x384xf32>, vector<16x384xf32> -> vector<16x384xf32>
    %332 = vector.extract_strided_slice %331 {offsets = [0, 0], sizes = [16, 128], strides = [1, 1]} : vector<16x384xf32> to vector<16x128xf32>
    %c1_i32_121 = arith.constant 1 : i32
    %333 = tpu.dynamic_rotate %332 by %c1_i32_121 dim 0 : vector<16x128xf32>, i32 -> vector<16x128xf32>
    %334 = vector.extract_strided_slice %331 {offsets = [0, 256], sizes = [16, 128], strides = [1, 1]} : vector<16x384xf32> to vector<16x128xf32>
    %c15_i32_122 = arith.constant 15 : i32
    %335 = tpu.dynamic_rotate %334 by %c15_i32_122 dim 0 : vector<16x128xf32>, i32 -> vector<16x128xf32>
    %336 = vector.extract_strided_slice %331 {offsets = [0, 128], sizes = [16, 128], strides = [1, 1]} : vector<16x384xf32> to vector<16x128xf32>
    %337 = arith.addf %336, %0 : vector<16x128xf32>
    %338 = arith.mulf %5, %333 : vector<16x128xf32>
    %339 = arith.addf %337, %338 : vector<16x128xf32>
    %340 = arith.mulf %9, %335 : vector<16x128xf32>
    %341 = arith.addf %339, %340 : vector<16x128xf32>
    %342 = math.tanh %341 : vector<16x128xf32>
    %cst_123 = arith.constant 2.000000e+00 : f32
    %343 = vector.broadcast %cst_123 : f32 to vector<16x128xf32>
    %344 = arith.mulf %343, %342 : vector<16x128xf32>
    %345 = arith.addf %326, %344 : vector<16x128xf32>
    %cst_124 = arith.constant 1.250000e-01 : f32
    %346 = vector.broadcast %cst_124 : f32 to vector<16x128xf32>
    %347 = arith.mulf %346, %342 : vector<16x128xf32>
    %348 = arith.addf %294, %347 : vector<16x128xf32>
    %c0_125 = arith.constant 0 : index
    %c0_126 = arith.constant 0 : index
    %349 = vector.load %arg1[%c0_125, %c0_126] : memref<128x384xf32, #tpu.memory_space<vmem>>, vector<128x384xf32>
    %cst_127 = arith.constant dense<0.000000e+00> : vector<16x384xf32>
    %350 = tpu.matmul %348, %349, %cst_127 {dimension_numbers = #tpu.dot_dimension_numbers<[1], [0], [0], [1], [0, 0, 1, 1], [], []>} : vector<16x128xf32>, vector<128x384xf32>, vector<16x384xf32> -> vector<16x384xf32>
    %351 = vector.extract_strided_slice %350 {offsets = [0, 0], sizes = [16, 128], strides = [1, 1]} : vector<16x384xf32> to vector<16x128xf32>
    %c1_i32_128 = arith.constant 1 : i32
    %352 = tpu.dynamic_rotate %351 by %c1_i32_128 dim 0 : vector<16x128xf32>, i32 -> vector<16x128xf32>
    %353 = vector.extract_strided_slice %350 {offsets = [0, 256], sizes = [16, 128], strides = [1, 1]} : vector<16x384xf32> to vector<16x128xf32>
    %c15_i32_129 = arith.constant 15 : i32
    %354 = tpu.dynamic_rotate %353 by %c15_i32_129 dim 0 : vector<16x128xf32>, i32 -> vector<16x128xf32>
    %355 = vector.extract_strided_slice %350 {offsets = [0, 128], sizes = [16, 128], strides = [1, 1]} : vector<16x384xf32> to vector<16x128xf32>
    %356 = arith.addf %355, %0 : vector<16x128xf32>
    %357 = arith.mulf %5, %352 : vector<16x128xf32>
    %358 = arith.addf %356, %357 : vector<16x128xf32>
    %359 = arith.mulf %9, %354 : vector<16x128xf32>
    %360 = arith.addf %358, %359 : vector<16x128xf32>
    %361 = math.tanh %360 : vector<16x128xf32>
    %362 = arith.addf %345, %361 : vector<16x128xf32>
    %cst_130 = arith.constant 0.020833334 : f32
    %363 = vector.broadcast %cst_130 : f32 to vector<16x128xf32>
    %364 = arith.mulf %363, %362 : vector<16x128xf32>
    %365 = arith.addf %294, %364 : vector<16x128xf32>
    %c0_131 = arith.constant 0 : index
    %c0_132 = arith.constant 0 : index
    %366 = vector.load %arg1[%c0_131, %c0_132] : memref<128x384xf32, #tpu.memory_space<vmem>>, vector<128x384xf32>
    %cst_133 = arith.constant dense<0.000000e+00> : vector<16x384xf32>
    %367 = tpu.matmul %365, %366, %cst_133 {dimension_numbers = #tpu.dot_dimension_numbers<[1], [0], [0], [1], [0, 0, 1, 1], [], []>} : vector<16x128xf32>, vector<128x384xf32>, vector<16x384xf32> -> vector<16x384xf32>
    %368 = vector.extract_strided_slice %367 {offsets = [0, 0], sizes = [16, 128], strides = [1, 1]} : vector<16x384xf32> to vector<16x128xf32>
    %c1_i32_134 = arith.constant 1 : i32
    %369 = tpu.dynamic_rotate %368 by %c1_i32_134 dim 0 : vector<16x128xf32>, i32 -> vector<16x128xf32>
    %370 = vector.extract_strided_slice %367 {offsets = [0, 256], sizes = [16, 128], strides = [1, 1]} : vector<16x384xf32> to vector<16x128xf32>
    %c15_i32_135 = arith.constant 15 : i32
    %371 = tpu.dynamic_rotate %370 by %c15_i32_135 dim 0 : vector<16x128xf32>, i32 -> vector<16x128xf32>
    %372 = vector.extract_strided_slice %367 {offsets = [0, 128], sizes = [16, 128], strides = [1, 1]} : vector<16x384xf32> to vector<16x128xf32>
    %373 = arith.addf %372, %0 : vector<16x128xf32>
    %374 = arith.mulf %5, %369 : vector<16x128xf32>
    %375 = arith.addf %373, %374 : vector<16x128xf32>
    %376 = arith.mulf %9, %371 : vector<16x128xf32>
    %377 = arith.addf %375, %376 : vector<16x128xf32>
    %378 = math.tanh %377 : vector<16x128xf32>
    %cst_136 = arith.constant 6.250000e-02 : f32
    %379 = vector.broadcast %cst_136 : f32 to vector<16x128xf32>
    %380 = arith.mulf %379, %378 : vector<16x128xf32>
    %381 = arith.addf %365, %380 : vector<16x128xf32>
    %c0_137 = arith.constant 0 : index
    %c0_138 = arith.constant 0 : index
    %382 = vector.load %arg1[%c0_137, %c0_138] : memref<128x384xf32, #tpu.memory_space<vmem>>, vector<128x384xf32>
    %cst_139 = arith.constant dense<0.000000e+00> : vector<16x384xf32>
    %383 = tpu.matmul %381, %382, %cst_139 {dimension_numbers = #tpu.dot_dimension_numbers<[1], [0], [0], [1], [0, 0, 1, 1], [], []>} : vector<16x128xf32>, vector<128x384xf32>, vector<16x384xf32> -> vector<16x384xf32>
    %384 = vector.extract_strided_slice %383 {offsets = [0, 0], sizes = [16, 128], strides = [1, 1]} : vector<16x384xf32> to vector<16x128xf32>
    %c1_i32_140 = arith.constant 1 : i32
    %385 = tpu.dynamic_rotate %384 by %c1_i32_140 dim 0 : vector<16x128xf32>, i32 -> vector<16x128xf32>
    %386 = vector.extract_strided_slice %383 {offsets = [0, 256], sizes = [16, 128], strides = [1, 1]} : vector<16x384xf32> to vector<16x128xf32>
    %c15_i32_141 = arith.constant 15 : i32
    %387 = tpu.dynamic_rotate %386 by %c15_i32_141 dim 0 : vector<16x128xf32>, i32 -> vector<16x128xf32>
    %388 = vector.extract_strided_slice %383 {offsets = [0, 128], sizes = [16, 128], strides = [1, 1]} : vector<16x384xf32> to vector<16x128xf32>
    %389 = arith.addf %388, %0 : vector<16x128xf32>
    %390 = arith.mulf %5, %385 : vector<16x128xf32>
    %391 = arith.addf %389, %390 : vector<16x128xf32>
    %392 = arith.mulf %9, %387 : vector<16x128xf32>
    %393 = arith.addf %391, %392 : vector<16x128xf32>
    %394 = math.tanh %393 : vector<16x128xf32>
    %cst_142 = arith.constant 2.000000e+00 : f32
    %395 = vector.broadcast %cst_142 : f32 to vector<16x128xf32>
    %396 = arith.mulf %395, %394 : vector<16x128xf32>
    %397 = arith.addf %378, %396 : vector<16x128xf32>
    %cst_143 = arith.constant 6.250000e-02 : f32
    %398 = vector.broadcast %cst_143 : f32 to vector<16x128xf32>
    %399 = arith.mulf %398, %394 : vector<16x128xf32>
    %400 = arith.addf %365, %399 : vector<16x128xf32>
    %c0_144 = arith.constant 0 : index
    %c0_145 = arith.constant 0 : index
    %401 = vector.load %arg1[%c0_144, %c0_145] : memref<128x384xf32, #tpu.memory_space<vmem>>, vector<128x384xf32>
    %cst_146 = arith.constant dense<0.000000e+00> : vector<16x384xf32>
    %402 = tpu.matmul %400, %401, %cst_146 {dimension_numbers = #tpu.dot_dimension_numbers<[1], [0], [0], [1], [0, 0, 1, 1], [], []>} : vector<16x128xf32>, vector<128x384xf32>, vector<16x384xf32> -> vector<16x384xf32>
    %403 = vector.extract_strided_slice %402 {offsets = [0, 0], sizes = [16, 128], strides = [1, 1]} : vector<16x384xf32> to vector<16x128xf32>
    %c1_i32_147 = arith.constant 1 : i32
    %404 = tpu.dynamic_rotate %403 by %c1_i32_147 dim 0 : vector<16x128xf32>, i32 -> vector<16x128xf32>
    %405 = vector.extract_strided_slice %402 {offsets = [0, 256], sizes = [16, 128], strides = [1, 1]} : vector<16x384xf32> to vector<16x128xf32>
    %c15_i32_148 = arith.constant 15 : i32
    %406 = tpu.dynamic_rotate %405 by %c15_i32_148 dim 0 : vector<16x128xf32>, i32 -> vector<16x128xf32>
    %407 = vector.extract_strided_slice %402 {offsets = [0, 128], sizes = [16, 128], strides = [1, 1]} : vector<16x384xf32> to vector<16x128xf32>
    %408 = arith.addf %407, %0 : vector<16x128xf32>
    %409 = arith.mulf %5, %404 : vector<16x128xf32>
    %410 = arith.addf %408, %409 : vector<16x128xf32>
    %411 = arith.mulf %9, %406 : vector<16x128xf32>
    %412 = arith.addf %410, %411 : vector<16x128xf32>
    %413 = math.tanh %412 : vector<16x128xf32>
    %cst_149 = arith.constant 2.000000e+00 : f32
    %414 = vector.broadcast %cst_149 : f32 to vector<16x128xf32>
    %415 = arith.mulf %414, %413 : vector<16x128xf32>
    %416 = arith.addf %397, %415 : vector<16x128xf32>
    %cst_150 = arith.constant 1.250000e-01 : f32
    %417 = vector.broadcast %cst_150 : f32 to vector<16x128xf32>
    %418 = arith.mulf %417, %413 : vector<16x128xf32>
    %419 = arith.addf %365, %418 : vector<16x128xf32>
    %c0_151 = arith.constant 0 : index
    %c0_152 = arith.constant 0 : index
    %420 = vector.load %arg1[%c0_151, %c0_152] : memref<128x384xf32, #tpu.memory_space<vmem>>, vector<128x384xf32>
    %cst_153 = arith.constant dense<0.000000e+00> : vector<16x384xf32>
    %421 = tpu.matmul %419, %420, %cst_153 {dimension_numbers = #tpu.dot_dimension_numbers<[1], [0], [0], [1], [0, 0, 1, 1], [], []>} : vector<16x128xf32>, vector<128x384xf32>, vector<16x384xf32> -> vector<16x384xf32>
    %422 = vector.extract_strided_slice %421 {offsets = [0, 0], sizes = [16, 128], strides = [1, 1]} : vector<16x384xf32> to vector<16x128xf32>
    %c1_i32_154 = arith.constant 1 : i32
    %423 = tpu.dynamic_rotate %422 by %c1_i32_154 dim 0 : vector<16x128xf32>, i32 -> vector<16x128xf32>
    %424 = vector.extract_strided_slice %421 {offsets = [0, 256], sizes = [16, 128], strides = [1, 1]} : vector<16x384xf32> to vector<16x128xf32>
    %c15_i32_155 = arith.constant 15 : i32
    %425 = tpu.dynamic_rotate %424 by %c15_i32_155 dim 0 : vector<16x128xf32>, i32 -> vector<16x128xf32>
    %426 = vector.extract_strided_slice %421 {offsets = [0, 128], sizes = [16, 128], strides = [1, 1]} : vector<16x384xf32> to vector<16x128xf32>
    %427 = arith.addf %426, %0 : vector<16x128xf32>
    %428 = arith.mulf %5, %423 : vector<16x128xf32>
    %429 = arith.addf %427, %428 : vector<16x128xf32>
    %430 = arith.mulf %9, %425 : vector<16x128xf32>
    %431 = arith.addf %429, %430 : vector<16x128xf32>
    %432 = math.tanh %431 : vector<16x128xf32>
    %433 = arith.addf %416, %432 : vector<16x128xf32>
    %cst_156 = arith.constant 0.020833334 : f32
    %434 = vector.broadcast %cst_156 : f32 to vector<16x128xf32>
    %435 = arith.mulf %434, %433 : vector<16x128xf32>
    %436 = arith.addf %365, %435 : vector<16x128xf32>
    %c0_157 = arith.constant 0 : index
    %c0_158 = arith.constant 0 : index
    %437 = vector.load %arg1[%c0_157, %c0_158] : memref<128x384xf32, #tpu.memory_space<vmem>>, vector<128x384xf32>
    %cst_159 = arith.constant dense<0.000000e+00> : vector<16x384xf32>
    %438 = tpu.matmul %436, %437, %cst_159 {dimension_numbers = #tpu.dot_dimension_numbers<[1], [0], [0], [1], [0, 0, 1, 1], [], []>} : vector<16x128xf32>, vector<128x384xf32>, vector<16x384xf32> -> vector<16x384xf32>
    %439 = vector.extract_strided_slice %438 {offsets = [0, 0], sizes = [16, 128], strides = [1, 1]} : vector<16x384xf32> to vector<16x128xf32>
    %c1_i32_160 = arith.constant 1 : i32
    %440 = tpu.dynamic_rotate %439 by %c1_i32_160 dim 0 : vector<16x128xf32>, i32 -> vector<16x128xf32>
    %441 = vector.extract_strided_slice %438 {offsets = [0, 256], sizes = [16, 128], strides = [1, 1]} : vector<16x384xf32> to vector<16x128xf32>
    %c15_i32_161 = arith.constant 15 : i32
    %442 = tpu.dynamic_rotate %441 by %c15_i32_161 dim 0 : vector<16x128xf32>, i32 -> vector<16x128xf32>
    %443 = vector.extract_strided_slice %438 {offsets = [0, 128], sizes = [16, 128], strides = [1, 1]} : vector<16x384xf32> to vector<16x128xf32>
    %444 = arith.addf %443, %0 : vector<16x128xf32>
    %445 = arith.mulf %5, %440 : vector<16x128xf32>
    %446 = arith.addf %444, %445 : vector<16x128xf32>
    %447 = arith.mulf %9, %442 : vector<16x128xf32>
    %448 = arith.addf %446, %447 : vector<16x128xf32>
    %449 = math.tanh %448 : vector<16x128xf32>
    %cst_162 = arith.constant 6.250000e-02 : f32
    %450 = vector.broadcast %cst_162 : f32 to vector<16x128xf32>
    %451 = arith.mulf %450, %449 : vector<16x128xf32>
    %452 = arith.addf %436, %451 : vector<16x128xf32>
    %c0_163 = arith.constant 0 : index
    %c0_164 = arith.constant 0 : index
    %453 = vector.load %arg1[%c0_163, %c0_164] : memref<128x384xf32, #tpu.memory_space<vmem>>, vector<128x384xf32>
    %cst_165 = arith.constant dense<0.000000e+00> : vector<16x384xf32>
    %454 = tpu.matmul %452, %453, %cst_165 {dimension_numbers = #tpu.dot_dimension_numbers<[1], [0], [0], [1], [0, 0, 1, 1], [], []>} : vector<16x128xf32>, vector<128x384xf32>, vector<16x384xf32> -> vector<16x384xf32>
    %455 = vector.extract_strided_slice %454 {offsets = [0, 0], sizes = [16, 128], strides = [1, 1]} : vector<16x384xf32> to vector<16x128xf32>
    %c1_i32_166 = arith.constant 1 : i32
    %456 = tpu.dynamic_rotate %455 by %c1_i32_166 dim 0 : vector<16x128xf32>, i32 -> vector<16x128xf32>
    %457 = vector.extract_strided_slice %454 {offsets = [0, 256], sizes = [16, 128], strides = [1, 1]} : vector<16x384xf32> to vector<16x128xf32>
    %c15_i32_167 = arith.constant 15 : i32
    %458 = tpu.dynamic_rotate %457 by %c15_i32_167 dim 0 : vector<16x128xf32>, i32 -> vector<16x128xf32>
    %459 = vector.extract_strided_slice %454 {offsets = [0, 128], sizes = [16, 128], strides = [1, 1]} : vector<16x384xf32> to vector<16x128xf32>
    %460 = arith.addf %459, %0 : vector<16x128xf32>
    %461 = arith.mulf %5, %456 : vector<16x128xf32>
    %462 = arith.addf %460, %461 : vector<16x128xf32>
    %463 = arith.mulf %9, %458 : vector<16x128xf32>
    %464 = arith.addf %462, %463 : vector<16x128xf32>
    %465 = math.tanh %464 : vector<16x128xf32>
    %cst_168 = arith.constant 2.000000e+00 : f32
    %466 = vector.broadcast %cst_168 : f32 to vector<16x128xf32>
    %467 = arith.mulf %466, %465 : vector<16x128xf32>
    %468 = arith.addf %449, %467 : vector<16x128xf32>
    %cst_169 = arith.constant 6.250000e-02 : f32
    %469 = vector.broadcast %cst_169 : f32 to vector<16x128xf32>
    %470 = arith.mulf %469, %465 : vector<16x128xf32>
    %471 = arith.addf %436, %470 : vector<16x128xf32>
    %c0_170 = arith.constant 0 : index
    %c0_171 = arith.constant 0 : index
    %472 = vector.load %arg1[%c0_170, %c0_171] : memref<128x384xf32, #tpu.memory_space<vmem>>, vector<128x384xf32>
    %cst_172 = arith.constant dense<0.000000e+00> : vector<16x384xf32>
    %473 = tpu.matmul %471, %472, %cst_172 {dimension_numbers = #tpu.dot_dimension_numbers<[1], [0], [0], [1], [0, 0, 1, 1], [], []>} : vector<16x128xf32>, vector<128x384xf32>, vector<16x384xf32> -> vector<16x384xf32>
    %474 = vector.extract_strided_slice %473 {offsets = [0, 0], sizes = [16, 128], strides = [1, 1]} : vector<16x384xf32> to vector<16x128xf32>
    %c1_i32_173 = arith.constant 1 : i32
    %475 = tpu.dynamic_rotate %474 by %c1_i32_173 dim 0 : vector<16x128xf32>, i32 -> vector<16x128xf32>
    %476 = vector.extract_strided_slice %473 {offsets = [0, 256], sizes = [16, 128], strides = [1, 1]} : vector<16x384xf32> to vector<16x128xf32>
    %c15_i32_174 = arith.constant 15 : i32
    %477 = tpu.dynamic_rotate %476 by %c15_i32_174 dim 0 : vector<16x128xf32>, i32 -> vector<16x128xf32>
    %478 = vector.extract_strided_slice %473 {offsets = [0, 128], sizes = [16, 128], strides = [1, 1]} : vector<16x384xf32> to vector<16x128xf32>
    %479 = arith.addf %478, %0 : vector<16x128xf32>
    %480 = arith.mulf %5, %475 : vector<16x128xf32>
    %481 = arith.addf %479, %480 : vector<16x128xf32>
    %482 = arith.mulf %9, %477 : vector<16x128xf32>
    %483 = arith.addf %481, %482 : vector<16x128xf32>
    %484 = math.tanh %483 : vector<16x128xf32>
    %cst_175 = arith.constant 2.000000e+00 : f32
    %485 = vector.broadcast %cst_175 : f32 to vector<16x128xf32>
    %486 = arith.mulf %485, %484 : vector<16x128xf32>
    %487 = arith.addf %468, %486 : vector<16x128xf32>
    %cst_176 = arith.constant 1.250000e-01 : f32
    %488 = vector.broadcast %cst_176 : f32 to vector<16x128xf32>
    %489 = arith.mulf %488, %484 : vector<16x128xf32>
    %490 = arith.addf %436, %489 : vector<16x128xf32>
    %c0_177 = arith.constant 0 : index
    %c0_178 = arith.constant 0 : index
    %491 = vector.load %arg1[%c0_177, %c0_178] : memref<128x384xf32, #tpu.memory_space<vmem>>, vector<128x384xf32>
    %cst_179 = arith.constant dense<0.000000e+00> : vector<16x384xf32>
    %492 = tpu.matmul %490, %491, %cst_179 {dimension_numbers = #tpu.dot_dimension_numbers<[1], [0], [0], [1], [0, 0, 1, 1], [], []>} : vector<16x128xf32>, vector<128x384xf32>, vector<16x384xf32> -> vector<16x384xf32>
    %493 = vector.extract_strided_slice %492 {offsets = [0, 0], sizes = [16, 128], strides = [1, 1]} : vector<16x384xf32> to vector<16x128xf32>
    %c1_i32_180 = arith.constant 1 : i32
    %494 = tpu.dynamic_rotate %493 by %c1_i32_180 dim 0 : vector<16x128xf32>, i32 -> vector<16x128xf32>
    %495 = vector.extract_strided_slice %492 {offsets = [0, 256], sizes = [16, 128], strides = [1, 1]} : vector<16x384xf32> to vector<16x128xf32>
    %c15_i32_181 = arith.constant 15 : i32
    %496 = tpu.dynamic_rotate %495 by %c15_i32_181 dim 0 : vector<16x128xf32>, i32 -> vector<16x128xf32>
    %497 = vector.extract_strided_slice %492 {offsets = [0, 128], sizes = [16, 128], strides = [1, 1]} : vector<16x384xf32> to vector<16x128xf32>
    %498 = arith.addf %497, %0 : vector<16x128xf32>
    %499 = arith.mulf %5, %494 : vector<16x128xf32>
    %500 = arith.addf %498, %499 : vector<16x128xf32>
    %501 = arith.mulf %9, %496 : vector<16x128xf32>
    %502 = arith.addf %500, %501 : vector<16x128xf32>
    %503 = math.tanh %502 : vector<16x128xf32>
    %504 = arith.addf %487, %503 : vector<16x128xf32>
    %cst_182 = arith.constant 0.020833334 : f32
    %505 = vector.broadcast %cst_182 : f32 to vector<16x128xf32>
    %506 = arith.mulf %505, %504 : vector<16x128xf32>
    %507 = arith.addf %436, %506 : vector<16x128xf32>
    %c0_183 = arith.constant 0 : index
    %c0_184 = arith.constant 0 : index
    %508 = vector.load %arg1[%c0_183, %c0_184] : memref<128x384xf32, #tpu.memory_space<vmem>>, vector<128x384xf32>
    %cst_185 = arith.constant dense<0.000000e+00> : vector<16x384xf32>
    %509 = tpu.matmul %507, %508, %cst_185 {dimension_numbers = #tpu.dot_dimension_numbers<[1], [0], [0], [1], [0, 0, 1, 1], [], []>} : vector<16x128xf32>, vector<128x384xf32>, vector<16x384xf32> -> vector<16x384xf32>
    %510 = vector.extract_strided_slice %509 {offsets = [0, 0], sizes = [16, 128], strides = [1, 1]} : vector<16x384xf32> to vector<16x128xf32>
    %c1_i32_186 = arith.constant 1 : i32
    %511 = tpu.dynamic_rotate %510 by %c1_i32_186 dim 0 : vector<16x128xf32>, i32 -> vector<16x128xf32>
    %512 = vector.extract_strided_slice %509 {offsets = [0, 256], sizes = [16, 128], strides = [1, 1]} : vector<16x384xf32> to vector<16x128xf32>
    %c15_i32_187 = arith.constant 15 : i32
    %513 = tpu.dynamic_rotate %512 by %c15_i32_187 dim 0 : vector<16x128xf32>, i32 -> vector<16x128xf32>
    %514 = vector.extract_strided_slice %509 {offsets = [0, 128], sizes = [16, 128], strides = [1, 1]} : vector<16x384xf32> to vector<16x128xf32>
    %515 = arith.addf %514, %0 : vector<16x128xf32>
    %516 = arith.mulf %5, %511 : vector<16x128xf32>
    %517 = arith.addf %515, %516 : vector<16x128xf32>
    %518 = arith.mulf %9, %513 : vector<16x128xf32>
    %519 = arith.addf %517, %518 : vector<16x128xf32>
    %520 = math.tanh %519 : vector<16x128xf32>
    %cst_188 = arith.constant 6.250000e-02 : f32
    %521 = vector.broadcast %cst_188 : f32 to vector<16x128xf32>
    %522 = arith.mulf %521, %520 : vector<16x128xf32>
    %523 = arith.addf %507, %522 : vector<16x128xf32>
    %c0_189 = arith.constant 0 : index
    %c0_190 = arith.constant 0 : index
    %524 = vector.load %arg1[%c0_189, %c0_190] : memref<128x384xf32, #tpu.memory_space<vmem>>, vector<128x384xf32>
    %cst_191 = arith.constant dense<0.000000e+00> : vector<16x384xf32>
    %525 = tpu.matmul %523, %524, %cst_191 {dimension_numbers = #tpu.dot_dimension_numbers<[1], [0], [0], [1], [0, 0, 1, 1], [], []>} : vector<16x128xf32>, vector<128x384xf32>, vector<16x384xf32> -> vector<16x384xf32>
    %526 = vector.extract_strided_slice %525 {offsets = [0, 0], sizes = [16, 128], strides = [1, 1]} : vector<16x384xf32> to vector<16x128xf32>
    %c1_i32_192 = arith.constant 1 : i32
    %527 = tpu.dynamic_rotate %526 by %c1_i32_192 dim 0 : vector<16x128xf32>, i32 -> vector<16x128xf32>
    %528 = vector.extract_strided_slice %525 {offsets = [0, 256], sizes = [16, 128], strides = [1, 1]} : vector<16x384xf32> to vector<16x128xf32>
    %c15_i32_193 = arith.constant 15 : i32
    %529 = tpu.dynamic_rotate %528 by %c15_i32_193 dim 0 : vector<16x128xf32>, i32 -> vector<16x128xf32>
    %530 = vector.extract_strided_slice %525 {offsets = [0, 128], sizes = [16, 128], strides = [1, 1]} : vector<16x384xf32> to vector<16x128xf32>
    %531 = arith.addf %530, %0 : vector<16x128xf32>
    %532 = arith.mulf %5, %527 : vector<16x128xf32>
    %533 = arith.addf %531, %532 : vector<16x128xf32>
    %534 = arith.mulf %9, %529 : vector<16x128xf32>
    %535 = arith.addf %533, %534 : vector<16x128xf32>
    %536 = math.tanh %535 : vector<16x128xf32>
    %cst_194 = arith.constant 2.000000e+00 : f32
    %537 = vector.broadcast %cst_194 : f32 to vector<16x128xf32>
    %538 = arith.mulf %537, %536 : vector<16x128xf32>
    %539 = arith.addf %520, %538 : vector<16x128xf32>
    %cst_195 = arith.constant 6.250000e-02 : f32
    %540 = vector.broadcast %cst_195 : f32 to vector<16x128xf32>
    %541 = arith.mulf %540, %536 : vector<16x128xf32>
    %542 = arith.addf %507, %541 : vector<16x128xf32>
    %c0_196 = arith.constant 0 : index
    %c0_197 = arith.constant 0 : index
    %543 = vector.load %arg1[%c0_196, %c0_197] : memref<128x384xf32, #tpu.memory_space<vmem>>, vector<128x384xf32>
    %cst_198 = arith.constant dense<0.000000e+00> : vector<16x384xf32>
    %544 = tpu.matmul %542, %543, %cst_198 {dimension_numbers = #tpu.dot_dimension_numbers<[1], [0], [0], [1], [0, 0, 1, 1], [], []>} : vector<16x128xf32>, vector<128x384xf32>, vector<16x384xf32> -> vector<16x384xf32>
    %545 = vector.extract_strided_slice %544 {offsets = [0, 0], sizes = [16, 128], strides = [1, 1]} : vector<16x384xf32> to vector<16x128xf32>
    %c1_i32_199 = arith.constant 1 : i32
    %546 = tpu.dynamic_rotate %545 by %c1_i32_199 dim 0 : vector<16x128xf32>, i32 -> vector<16x128xf32>
    %547 = vector.extract_strided_slice %544 {offsets = [0, 256], sizes = [16, 128], strides = [1, 1]} : vector<16x384xf32> to vector<16x128xf32>
    %c15_i32_200 = arith.constant 15 : i32
    %548 = tpu.dynamic_rotate %547 by %c15_i32_200 dim 0 : vector<16x128xf32>, i32 -> vector<16x128xf32>
    %549 = vector.extract_strided_slice %544 {offsets = [0, 128], sizes = [16, 128], strides = [1, 1]} : vector<16x384xf32> to vector<16x128xf32>
    %550 = arith.addf %549, %0 : vector<16x128xf32>
    %551 = arith.mulf %5, %546 : vector<16x128xf32>
    %552 = arith.addf %550, %551 : vector<16x128xf32>
    %553 = arith.mulf %9, %548 : vector<16x128xf32>
    %554 = arith.addf %552, %553 : vector<16x128xf32>
    %555 = math.tanh %554 : vector<16x128xf32>
    %cst_201 = arith.constant 2.000000e+00 : f32
    %556 = vector.broadcast %cst_201 : f32 to vector<16x128xf32>
    %557 = arith.mulf %556, %555 : vector<16x128xf32>
    %558 = arith.addf %539, %557 : vector<16x128xf32>
    %cst_202 = arith.constant 1.250000e-01 : f32
    %559 = vector.broadcast %cst_202 : f32 to vector<16x128xf32>
    %560 = arith.mulf %559, %555 : vector<16x128xf32>
    %561 = arith.addf %507, %560 : vector<16x128xf32>
    %c0_203 = arith.constant 0 : index
    %c0_204 = arith.constant 0 : index
    %562 = vector.load %arg1[%c0_203, %c0_204] : memref<128x384xf32, #tpu.memory_space<vmem>>, vector<128x384xf32>
    %cst_205 = arith.constant dense<0.000000e+00> : vector<16x384xf32>
    %563 = tpu.matmul %561, %562, %cst_205 {dimension_numbers = #tpu.dot_dimension_numbers<[1], [0], [0], [1], [0, 0, 1, 1], [], []>} : vector<16x128xf32>, vector<128x384xf32>, vector<16x384xf32> -> vector<16x384xf32>
    %564 = vector.extract_strided_slice %563 {offsets = [0, 0], sizes = [16, 128], strides = [1, 1]} : vector<16x384xf32> to vector<16x128xf32>
    %c1_i32_206 = arith.constant 1 : i32
    %565 = tpu.dynamic_rotate %564 by %c1_i32_206 dim 0 : vector<16x128xf32>, i32 -> vector<16x128xf32>
    %566 = vector.extract_strided_slice %563 {offsets = [0, 256], sizes = [16, 128], strides = [1, 1]} : vector<16x384xf32> to vector<16x128xf32>
    %c15_i32_207 = arith.constant 15 : i32
    %567 = tpu.dynamic_rotate %566 by %c15_i32_207 dim 0 : vector<16x128xf32>, i32 -> vector<16x128xf32>
    %568 = vector.extract_strided_slice %563 {offsets = [0, 128], sizes = [16, 128], strides = [1, 1]} : vector<16x384xf32> to vector<16x128xf32>
    %569 = arith.addf %568, %0 : vector<16x128xf32>
    %570 = arith.mulf %5, %565 : vector<16x128xf32>
    %571 = arith.addf %569, %570 : vector<16x128xf32>
    %572 = arith.mulf %9, %567 : vector<16x128xf32>
    %573 = arith.addf %571, %572 : vector<16x128xf32>
    %574 = math.tanh %573 : vector<16x128xf32>
    %575 = arith.addf %558, %574 : vector<16x128xf32>
    %cst_208 = arith.constant 0.020833334 : f32
    %576 = vector.broadcast %cst_208 : f32 to vector<16x128xf32>
    %577 = arith.mulf %576, %575 : vector<16x128xf32>
    %578 = arith.addf %507, %577 : vector<16x128xf32>
    %c0_209 = arith.constant 0 : index
    %c0_210 = arith.constant 0 : index
    %579 = vector.load %arg3[%c0_209, %c0_210] : memref<16x128xf32, #tpu.memory_space<vmem>>, vector<16x128xf32>
    tpu.vector_store %arg3[%c0_209, %c0_210], %578 {strides = array<i32>} : memref<16x128xf32, #tpu.memory_space<vmem>>, vector<16x128xf32>,
    return
  }
}

</mosaic_0001>

<bundles_post_ra>
// kernel: tpu_custom_call.1
= control target key start
LH: loop header
LB: loop body
LE: loop exit
PB: predicated region body
PF: predicated region fallthrough
CT: control target
= control target key end

     0   :  { %8 = vsyncpa [#allocation3], 0  ;;  %s11772_s0 = inlined_call_operand.hbm [shape: f32[16,128], index: 0, kind: input, shape index: {}]   ;;  %s11773_s1 = inlined_call_operand.hbm [shape: f32[128,384], index: 1, kind: input, shape index: {}]   ;;  %s11774_s2 = inlined_call_operand.hbm [shape: f32[16,128], index: 2, kind: input, shape index: {}]   ;;  %s11775_s3 = inlined_call_operand.hbm [shape: f32[16,128], index: 3, kind: output, shape index: {}]  }
   0x1   :  { %9 = vsyncpa [#allocation6], 0 }
   0x2   :  { %10 = vsyncpa [#allocation4], 0  ;;  %s9840_s12 = smov [#allocation5]   ;;  %s9746_s16 = scalar_lea.hbm %s11773_s1, 6144 }
   0x3   :  { %s28_s13 = sshll.u32 %s9840_s12, 4  ;;  %p9747_p0 = scmp.ne.s32.totalorder %s11773_s1, %s9746_s16  ;;  %s29_s13 = int_to_ptr.vmem [resolvable:$true] %s28_s13 }
   0x4   :  { %p9750_p1 = scmp.lt.u32.totalorder %s9746_s16, %s11773_s1 }
   0x6   :  { %p9752_p2 = pnand %p9750_p1, %p9747_p0 }
   0x8   :  { %9755 = shalt.err (!%p9752_p2)
}
   0x9   :  { %s9756_s21 = scalar_lea.vmem %s29_s13, 6144  ;;  %p9761_p4 = scmp.lt.s32.totalorder %s29_s13, %s29_s13 }
   0xa   :  { %p9757_p3 = scmp.ne.s32.totalorder %s29_s13, %s9756_s21  ;;  %p9762_p5 = scmp.lt.s32.totalorder %s9756_s21, %s9756_s21 }
   0xc   :  { %p9763_p6 = por %p9762_p5, %p9761_p4 }
   0xe   :  { %p9764_p7 = pnand %p9763_p6, %p9757_p3 }
  0x10   :  { %9767 = shalt.err (!%p9764_p7)
}
  0x11   :  { %s9841_s22 = smov 384   ;;  %s9842_s23 = smov 24  }
  0x12   :  { %34 = dma.hbm_to_vmem [thread:$0]  %s11773_s1, 6144, %s29_s13, [#allocation6], %s9841_s22, %s9841_s22, %s9842_s23  }
  0x13   :  { %s9843_s26 = smov [#allocation2]   ;;  %s9768_s30 = scalar_lea.hbm %s11772_s0, 256 }
  0x14   :  { %s16_s27 = sshll.u32 %s9843_s26, 4  ;;  %p9769_p8 = scmp.ne.s32.totalorder %s11772_s0, %s9768_s30  ;;  %s17_s27 = int_to_ptr.vmem [resolvable:$true] %s16_s27 }
  0x15   :  { %p9772_p9 = scmp.lt.u32.totalorder %s9768_s30, %s11772_s0 }
  0x17   :  { %p9774_p10 = pnand %p9772_p9, %p9769_p8 }
  0x19   :  { %9777 = shalt.err (!%p9774_p10)
}
  0x1a   :  { %s9778_s8 = scalar_lea.vmem %s17_s27, 256  ;;  %p9783_p12 = scmp.lt.s32.totalorder %s17_s27, %s17_s27 }
  0x1b   :  { %p9779_p11 = scmp.ne.s32.totalorder %s17_s27, %s9778_s8  ;;  %p9784_p13 = scmp.lt.s32.totalorder %s9778_s8, %s9778_s8 }
  0x1d   :  { %p9785_p0 = por %p9784_p13, %p9783_p12 }
  0x1f   :  { %p9786_p1 = pnand %p9785_p0, %p9779_p11 }
  0x21   :  { %9789 = shalt.err (!%p9786_p1)
}
  0x22   :  { %s9844_s1 = smov 128   ;;  %s9845_s9 = smov 8  }
  0x23   :  { %22 = dma.hbm_to_vmem [thread:$0]  %s11772_s0, 256, %s17_s27, [#allocation3], %s9844_s1, %s9844_s1, %s9845_s9  }
  0x24   :  { %s9846_s12 = smov [#allocation7]   ;;  %s9790_s16 = scalar_lea.hbm %s11774_s2, 256 }
  0x25   :  { %s40_s13 = sshll.u32 %s9846_s12, 4  ;;  %p9791_p2 = scmp.ne.s32.totalorder %s11774_s2, %s9790_s16  ;;  %s41_s13 = int_to_ptr.vmem [resolvable:$true] %s40_s13 }
  0x26   :  { %p9794_p3 = scmp.lt.u32.totalorder %s9790_s16, %s11774_s2 }
  0x28   :  { %p9796_p4 = pnand %p9794_p3, %p9791_p2 }
  0x2a   :  { %9799 = shalt.err (!%p9796_p4)
}
  0x2b   :  { %s9800_s21 = scalar_lea.vmem %s41_s13, 256  ;;  %p9805_p6 = scmp.lt.s32.totalorder %s41_s13, %s41_s13 }
  0x2c   :  { %p9801_p5 = scmp.ne.s32.totalorder %s41_s13, %s9800_s21  ;;  %p9806_p7 = scmp.lt.s32.totalorder %s9800_s21, %s9800_s21 }
  0x2e   :  { %p9807_p8 = por %p9806_p7, %p9805_p6 }
  0x30   :  { %p9808_p9 = pnand %p9807_p8, %p9801_p5 }
  0x32   :  { %9811 = shalt.err (!%p9808_p9)
}
  0x33   :  { %46 = dma.hbm_to_vmem [thread:$0]  %s11774_s2, 256, %s41_s13, [#allocation6], %s9844_s1, %s9844_s1, %s9845_s9  }
  0x34   :  { %9834 = dma.done.wait [#allocation3], 256  }
  0x35   :  { %9835 = vsyncadd [#allocation3], 4294967040 }
  0x36   :  { %9836 = dma.done.wait [#allocation6], 6400  }
  0x37   :  { %9837 = vsyncadd [#allocation6], 4294960896  ;;  %v9847_v0 = vmov 0.0   ;;  %v76_v1 = vld [vmem:[#allocation5 + $0x8] sm:$0xff]  ;;  %v79_v2 = vld [vmem:[#allocation5 + $0x20] sm:$0xff]  ;;  %s9848_s2 = smov [#allocation8]  }
  0x38   :  { %187 = vmatprep.mubr.f32.mxu0 %v9847_v0  ;;  %v75_v3 = vld [vmem:[#allocation5] sm:$0xff]  ;;  %v9912_v4 = vpack.c.bf16 %v79_v2, %v76_v1  ;;  %v78_v5 = vld [vmem:[#allocation5 + $0x18] sm:$0xff]  ;;  %v77_v6 = vld [vmem:[#allocation5 + $0x10] sm:$0xff]  ;;  %s5844_s23 = sshll.u32 %s9848_s2, 4  ;;  %s5845_s23 = int_to_ptr.vmem [resolvable:$true] %s5844_s23 }
  0x39   :  { %v80_v7 = vld [vmem:[#allocation5 + $0x28] sm:$0xff]  ;;  %v9914_v8 = vpack.c.bf16 %v78_v5, %v75_v3  ;;  %v82_v10 = vld [vmem:[#allocation5 + $0x38] sm:$0xff]  ;;  %v85_v11 = vld [vmem:[#allocation5 + $0x50] sm:$0xff]  ;;  %s9812_s24 = scalar_lea.vmem %s5845_s23, 256  ;;  %p9817_p11 = scmp.lt.s32.totalorder %s5845_s23, %s5845_s23 }
  0x3a   :  { %v9916_v9 = vpack.c.bf16 %v80_v7, %v77_v6  ;;  %v81_v12 = vld [vmem:[#allocation5 + $0x30] sm:$0xff]  ;;  %7556 = vmatprep.subr.bf16.mxu0 %v9912_v4  ;;  %v9919_v13 = vpack.c.bf16 %v85_v11, %v82_v10  ;;  %v84_v14 = vld [vmem:[#allocation5 + $0x48] sm:$0xff]  ;;  %v83_v15 = vld [vmem:[#allocation5 + $0x40] sm:$0xff]  ;;  %p9813_p10 = scmp.ne.s32.totalorder %s5845_s23, %s9812_s24  ;;  %p9818_p12 = scmp.lt.s32.totalorder %s9812_s24, %s9812_s24 }
  0x3b   :  { %v86_v16 = vld [vmem:[#allocation5 + $0x58] sm:$0xff]  ;;  %7558 = vmatpush1.bf16.msra.mxu0 %v9914_v8  ;;  %v9923_v17 = vpack.c.bf16 %v84_v14, %v81_v12  ;;  %v88_v19 = vld [vmem:[#allocation5 + $0x68] sm:$0xff]  ;;  %v91_v20 = vld [vmem:[#allocation5 + $0x80] sm:$0xff] }
  0x3c   :  { %7588 = vmatprep.subr.bf16.mxu1 %v9916_v9  ;;  %v9925_v18 = vpack.c.bf16 %v86_v16, %v83_v15  ;;  %v87_v21 = vld [vmem:[#allocation5 + $0x60] sm:$0xff]  ;;  %7560 = vmatprep.subr.bf16.mxu0 %v9919_v13  ;;  %v9929_v22 = vpack.c.bf16 %v91_v20, %v88_v19  ;;  %v90_v23 = vld [vmem:[#allocation5 + $0x78] sm:$0xff]  ;;  %v89_v24 = vld [vmem:[#allocation5 + $0x70] sm:$0xff]  ;;  %v58_v16 = vlaneseq  ;;  %p9819_p13 = por %p9818_p12, %p9817_p11 }
  0x3d   :  { %7590 = vmatpush3.bf16.msra.mxu1 %v9916_v9  ;;  %v92_v25 = vld [vmem:[#allocation5 + $0x88] sm:$0xff]  ;;  %v94_v27 = vld [vmem:[#allocation5 + $0x98] sm:$0xff]  ;;  %v97_v28 = vld [vmem:[#allocation5 + $0xb0] sm:$0xff]  ;;  %v9935_v31 = vpack.c.bf16 %v90_v23, %v87_v21 }
  0x3e   :  { %7592 = vmatprep.subr.bf16.mxu1 %v9925_v18  ;;  %v9932_v26 = vpack.c.bf16 %v92_v25, %v89_v24  ;;  %v95_v29 = vld [vmem:[#allocation5 + $0xa0] sm:$0xff]  ;;  %v98_v30 = vld [vmem:[#allocation5 + $0xb8] sm:$0xff]  ;;  %v9939_v32 = vpack.c.bf16 %v97_v28, %v94_v27  ;;  %v93_v33 = vld [vmem:[#allocation5 + $0x90] sm:$0xff]  ;;  %v10036_v19 = vshrl.u32 %v58_v16, 7  ;;  %p9820_p0 = pnand %p9819_p13, %p9813_p10 }
  0x3f   :  { %7562 = vmatpush1.bf16.msra.mxu0 %v9923_v17  ;;  %v96_v34 = vld [vmem:[#allocation5 + $0xa8] sm:$0xff]  ;;  %v9942_v35 = vpack.c.bf16 %v98_v30, %v95_v29  ;;  %v103_v37 = vld [vmem:[#allocation5 + $0xe0] sm:$0xff]  ;;  %v101_v38 = vld [vmem:[#allocation5 + $0xd0] sm:$0xff] }
  0x40   :  { %7564 = vmatprep.subr.bf16.mxu0 %v9929_v22  ;;  %v100_v36 = vld [vmem:[#allocation5 + $0xc8] sm:$0xff]  ;;  %v9945_v40 = vpack.c.bf16 %v96_v34, %v93_v33  ;;  %v99_v42 = vld [vmem:[#allocation5 + $0xc0] sm:$0xff]  ;;  %v102_v43 = vld [vmem:[#allocation5 + $0xd8] sm:$0xff]  ;;  %v60_v20 = vadd.s32 8, %v10036_v19  ;;  %vm61_vm1 = vcmp.gt.s32.totalorder %v10036_v19, 0  ;;  %vm282_vm2 = vcmp.lt.s32.totalorder %v10036_v19, 7 }
  0x41   :  { %7594 = vmatpush3.bf16.msra.mxu1 %v9925_v18  ;;  %v104_v39 = vld [vmem:[#allocation5 + $0xe8] sm:$0xff]  ;;  %v9949_v41 = vpack.c.bf16 %v103_v37, %v100_v36  ;;  %v106_v45 = vld [vmem:[#allocation5 + $0xf8] sm:$0xff]  ;;  %v109_v46 = vld [vmem:[#allocation5 + $0x110] sm:$0xff]  ;;  %v9955_v49 = vpack.c.bf16 %v102_v43, %v99_v42  ;;  %v10047_v33 = vsel %vm61_vm1, 1.0, %v9847_v0  ;;  %vm277_vm3 = vcmp.lt.s32.totalorder %v10036_v19, 1 }
  0x42   :  { %7596 = vmatprep.subr.bf16.mxu1 %v9932_v26  ;;  %v9952_v44 = vpack.c.bf16 %v104_v39, %v101_v38  ;;  %v107_v47 = vld [vmem:[#allocation5 + $0x100] sm:$0xff]  ;;  %v110_v48 = vld [vmem:[#allocation5 + $0x118] sm:$0xff]  ;;  %v9959_v50 = vpack.c.bf16 %v109_v46, %v106_v45  ;;  %v105_v51 = vld [vmem:[#allocation5 + $0xf0] sm:$0xff]  ;;  %vm68_vm0 = vcmp.lt.s32.totalorder %v60_v20, 15 }
  0x43   :  { %7566 = vmatpush1.bf16.msra.mxu0 %v9935_v31  ;;  %v108_v52 = vld [vmem:[#allocation5 + $0x108] sm:$0xff]  ;;  %v9961_v53 = vld [vmem:[#allocation2] sm:$0xff]  ;;  %v9964_v54 = vpack.c.bf16 %v110_v48, %v107_v47  ;;  %v115_v56 = vld [vmem:[#allocation5 + $0x140] sm:$0xff]  ;;  %v10042_v28 = vsel %vm68_vm0, 1.0, %v9847_v0 }
  0x44   :  { %7568 = vmatprep.subr.bf16.mxu0 %v9939_v32  ;;  %v112_v55 = vld [vmem:[#allocation5 + $0x128] sm:$0xff]  ;;  %6467 = vmatprep.mubr.f32.mxu1 %v9961_v53  ;;  %v113_v57 = vld [vmem:[#allocation5 + $0x130] sm:$0xff]  ;;  %v9968_v59 = vpack.c.bf16 %v108_v52, %v105_v51  ;;  %v111_v61 = vld [vmem:[#allocation5 + $0x120] sm:$0xff] }
  0x45   :  { %7598 = vmatpush3.bf16.msra.mxu1 %v9932_v26  ;;  %v116_v58 = vld [vmem:[#allocation5 + $0x148] sm:$0xff]  ;;  %v9972_v60 = vpack.c.bf16 %v115_v56, %v112_v55  ;;  %v114_v62 = vld [vmem:[#allocation5 + $0x138] sm:$0xff]  ;;  %v121_v2 = vld [vmem:[#allocation5 + $0x170] sm:$0xff] }
  0x46   :  { %7600 = vmatprep.subr.bf16.mxu1 %v9942_v35  ;;  %v9975_v63 = vpack.c.bf16 %v116_v58, %v113_v57  ;;  %v118_v1 = vld [vmem:[#allocation5 + $0x158] sm:$0xff]  ;;  %v119_v3 = vld [vmem:[#allocation5 + $0x160] sm:$0xff]  ;;  %v9978_v6 = vpack.c.bf16 %v114_v62, %v111_v61  ;;  %v117_v10 = vld [vmem:[#allocation5 + $0x150] sm:$0xff] }
  0x47   :  { %7570 = vmatpush1.bf16.msra.mxu0 %v9945_v40  ;;  %v122_v5 = vld [vmem:[#allocation5 + $0x178] sm:$0xff]  ;;  %v9982_v7 = vpack.c.bf16 %v121_v2, %v118_v1  ;;  %v120_v11 = vld [vmem:[#allocation5 + $0x168] sm:$0xff]  ;;  %v10050_v37 = vld [vmem:[#allocation7] sm:$0xff] }
  0x48   :  { %7572 = vmatprep.subr.bf16.mxu0 %v9949_v41  ;;  %v9985_v12 = vpack.c.bf16 %v122_v5, %v119_v3  ;;  %v9988_v14 = vpack.c.bf16 %v120_v11, %v117_v10  ;;  %v9995_v15 = vld [vmem:[#allocation2 + $0x8] sm:$0xff]  ;;  %v10044_v30 = vld [vmem:[#allocation7 + $0x8] sm:$0xff] }
  0x49   :  { %7602 = vmatpush3.bf16.msra.mxu1 %v9942_v35 }
  0x4a   :  { %7604 = vmatprep.subr.bf16.mxu1 %v9952_v44 }
  0x4b   :  { %7574 = vmatpush1.bf16.msra.mxu0 %v9955_v49 }
  0x4c   :  { %7576 = vmatprep.subr.bf16.mxu0 %v9959_v50 }
  0x4d   :  { %7606 = vmatpush3.bf16.msra.mxu1 %v9952_v44 }
  0x4e   :  { %7608 = vmatprep.subr.bf16.mxu1 %v9964_v54 }
  0x4f   :  { %7578 = vmatpush1.bf16.msra.mxu0 %v9968_v59 }
  0x50   :  { %7580 = vmatprep.subr.bf16.mxu0 %v9972_v60 }
  0x51   :  { %7610 = vmatpush3.bf16.msra.mxu1 %v9964_v54 }
  0x52   :  { %7612 = vmatprep.subr.bf16.mxu1 %v9975_v63 }
  0x53   :  { %7582 = vmatpush1.bf16.msra.mxu0 %v9978_v6 }
  0x54   :  { %7584 = vmatprep.subr.bf16.mxu0 %v9982_v7 }
  0x55   :  { %7614 = vmatpush3.bf16.msra.mxu1 %v9975_v63 }
  0x56   :  { %7616 = vmatprep.subr.bf16.mxu1 %v9985_v12 }
  0x57   :  { %7586 = vmatpush1.bf16.msra.mxu0 %v9988_v14 }
  0x58   :  { %7620 = vmatprep.subr.bf16.mxu0 %v9912_v4 }
  0x59   :  { %7618 = vmatpush3.bf16.msra.mxu1 %v9985_v12 }
  0x5a   :  { %7652 = vmatprep.subr.bf16.mxu1 %v9916_v9  ;;  %188 = vmatmul.mubr.f32.vlgmr.msra.gmra.mrb[0].mxu0 %v9961_v53 }
  0x5b   :  { %193 = vmatprep.mubr.f32.mxu0 %v9847_v0  ;;  %7622 = vmatpush1.bf16.msra.mxu0 %v9914_v8 }
  0x5c   :  { %6468 = vmatmul.mubr.f32.vlgmr.msra.gmra.mrb[0].mxu1 %v9995_v15  ;;  %7624 = vmatprep.subr.bf16.mxu0 %v9919_v13 }
  0x5d   :  { %7654 = vmatpush3.bf16.msra.mxu1 %v9916_v9 }
  0x5e   :  { %7656 = vmatprep.subr.bf16.mxu1 %v9925_v18  ;;  %194 = vmatmul.mubr.f32.gmra.mrb[2].mxu0 %v9995_v15 }
  0x5f   :  { %365 = vmatprep.mubr.f32.mxu0 %v9847_v0  ;;  %7626 = vmatpush1.bf16.msra.mxu0 %v9923_v17 }
  0x60   :  { %7628 = vmatprep.subr.bf16.mxu0 %v9929_v22 }
  0x61   :  { %7658 = vmatpush3.bf16.msra.mxu1 %v9925_v18 }
  0x62   :  { %7660 = vmatprep.subr.bf16.mxu1 %v9932_v26 }
  0x63   :  { %7630 = vmatpush1.bf16.msra.mxu0 %v9935_v31 }
  0x64   :  { %7632 = vmatprep.subr.bf16.mxu0 %v9939_v32 }
  0x65   :  { %7662 = vmatpush3.bf16.msra.mxu1 %v9932_v26 }
  0x66   :  { %7664 = vmatprep.subr.bf16.mxu1 %v9942_v35 }
  0x67   :  { %7634 = vmatpush1.bf16.msra.mxu0 %v9945_v40 }
  0x68   :  { %7636 = vmatprep.subr.bf16.mxu0 %v9949_v41 }
  0x69   :  { %7666 = vmatpush3.bf16.msra.mxu1 %v9942_v35 }
  0x6a   :  { %7668 = vmatprep.subr.bf16.mxu1 %v9952_v44 }
  0x6b   :  { %7638 = vmatpush1.bf16.msra.mxu0 %v9955_v49 }
  0x6c   :  { %7640 = vmatprep.subr.bf16.mxu0 %v9959_v50 }
  0x6d   :  { %7670 = vmatpush3.bf16.msra.mxu1 %v9952_v44 }
  0x6e   :  { %7672 = vmatprep.subr.bf16.mxu1 %v9964_v54 }
  0x6f   :  { %7642 = vmatpush1.bf16.msra.mxu0 %v9968_v59 }
  0x70   :  { %7644 = vmatprep.subr.bf16.mxu0 %v9972_v60 }
  0x71   :  { %7674 = vmatpush3.bf16.msra.mxu1 %v9964_v54 }
  0x72   :  { %7676 = vmatprep.subr.bf16.mxu1 %v9975_v63 }
  0x73   :  { %7646 = vmatpush1.bf16.msra.mxu0 %v9978_v6 }
  0x74   :  { %7648 = vmatprep.subr.bf16.mxu0 %v9982_v7 }
  0x75   :  { %7678 = vmatpush3.bf16.msra.mxu1 %v9975_v63 }
  0x76   :  { %7680 = vmatprep.subr.bf16.mxu1 %v9985_v12 }
  0x77   :  { %7650 = vmatpush1.bf16.msra.mxu0 %v9988_v14 }
  0x78   :  { %7684 = vmatprep.subr.bf16.mxu0 %v9912_v4 }
  0x79   :  { %7682 = vmatpush3.bf16.msra.mxu1 %v9985_v12 }
  0x7a   :  { %7716 = vmatprep.subr.bf16.mxu1 %v9916_v9 }
 0x12d   :  { %v189_v21 = vpop.f32.mrb[0].mxu0 }
 0x12e   :  { %v191_v23 = vpop.f32.mrb[1].mxu0  ;;  %v275_v36 = vrot.slane %v189_v21, 7 }
 0x12f   :  { %v6469_v24 = vpop.f32.mrb[0].mxu1  ;;  %v285_v51 = vadd.f32 %v191_v23, %v10050_v37 }
 0x130   :  { %v281_v25 = vrot.slane %v6469_v24, 1  ;;  %v266_v27 = vpop.f32.mrb[1].mxu1 }
 0x131   :  { %v280_v29 = vrot.slane %v266_v27, 1  ;;  %v195_v34 = vpop.f32.mrb[2].mxu0 }
 0x132   :  { %v276_v38 = vrot.slane %v195_v34, 7  ;;  %v197_v43 = vpop.f32.mrb[3].mxu0 }
 0x133   :  { %v283_v39 = vsel %vm282_vm2, %v280_v29, %v281_v25  ;;  %v284_v42 = vsel %vm282_vm2, %v281_v25, %v280_v29  ;;  %v286_v46 = vadd.f32 %v197_v43, %v10044_v30 }
 0x134   :  { %v292_v45 = vmul.f32 %v10042_v28, %v284_v42  ;;  %v279_v47 = vsel %vm277_vm3, %v276_v38, %v275_v36  ;;  %v278_v48 = vsel %vm277_vm3, %v275_v36, %v276_v38 }
 0x135   :  { %v287_v52 = vmul.f32 %v10047_v33, %v279_v47  ;;  %v290_v55 = vadd.f32 %v286_v46, %v278_v48 }
 0x137   :  { %v289_v56 = vadd.f32 %v287_v52, %v285_v51  ;;  %v294_v57 = vadd.f32 %v292_v45, %v290_v55 }
 0x139   :  { %v293_v58 = vadd.f32 %v289_v56, %v283_v39  ;;  %9612 = vtanh.f32 %v294_v57 }
 0x13b   :  { %9614 = vtanh.f32 %v293_v58 }
 0x143   :  { %v10064_v61 = vpop.eup %9612 }
 0x144   :  { %v298_v1 = vmul.f32 0.0625, %v10064_v61 }
 0x145   :  { %v10066_v62 = vpop.eup %9614 }
 0x146   :  { %v297_v2 = vmul.f32 0.0625, %v10066_v62  ;;  %v300_v5 = vadd.f32 %v298_v1, %v9995_v15 }
 0x148   :  { %v299_v3 = vadd.f32 %v297_v2, %v9961_v53 }
 0x14a   :  { %366 = vmatmul.mubr.f32.vlgmr.msra.gmra.mrb[4].mxu0 %v299_v3  ;;  %6502 = vmatprep.mubr.f32.mxu1 %v299_v3 }
 0x14b   :  { %6503 = vmatmul.mubr.f32.vlgmr.msra.gmra.mrb[2].mxu1 %v300_v5  ;;  %371 = vmatprep.mubr.f32.mxu0 %v9847_v0 }
 0x14c   :  { %7686 = vmatpush1.bf16.msra.mxu0 %v9914_v8  ;;  %7718 = vmatpush3.bf16.msra.mxu1 %v9916_v9 }
 0x14d   :  { %7688 = vmatprep.subr.bf16.mxu0 %v9919_v13  ;;  %7720 = vmatprep.subr.bf16.mxu1 %v9925_v18 }
 0x14e   :  { %372 = vmatmul.mubr.f32.gmra.mrb[6].mxu0 %v300_v5 }
 0x14f   :  { %545 = vmatprep.mubr.f32.mxu0 %v9847_v0 }
 0x150   :  { %7690 = vmatpush1.bf16.msra.mxu0 %v9923_v17  ;;  %7722 = vmatpush3.bf16.msra.mxu1 %v9925_v18 }
 0x151   :  { %7692 = vmatprep.subr.bf16.mxu0 %v9929_v22  ;;  %7724 = vmatprep.subr.bf16.mxu1 %v9932_v26 }
 0x154   :  { %7694 = vmatpush1.bf16.msra.mxu0 %v9935_v31  ;;  %7726 = vmatpush3.bf16.msra.mxu1 %v9932_v26 }
 0x155   :  { %7696 = vmatprep.subr.bf16.mxu0 %v9939_v32  ;;  %7728 = vmatprep.subr.bf16.mxu1 %v9942_v35 }
 0x158   :  { %7698 = vmatpush1.bf16.msra.mxu0 %v9945_v40  ;;  %7730 = vmatpush3.bf16.msra.mxu1 %v9942_v35 }
 0x159   :  { %7700 = vmatprep.subr.bf16.mxu0 %v9949_v41  ;;  %7732 = vmatprep.subr.bf16.mxu1 %v9952_v44 }
 0x15c   :  { %7702 = vmatpush1.bf16.msra.mxu0 %v9955_v49  ;;  %7734 = vmatpush3.bf16.msra.mxu1 %v9952_v44 }
 0x15d   :  { %7704 = vmatprep.subr.bf16.mxu0 %v9959_v50  ;;  %7736 = vmatprep.subr.bf16.mxu1 %v9964_v54 }
 0x160   :  { %7706 = vmatpush1.bf16.msra.mxu0 %v9968_v59  ;;  %7738 = vmatpush3.bf16.msra.mxu1 %v9964_v54 }
 0x161   :  { %7708 = vmatprep.subr.bf16.mxu0 %v9972_v60  ;;  %7740 = vmatprep.subr.bf16.mxu1 %v9975_v63 }
 0x164   :  { %7710 = vmatpush1.bf16.msra.mxu0 %v9978_v6  ;;  %7742 = vmatpush3.bf16.msra.mxu1 %v9975_v63 }
 0x165   :  { %7712 = vmatprep.subr.bf16.mxu0 %v9982_v7  ;;  %7744 = vmatprep.subr.bf16.mxu1 %v9985_v12 }
 0x168   :  { %7714 = vmatpush1.bf16.msra.mxu0 %v9988_v14  ;;  %7746 = vmatpush3.bf16.msra.mxu1 %v9985_v12 }
 0x169   :  { %7748 = vmatprep.subr.bf16.mxu0 %v9912_v4  ;;  %7780 = vmatprep.subr.bf16.mxu1 %v9916_v9 }
 0x21d   :  { %v367_v10 = vpop.f32.mrb[4].mxu0 }
 0x21e   :  { %v369_v11 = vpop.f32.mrb[5].mxu0  ;;  %v6504_v16 = vpop.f32.mrb[2].mxu1  ;;  %v453_v25 = vrot.slane %v367_v10, 7 }
 0x21f   :  { %v458_v20 = vrot.slane %v6504_v16, 1  ;;  %v444_v21 = vpop.f32.mrb[3].mxu1  ;;  %v461_v43 = vadd.f32 %v369_v11, %v10050_v37 }
 0x220   :  { %v457_v23 = vrot.slane %v444_v21, 1 }
 0x221   :  { %v373_v24 = vpop.f32.mrb[6].mxu0 }
 0x222   :  { %v459_v27 = vsel %vm282_vm2, %v457_v23, %v458_v20  ;;  %v460_v29 = vsel %vm282_vm2, %v458_v20, %v457_v23  ;;  %v454_v34 = vrot.slane %v373_v24, 7  ;;  %v375_v36 = vpop.f32.mrb[7].mxu0 }
 0x223   :  { %v462_v38 = vadd.f32 %v375_v36, %v10044_v30  ;;  %v468_v45 = vmul.f32 %v10042_v28, %v460_v29 }
 0x224   :  { %v456_v39 = vsel %vm277_vm3, %v454_v34, %v453_v25  ;;  %v455_v42 = vsel %vm277_vm3, %v453_v25, %v454_v34 }
 0x225   :  { %v463_v46 = vmul.f32 %v10047_v33, %v456_v39  ;;  %v466_v47 = vadd.f32 %v462_v38, %v455_v42 }
 0x227   :  { %v465_v48 = vadd.f32 %v463_v46, %v461_v43  ;;  %v470_v51 = vadd.f32 %v468_v45, %v466_v47 }
 0x229   :  { %v469_v52 = vadd.f32 %v465_v48, %v459_v27  ;;  %9616 = vtanh.f32 %v470_v51 }
 0x22b   :  { %9618 = vtanh.f32 %v469_v52 }
 0x233   :  { %v10118_v55 = vpop.eup %9616 }
 0x234   :  { %v478_v57 = vmul.f32 0.0625, %v10118_v55  ;;  %v474_v51 = vmul.f32 2.0, %v10118_v55 }
 0x235   :  { %v10120_v56 = vpop.eup %9618 }
 0x236   :  { %v477_v58 = vmul.f32 0.0625, %v10120_v56  ;;  %v480_v2 = vadd.f32 %v478_v57, %v9995_v15  ;;  %v473_v52 = vmul.f32 2.0, %v10120_v56 }
 0x238   :  { %v479_v1 = vadd.f32 %v477_v58, %v9961_v53  ;;  %v476_v58 = vadd.f32 %v10064_v61, %v474_v51 }
 0x23a   :  { %546 = vmatmul.mubr.f32.vlgmr.msra.gmra.mrb[8].mxu0 %v479_v1  ;;  %6537 = vmatprep.mubr.f32.mxu1 %v479_v1 }
 0x23b   :  { %6538 = vmatmul.mubr.f32.vlgmr.msra.gmra.mrb[4].mxu1 %v480_v2  ;;  %551 = vmatprep.mubr.f32.mxu0 %v9847_v0 }
 0x23c   :  { %7750 = vmatpush1.bf16.msra.mxu0 %v9914_v8  ;;  %7782 = vmatpush3.bf16.msra.mxu1 %v9916_v9 }
 0x23d   :  { %7752 = vmatprep.subr.bf16.mxu0 %v9919_v13  ;;  %7784 = vmatprep.subr.bf16.mxu1 %v9925_v18 }
 0x23e   :  { %552 = vmatmul.mubr.f32.gmra.mrb[10].mxu0 %v480_v2 }
 0x23f   :  { %725 = vmatprep.mubr.f32.mxu0 %v9847_v0 }
 0x240   :  { %7754 = vmatpush1.bf16.msra.mxu0 %v9923_v17  ;;  %7786 = vmatpush3.bf16.msra.mxu1 %v9925_v18 }
 0x241   :  { %7756 = vmatprep.subr.bf16.mxu0 %v9929_v22  ;;  %7788 = vmatprep.subr.bf16.mxu1 %v9932_v26 }
 0x244   :  { %7758 = vmatpush1.bf16.msra.mxu0 %v9935_v31  ;;  %7790 = vmatpush3.bf16.msra.mxu1 %v9932_v26 }
 0x245   :  { %7760 = vmatprep.subr.bf16.mxu0 %v9939_v32  ;;  %7792 = vmatprep.subr.bf16.mxu1 %v9942_v35 }
 0x248   :  { %7762 = vmatpush1.bf16.msra.mxu0 %v9945_v40  ;;  %7794 = vmatpush3.bf16.msra.mxu1 %v9942_v35 }
 0x249   :  { %7764 = vmatprep.subr.bf16.mxu0 %v9949_v41  ;;  %7796 = vmatprep.subr.bf16.mxu1 %v9952_v44 }
 0x24c   :  { %7766 = vmatpush1.bf16.msra.mxu0 %v9955_v49  ;;  %7798 = vmatpush3.bf16.msra.mxu1 %v9952_v44 }
 0x24d   :  { %7768 = vmatprep.subr.bf16.mxu0 %v9959_v50  ;;  %7800 = vmatprep.subr.bf16.mxu1 %v9964_v54 }
 0x250   :  { %7770 = vmatpush1.bf16.msra.mxu0 %v9968_v59  ;;  %7802 = vmatpush3.bf16.msra.mxu1 %v9964_v54 }
 0x251   :  { %7772 = vmatprep.subr.bf16.mxu0 %v9972_v60  ;;  %7804 = vmatprep.subr.bf16.mxu1 %v9975_v63 }
 0x254   :  { %7774 = vmatpush1.bf16.msra.mxu0 %v9978_v6  ;;  %7806 = vmatpush3.bf16.msra.mxu1 %v9975_v63 }
 0x255   :  { %7776 = vmatprep.subr.bf16.mxu0 %v9982_v7  ;;  %7808 = vmatprep.subr.bf16.mxu1 %v9985_v12 }
 0x258   :  { %7778 = vmatpush1.bf16.msra.mxu0 %v9988_v14  ;;  %7810 = vmatpush3.bf16.msra.mxu1 %v9985_v12 }
 0x259   :  { %7812 = vmatprep.subr.bf16.mxu0 %v9912_v4  ;;  %7844 = vmatprep.subr.bf16.mxu1 %v9916_v9 }
 0x30d   :  { %v547_v3 = vpop.f32.mrb[8].mxu0 }
 0x30e   :  { %v549_v5 = vpop.f32.mrb[9].mxu0  ;;  %v6539_v10 = vpop.f32.mrb[4].mxu1  ;;  %v633_v23 = vrot.slane %v547_v3, 7 }
 0x30f   :  { %v638_v11 = vrot.slane %v6539_v10, 1  ;;  %v624_v16 = vpop.f32.mrb[5].mxu1  ;;  %v641_v39 = vadd.f32 %v549_v5, %v10050_v37  ;;  %v475_v5 = vadd.f32 %v10066_v62, %v473_v52 }
 0x310   :  { %v637_v20 = vrot.slane %v624_v16, 1 }
 0x311   :  { %v553_v21 = vpop.f32.mrb[10].mxu0 }
 0x312   :  { %v639_v24 = vsel %vm282_vm2, %v637_v20, %v638_v11  ;;  %v640_v25 = vsel %vm282_vm2, %v638_v11, %v637_v20  ;;  %v634_v27 = vrot.slane %v553_v21, 7  ;;  %v555_v29 = vpop.f32.mrb[11].mxu0 }
 0x313   :  { %v642_v34 = vadd.f32 %v555_v29, %v10044_v30  ;;  %v648_v42 = vmul.f32 %v10042_v28, %v640_v25 }
 0x314   :  { %v636_v36 = vsel %vm277_vm3, %v634_v27, %v633_v23  ;;  %v635_v38 = vsel %vm277_vm3, %v633_v23, %v634_v27 }
 0x315   :  { %v643_v43 = vmul.f32 %v10047_v33, %v636_v36  ;;  %v646_v45 = vadd.f32 %v642_v34, %v635_v38 }
 0x317   :  { %v645_v46 = vadd.f32 %v643_v43, %v641_v39  ;;  %v650_v47 = vadd.f32 %v648_v42, %v646_v45 }
 0x319   :  { %v649_v48 = vadd.f32 %v645_v46, %v639_v24  ;;  %9620 = vtanh.f32 %v650_v47 }
 0x31b   :  { %9622 = vtanh.f32 %v649_v48 }
 0x323   :  { %v9621_v57 = vpop.eup %9620 }
 0x324   :  { %v654_v1 = vmul.f32 2.0, %v9621_v57  ;;  %v658_v3 = vmul.f32 0.125, %v9621_v57 }
 0x325   :  { %v9623_v2 = vpop.eup %9622 }
 0x326   :  { %v653_v10 = vmul.f32 2.0, %v9623_v2  ;;  %v657_v11 = vmul.f32 0.125, %v9623_v2  ;;  %v10176_v16 = vadd.f32 %v654_v1, %v476_v58  ;;  %v660_v55 = vadd.f32 %v658_v3, %v9995_v15 }
 0x328   :  { %v659_v20 = vadd.f32 %v657_v11, %v9961_v53  ;;  %v10179_v21 = vadd.f32 %v653_v10, %v475_v5 }
 0x32a   :  { %726 = vmatmul.mubr.f32.vlgmr.msra.gmra.mrb[12].mxu0 %v659_v20  ;;  %6572 = vmatprep.mubr.f32.mxu1 %v659_v20 }
 0x32b   :  { %6573 = vmatmul.mubr.f32.vlgmr.msra.gmra.mrb[6].mxu1 %v660_v55  ;;  %731 = vmatprep.mubr.f32.mxu0 %v9847_v0 }
 0x32c   :  { %7814 = vmatpush1.bf16.msra.mxu0 %v9914_v8  ;;  %7846 = vmatpush3.bf16.msra.mxu1 %v9916_v9 }
 0x32d   :  { %7816 = vmatprep.subr.bf16.mxu0 %v9919_v13  ;;  %7848 = vmatprep.subr.bf16.mxu1 %v9925_v18 }
 0x32e   :  { %732 = vmatmul.mubr.f32.gmra.mrb[14].mxu0 %v660_v55 }
 0x32f   :  { %903 = vmatprep.mubr.f32.mxu0 %v9847_v0 }
 0x330   :  { %7818 = vmatpush1.bf16.msra.mxu0 %v9923_v17  ;;  %7850 = vmatpush3.bf16.msra.mxu1 %v9925_v18 }
 0x331   :  { %7820 = vmatprep.subr.bf16.mxu0 %v9929_v22  ;;  %7852 = vmatprep.subr.bf16.mxu1 %v9932_v26 }
 0x334   :  { %7822 = vmatpush1.bf16.msra.mxu0 %v9935_v31  ;;  %7854 = vmatpush3.bf16.msra.mxu1 %v9932_v26 }
 0x335   :  { %7824 = vmatprep.subr.bf16.mxu0 %v9939_v32  ;;  %7856 = vmatprep.subr.bf16.mxu1 %v9942_v35 }
 0x338   :  { %7826 = vmatpush1.bf16.msra.mxu0 %v9945_v40  ;;  %7858 = vmatpush3.bf16.msra.mxu1 %v9942_v35 }
 0x339   :  { %7828 = vmatprep.subr.bf16.mxu0 %v9949_v41  ;;  %7860 = vmatprep.subr.bf16.mxu1 %v9952_v44 }
 0x33c   :  { %7830 = vmatpush1.bf16.msra.mxu0 %v9955_v49  ;;  %7862 = vmatpush3.bf16.msra.mxu1 %v9952_v44 }
 0x33d   :  { %7832 = vmatprep.subr.bf16.mxu0 %v9959_v50  ;;  %7864 = vmatprep.subr.bf16.mxu1 %v9964_v54 }
 0x340   :  { %7834 = vmatpush1.bf16.msra.mxu0 %v9968_v59  ;;  %7866 = vmatpush3.bf16.msra.mxu1 %v9964_v54 }
 0x341   :  { %7836 = vmatprep.subr.bf16.mxu0 %v9972_v60  ;;  %7868 = vmatprep.subr.bf16.mxu1 %v9975_v63 }
 0x344   :  { %7838 = vmatpush1.bf16.msra.mxu0 %v9978_v6  ;;  %7870 = vmatpush3.bf16.msra.mxu1 %v9975_v63 }
 0x345   :  { %7840 = vmatprep.subr.bf16.mxu0 %v9982_v7  ;;  %7872 = vmatprep.subr.bf16.mxu1 %v9985_v12 }
 0x348   :  { %7842 = vmatpush1.bf16.msra.mxu0 %v9988_v14  ;;  %7874 = vmatpush3.bf16.msra.mxu1 %v9985_v12 }
 0x349   :  { %7876 = vmatprep.subr.bf16.mxu0 %v9912_v4  ;;  %7908 = vmatprep.subr.bf16.mxu1 %v9916_v9 }
 0x3fd   :  { %v727_v61 = vpop.f32.mrb[12].mxu0 }
 0x3fe   :  { %v729_v62 = vpop.f32.mrb[13].mxu0  ;;  %v6574_v56 = vpop.f32.mrb[6].mxu1  ;;  %v813_v29 = vrot.slane %v727_v61, 7 }
 0x3ff   :  { %v818_v23 = vrot.slane %v6574_v56, 1  ;;  %v804_v24 = vpop.f32.mrb[7].mxu1  ;;  %v821_v46 = vadd.f32 %v729_v62, %v10050_v37 }
 0x400   :  { %v817_v25 = vrot.slane %v804_v24, 1 }
 0x401   :  { %v733_v27 = vpop.f32.mrb[14].mxu0 }
 0x402   :  { %v819_v34 = vsel %vm282_vm2, %v817_v25, %v818_v23  ;;  %v820_v36 = vsel %vm282_vm2, %v818_v23, %v817_v25  ;;  %v814_v38 = vrot.slane %v733_v27, 7  ;;  %v735_v39 = vpop.f32.mrb[15].mxu0 }
 0x403   :  { %v822_v42 = vadd.f32 %v735_v39, %v10044_v30  ;;  %v828_v47 = vmul.f32 %v10042_v28, %v820_v36 }
 0x404   :  { %v816_v43 = vsel %vm277_vm3, %v814_v38, %v813_v29  ;;  %v815_v45 = vsel %vm277_vm3, %v813_v29, %v814_v38 }
 0x405   :  { %v823_v48 = vmul.f32 %v10047_v33, %v816_v43  ;;  %v826_v51 = vadd.f32 %v822_v42, %v815_v45 }
 0x407   :  { %v825_v52 = vadd.f32 %v823_v48, %v821_v46  ;;  %v830_v57 = vadd.f32 %v828_v47, %v826_v51 }
 0x409   :  { %v829_v58 = vadd.f32 %v825_v52, %v819_v34  ;;  %9624 = vtanh.f32 %v830_v57 }
 0x40b   :  { %9626 = vtanh.f32 %v829_v58 }
 0x413   :  { %v9625_v1 = vpop.eup %9624 }
 0x414   :  { %v834_v2 = vadd.f32 %v9625_v1, %v10176_v16 }
 0x415   :  { %v9627_v3 = vpop.eup %9626 }
 0x416   :  { %v833_v5 = vadd.f32 %v9627_v3, %v10179_v21  ;;  %v836_v10 = vmul.f32 0.020833334, %v834_v2 }
 0x418   :  { %v835_v11 = vmul.f32 0.020833334, %v833_v5  ;;  %v10234_v55 = vadd.f32 %v836_v10, %v9995_v15 }
 0x41a   :  { %v10231_v20 = vadd.f32 %v835_v11, %v9961_v53 }
 0x41c   :  { %904 = vmatmul.mubr.f32.vlgmr.msra.gmra.mrb[16].mxu0 %v10231_v20  ;;  %6607 = vmatprep.mubr.f32.mxu1 %v10231_v20 }
 0x41d   :  { %6608 = vmatmul.mubr.f32.vlgmr.msra.gmra.mrb[8].mxu1 %v10234_v55  ;;  %909 = vmatprep.mubr.f32.mxu0 %v9847_v0 }
 0x41e   :  { %7878 = vmatpush1.bf16.msra.mxu0 %v9914_v8  ;;  %7910 = vmatpush3.bf16.msra.mxu1 %v9916_v9 }
 0x41f   :  { %7880 = vmatprep.subr.bf16.mxu0 %v9919_v13  ;;  %7912 = vmatprep.subr.bf16.mxu1 %v9925_v18 }
 0x420   :  { %910 = vmatmul.mubr.f32.gmra.mrb[18].mxu0 %v10234_v55 }
 0x421   :  { %1079 = vmatprep.mubr.f32.mxu0 %v9847_v0 }
 0x422   :  { %7882 = vmatpush1.bf16.msra.mxu0 %v9923_v17  ;;  %7914 = vmatpush3.bf16.msra.mxu1 %v9925_v18 }
 0x423   :  { %7884 = vmatprep.subr.bf16.mxu0 %v9929_v22  ;;  %7916 = vmatprep.subr.bf16.mxu1 %v9932_v26 }
 0x426   :  { %7886 = vmatpush1.bf16.msra.mxu0 %v9935_v31  ;;  %7918 = vmatpush3.bf16.msra.mxu1 %v9932_v26 }
 0x427   :  { %7888 = vmatprep.subr.bf16.mxu0 %v9939_v32  ;;  %7920 = vmatprep.subr.bf16.mxu1 %v9942_v35 }
 0x42a   :  { %7890 = vmatpush1.bf16.msra.mxu0 %v9945_v40  ;;  %7922 = vmatpush3.bf16.msra.mxu1 %v9942_v35 }
 0x42b   :  { %7892 = vmatprep.subr.bf16.mxu0 %v9949_v41  ;;  %7924 = vmatprep.subr.bf16.mxu1 %v9952_v44 }
 0x42e   :  { %7894 = vmatpush1.bf16.msra.mxu0 %v9955_v49  ;;  %7926 = vmatpush3.bf16.msra.mxu1 %v9952_v44 }
 0x42f   :  { %7896 = vmatprep.subr.bf16.mxu0 %v9959_v50  ;;  %7928 = vmatprep.subr.bf16.mxu1 %v9964_v54 }
 0x432   :  { %7898 = vmatpush1.bf16.msra.mxu0 %v9968_v59  ;;  %7930 = vmatpush3.bf16.msra.mxu1 %v9964_v54 }
 0x433   :  { %7900 = vmatprep.subr.bf16.mxu0 %v9972_v60  ;;  %7932 = vmatprep.subr.bf16.mxu1 %v9975_v63 }
 0x436   :  { %7902 = vmatpush1.bf16.msra.mxu0 %v9978_v6  ;;  %7934 = vmatpush3.bf16.msra.mxu1 %v9975_v63 }
 0x437   :  { %7904 = vmatprep.subr.bf16.mxu0 %v9982_v7  ;;  %7936 = vmatprep.subr.bf16.mxu1 %v9985_v12 }
 0x43a   :  { %7906 = vmatpush1.bf16.msra.mxu0 %v9988_v14  ;;  %7938 = vmatpush3.bf16.msra.mxu1 %v9985_v12 }
 0x43b   :  { %7940 = vmatprep.subr.bf16.mxu0 %v9912_v4  ;;  %7972 = vmatprep.subr.bf16.mxu1 %v9916_v9 }
 0x4ef   :  { %v905_v53 = vpop.f32.mrb[16].mxu0 }
 0x4f0   :  { %v907_v15 = vpop.f32.mrb[17].mxu0  ;;  %v6609_v16 = vpop.f32.mrb[8].mxu1  ;;  %v991_v23 = vrot.slane %v905_v53, 7 }
 0x4f1   :  { %v996_v21 = vrot.slane %v6609_v16, 1  ;;  %v982_v61 = vpop.f32.mrb[9].mxu1  ;;  %v999_v39 = vadd.f32 %v907_v15, %v10050_v37 }
 0x4f2   :  { %v995_v62 = vrot.slane %v982_v61, 1 }
 0x4f3   :  { %v911_v56 = vpop.f32.mrb[18].mxu0 }
 0x4f4   :  { %v997_v24 = vsel %vm282_vm2, %v995_v62, %v996_v21  ;;  %v998_v25 = vsel %vm282_vm2, %v996_v21, %v995_v62  ;;  %v992_v27 = vrot.slane %v911_v56, 7  ;;  %v913_v29 = vpop.f32.mrb[19].mxu0 }
 0x4f5   :  { %v1000_v34 = vadd.f32 %v913_v29, %v10044_v30  ;;  %v1006_v42 = vmul.f32 %v10042_v28, %v998_v25 }
 0x4f6   :  { %v994_v36 = vsel %vm277_vm3, %v992_v27, %v991_v23  ;;  %v993_v38 = vsel %vm277_vm3, %v991_v23, %v992_v27 }
 0x4f7   :  { %v1001_v43 = vmul.f32 %v10047_v33, %v994_v36  ;;  %v1004_v45 = vadd.f32 %v1000_v34, %v993_v38 }
 0x4f9   :  { %v1003_v46 = vadd.f32 %v1001_v43, %v999_v39  ;;  %v1008_v47 = vadd.f32 %v1006_v42, %v1004_v45 }
 0x4fb   :  { %v1007_v48 = vadd.f32 %v1003_v46, %v997_v24  ;;  %9628 = vtanh.f32 %v1008_v47 }
 0x4fd   :  { %9630 = vtanh.f32 %v1007_v48 }
 0x505   :  { %v10286_v51 = vpop.eup %9628 }
 0x506   :  { %v1012_v57 = vmul.f32 0.0625, %v10286_v51 }
 0x507   :  { %v10288_v52 = vpop.eup %9630 }
 0x508   :  { %v1011_v58 = vmul.f32 0.0625, %v10288_v52  ;;  %v1014_v2 = vadd.f32 %v1012_v57, %v10234_v55 }
 0x50a   :  { %v1013_v1 = vadd.f32 %v1011_v58, %v10231_v20 }
 0x50c   :  { %1080 = vmatmul.mubr.f32.vlgmr.msra.gmra.mrb[20].mxu0 %v1013_v1  ;;  %6642 = vmatprep.mubr.f32.mxu1 %v1013_v1 }
 0x50d   :  { %6643 = vmatmul.mubr.f32.vlgmr.msra.gmra.mrb[10].mxu1 %v1014_v2  ;;  %1085 = vmatprep.mubr.f32.mxu0 %v9847_v0 }
 0x50e   :  { %7942 = vmatpush1.bf16.msra.mxu0 %v9914_v8  ;;  %7974 = vmatpush3.bf16.msra.mxu1 %v9916_v9 }
 0x50f   :  { %7944 = vmatprep.subr.bf16.mxu0 %v9919_v13  ;;  %7976 = vmatprep.subr.bf16.mxu1 %v9925_v18 }
 0x510   :  { %1086 = vmatmul.mubr.f32.gmra.mrb[22].mxu0 %v1014_v2 }
 0x511   :  { %1259 = vmatprep.mubr.f32.mxu0 %v9847_v0 }
 0x512   :  { %7946 = vmatpush1.bf16.msra.mxu0 %v9923_v17  ;;  %7978 = vmatpush3.bf16.msra.mxu1 %v9925_v18 }
 0x513   :  { %7948 = vmatprep.subr.bf16.mxu0 %v9929_v22  ;;  %7980 = vmatprep.subr.bf16.mxu1 %v9932_v26 }
 0x516   :  { %7950 = vmatpush1.bf16.msra.mxu0 %v9935_v31  ;;  %7982 = vmatpush3.bf16.msra.mxu1 %v9932_v26 }
 0x517   :  { %7952 = vmatprep.subr.bf16.mxu0 %v9939_v32  ;;  %7984 = vmatprep.subr.bf16.mxu1 %v9942_v35 }
 0x51a   :  { %7954 = vmatpush1.bf16.msra.mxu0 %v9945_v40  ;;  %7986 = vmatpush3.bf16.msra.mxu1 %v9942_v35 }
 0x51b   :  { %7956 = vmatprep.subr.bf16.mxu0 %v9949_v41  ;;  %7988 = vmatprep.subr.bf16.mxu1 %v9952_v44 }
 0x51e   :  { %7958 = vmatpush1.bf16.msra.mxu0 %v9955_v49  ;;  %7990 = vmatpush3.bf16.msra.mxu1 %v9952_v44 }
 0x51f   :  { %7960 = vmatprep.subr.bf16.mxu0 %v9959_v50  ;;  %7992 = vmatprep.subr.bf16.mxu1 %v9964_v54 }
 0x522   :  { %7962 = vmatpush1.bf16.msra.mxu0 %v9968_v59  ;;  %7994 = vmatpush3.bf16.msra.mxu1 %v9964_v54 }
 0x523   :  { %7964 = vmatprep.subr.bf16.mxu0 %v9972_v60  ;;  %7996 = vmatprep.subr.bf16.mxu1 %v9975_v63 }
 0x526   :  { %7966 = vmatpush1.bf16.msra.mxu0 %v9978_v6  ;;  %7998 = vmatpush3.bf16.msra.mxu1 %v9975_v63 }
 0x527   :  { %7968 = vmatprep.subr.bf16.mxu0 %v9982_v7  ;;  %8000 = vmatprep.subr.bf16.mxu1 %v9985_v12 }
 0x52a   :  { %7970 = vmatpush1.bf16.msra.mxu0 %v9988_v14  ;;  %8002 = vmatpush3.bf16.msra.mxu1 %v9985_v12 }
 0x52b   :  { %8004 = vmatprep.subr.bf16.mxu0 %v9912_v4  ;;  %8036 = vmatprep.subr.bf16.mxu1 %v9916_v9 }
 0x5df   :  { %v1081_v3 = vpop.f32.mrb[20].mxu0 }
 0x5e0   :  { %v1083_v5 = vpop.f32.mrb[21].mxu0  ;;  %v6644_v10 = vpop.f32.mrb[10].mxu1  ;;  %v1167_v21 = vrot.slane %v1081_v3, 7 }
 0x5e1   :  { %v1172_v11 = vrot.slane %v6644_v10, 1  ;;  %v1158_v53 = vpop.f32.mrb[11].mxu1  ;;  %v1175_v29 = vadd.f32 %v1083_v5, %v10050_v37 }
 0x5e2   :  { %v1171_v15 = vrot.slane %v1158_v53, 1 }
 0x5e3   :  { %v1087_v16 = vpop.f32.mrb[22].mxu0 }
 0x5e4   :  { %v1173_v61 = vsel %vm282_vm2, %v1171_v15, %v1172_v11  ;;  %v1174_v62 = vsel %vm282_vm2, %v1172_v11, %v1171_v15  ;;  %v1168_v56 = vrot.slane %v1087_v16, 7  ;;  %v1089_v23 = vpop.f32.mrb[23].mxu0 }
 0x5e5   :  { %v1176_v24 = vadd.f32 %v1089_v23, %v10044_v30  ;;  %v1182_v34 = vmul.f32 %v10042_v28, %v1174_v62 }
 0x5e6   :  { %v1170_v25 = vsel %vm277_vm3, %v1168_v56, %v1167_v21  ;;  %v1169_v27 = vsel %vm277_vm3, %v1167_v21, %v1168_v56 }
 0x5e7   :  { %v1177_v36 = vmul.f32 %v10047_v33, %v1170_v25  ;;  %v1180_v38 = vadd.f32 %v1176_v24, %v1169_v27 }
 0x5e9   :  { %v1179_v39 = vadd.f32 %v1177_v36, %v1175_v29  ;;  %v1184_v42 = vadd.f32 %v1182_v34, %v1180_v38 }
 0x5eb   :  { %v1183_v43 = vadd.f32 %v1179_v39, %v1173_v61  ;;  %9632 = vtanh.f32 %v1184_v42 }
 0x5ed   :  { %9634 = vtanh.f32 %v1183_v43 }
 0x5f5   :  { %v10340_v45 = vpop.eup %9632 }
 0x5f6   :  { %v1192_v47 = vmul.f32 0.0625, %v10340_v45  ;;  %v1188_v42 = vmul.f32 2.0, %v10340_v45 }
 0x5f7   :  { %v10342_v46 = vpop.eup %9634 }
 0x5f8   :  { %v1191_v48 = vmul.f32 0.0625, %v10342_v46  ;;  %v1194_v58 = vadd.f32 %v1192_v47, %v10234_v55  ;;  %v1187_v43 = vmul.f32 2.0, %v10342_v46 }
 0x5fa   :  { %v1193_v57 = vadd.f32 %v1191_v48, %v10231_v20  ;;  %v1190_v48 = vadd.f32 %v10286_v51, %v1188_v42 }
 0x5fc   :  { %1260 = vmatmul.mubr.f32.vlgmr.msra.gmra.mrb[24].mxu0 %v1193_v57  ;;  %6677 = vmatprep.mubr.f32.mxu1 %v1193_v57 }
 0x5fd   :  { %6678 = vmatmul.mubr.f32.vlgmr.msra.gmra.mrb[12].mxu1 %v1194_v58  ;;  %1265 = vmatprep.mubr.f32.mxu0 %v9847_v0 }
 0x5fe   :  { %8006 = vmatpush1.bf16.msra.mxu0 %v9914_v8  ;;  %8038 = vmatpush3.bf16.msra.mxu1 %v9916_v9 }
 0x5ff   :  { %8008 = vmatprep.subr.bf16.mxu0 %v9919_v13  ;;  %8040 = vmatprep.subr.bf16.mxu1 %v9925_v18 }
 0x600   :  { %1266 = vmatmul.mubr.f32.gmra.mrb[26].mxu0 %v1194_v58 }
 0x601   :  { %1439 = vmatprep.mubr.f32.mxu0 %v9847_v0 }
 0x602   :  { %8010 = vmatpush1.bf16.msra.mxu0 %v9923_v17  ;;  %8042 = vmatpush3.bf16.msra.mxu1 %v9925_v18 }
 0x603   :  { %8012 = vmatprep.subr.bf16.mxu0 %v9929_v22  ;;  %8044 = vmatprep.subr.bf16.mxu1 %v9932_v26 }
 0x606   :  { %8014 = vmatpush1.bf16.msra.mxu0 %v9935_v31  ;;  %8046 = vmatpush3.bf16.msra.mxu1 %v9932_v26 }
 0x607   :  { %8016 = vmatprep.subr.bf16.mxu0 %v9939_v32  ;;  %8048 = vmatprep.subr.bf16.mxu1 %v9942_v35 }
 0x60a   :  { %8018 = vmatpush1.bf16.msra.mxu0 %v9945_v40  ;;  %8050 = vmatpush3.bf16.msra.mxu1 %v9942_v35 }
 0x60b   :  { %8020 = vmatprep.subr.bf16.mxu0 %v9949_v41  ;;  %8052 = vmatprep.subr.bf16.mxu1 %v9952_v44 }
 0x60e   :  { %8022 = vmatpush1.bf16.msra.mxu0 %v9955_v49  ;;  %8054 = vmatpush3.bf16.msra.mxu1 %v9952_v44 }
 0x60f   :  { %8024 = vmatprep.subr.bf16.mxu0 %v9959_v50  ;;  %8056 = vmatprep.subr.bf16.mxu1 %v9964_v54 }
 0x612   :  { %8026 = vmatpush1.bf16.msra.mxu0 %v9968_v59  ;;  %8058 = vmatpush3.bf16.msra.mxu1 %v9964_v54 }
 0x613   :  { %8028 = vmatprep.subr.bf16.mxu0 %v9972_v60  ;;  %8060 = vmatprep.subr.bf16.mxu1 %v9975_v63 }
 0x616   :  { %8030 = vmatpush1.bf16.msra.mxu0 %v9978_v6  ;;  %8062 = vmatpush3.bf16.msra.mxu1 %v9975_v63 }
 0x617   :  { %8032 = vmatprep.subr.bf16.mxu0 %v9982_v7  ;;  %8064 = vmatprep.subr.bf16.mxu1 %v9985_v12 }
 0x61a   :  { %8034 = vmatpush1.bf16.msra.mxu0 %v9988_v14  ;;  %8066 = vmatpush3.bf16.msra.mxu1 %v9985_v12 }
 0x61b   :  { %8068 = vmatprep.subr.bf16.mxu0 %v9912_v4  ;;  %8100 = vmatprep.subr.bf16.mxu1 %v9916_v9 }
 0x6cf   :  { %v1261_v1 = vpop.f32.mrb[24].mxu0 }
 0x6d0   :  { %v1263_v2 = vpop.f32.mrb[25].mxu0  ;;  %v6679_v3 = vpop.f32.mrb[12].mxu1  ;;  %v1347_v15 = vrot.slane %v1261_v1, 7 }
 0x6d1   :  { %v1352_v5 = vrot.slane %v6679_v3, 1  ;;  %v1338_v10 = vpop.f32.mrb[13].mxu1  ;;  %v1355_v25 = vadd.f32 %v1263_v2, %v10050_v37  ;;  %v1189_v2 = vadd.f32 %v10288_v52, %v1187_v43 }
 0x6d2   :  { %v1351_v11 = vrot.slane %v1338_v10, 1 }
 0x6d3   :  { %v1267_v53 = vpop.f32.mrb[26].mxu0 }
 0x6d4   :  { %v1353_v16 = vsel %vm282_vm2, %v1351_v11, %v1352_v5  ;;  %v1354_v21 = vsel %vm282_vm2, %v1352_v5, %v1351_v11  ;;  %v1348_v61 = vrot.slane %v1267_v53, 7  ;;  %v1269_v62 = vpop.f32.mrb[27].mxu0 }
 0x6d5   :  { %v1356_v56 = vadd.f32 %v1269_v62, %v10044_v30  ;;  %v1362_v27 = vmul.f32 %v10042_v28, %v1354_v21 }
 0x6d6   :  { %v1350_v23 = vsel %vm277_vm3, %v1348_v61, %v1347_v15  ;;  %v1349_v24 = vsel %vm277_vm3, %v1347_v15, %v1348_v61 }
 0x6d7   :  { %v1357_v29 = vmul.f32 %v10047_v33, %v1350_v23  ;;  %v1360_v34 = vadd.f32 %v1356_v56, %v1349_v24 }
 0x6d9   :  { %v1359_v36 = vadd.f32 %v1357_v29, %v1355_v25  ;;  %v1364_v38 = vadd.f32 %v1362_v27, %v1360_v34 }
 0x6db   :  { %v1363_v39 = vadd.f32 %v1359_v36, %v1353_v16  ;;  %9636 = vtanh.f32 %v1364_v38 }
 0x6dd   :  { %9638 = vtanh.f32 %v1363_v39 }
 0x6e5   :  { %v9637_v47 = vpop.eup %9636 }
 0x6e6   :  { %v1368_v57 = vmul.f32 2.0, %v9637_v47  ;;  %v1372_v1 = vmul.f32 0.125, %v9637_v47 }
 0x6e7   :  { %v9639_v58 = vpop.eup %9638 }
 0x6e8   :  { %v1367_v3 = vmul.f32 2.0, %v9639_v58  ;;  %v1371_v5 = vmul.f32 0.125, %v9639_v58  ;;  %v10398_v10 = vadd.f32 %v1368_v57, %v1190_v48  ;;  %v1374_v45 = vadd.f32 %v1372_v1, %v10234_v55 }
 0x6ea   :  { %v1373_v11 = vadd.f32 %v1371_v5, %v10231_v20  ;;  %v10401_v53 = vadd.f32 %v1367_v3, %v1189_v2 }
 0x6ec   :  { %1440 = vmatmul.mubr.f32.vlgmr.msra.gmra.mrb[28].mxu0 %v1373_v11  ;;  %6712 = vmatprep.mubr.f32.mxu1 %v1373_v11 }
 0x6ed   :  { %6713 = vmatmul.mubr.f32.vlgmr.msra.gmra.mrb[14].mxu1 %v1374_v45  ;;  %1445 = vmatprep.mubr.f32.mxu0 %v9847_v0 }
 0x6ee   :  { %8070 = vmatpush1.bf16.msra.mxu0 %v9914_v8  ;;  %8102 = vmatpush3.bf16.msra.mxu1 %v9916_v9 }
 0x6ef   :  { %8072 = vmatprep.subr.bf16.mxu0 %v9919_v13  ;;  %8104 = vmatprep.subr.bf16.mxu1 %v9925_v18 }
 0x6f0   :  { %1446 = vmatmul.mubr.f32.gmra.mrb[30].mxu0 %v1374_v45 }
 0x6f1   :  { %1617 = vmatprep.mubr.f32.mxu0 %v9847_v0 }
 0x6f2   :  { %8074 = vmatpush1.bf16.msra.mxu0 %v9923_v17  ;;  %8106 = vmatpush3.bf16.msra.mxu1 %v9925_v18 }
 0x6f3   :  { %8076 = vmatprep.subr.bf16.mxu0 %v9929_v22  ;;  %8108 = vmatprep.subr.bf16.mxu1 %v9932_v26 }
 0x6f6   :  { %8078 = vmatpush1.bf16.msra.mxu0 %v9935_v31  ;;  %8110 = vmatpush3.bf16.msra.mxu1 %v9932_v26 }
 0x6f7   :  { %8080 = vmatprep.subr.bf16.mxu0 %v9939_v32  ;;  %8112 = vmatprep.subr.bf16.mxu1 %v9942_v35 }
 0x6fa   :  { %8082 = vmatpush1.bf16.msra.mxu0 %v9945_v40  ;;  %8114 = vmatpush3.bf16.msra.mxu1 %v9942_v35 }
 0x6fb   :  { %8084 = vmatprep.subr.bf16.mxu0 %v9949_v41  ;;  %8116 = vmatprep.subr.bf16.mxu1 %v9952_v44 }
 0x6fe   :  { %8086 = vmatpush1.bf16.msra.mxu0 %v9955_v49  ;;  %8118 = vmatpush3.bf16.msra.mxu1 %v9952_v44 }
 0x6ff   :  { %8088 = vmatprep.subr.bf16.mxu0 %v9959_v50  ;;  %8120 = vmatprep.subr.bf16.mxu1 %v9964_v54 }
 0x702   :  { %8090 = vmatpush1.bf16.msra.mxu0 %v9968_v59  ;;  %8122 = vmatpush3.bf16.msra.mxu1 %v9964_v54 }
 0x703   :  { %8092 = vmatprep.subr.bf16.mxu0 %v9972_v60  ;;  %8124 = vmatprep.subr.bf16.mxu1 %v9975_v63 }
 0x706   :  { %8094 = vmatpush1.bf16.msra.mxu0 %v9978_v6  ;;  %8126 = vmatpush3.bf16.msra.mxu1 %v9975_v63 }
 0x707   :  { %8096 = vmatprep.subr.bf16.mxu0 %v9982_v7  ;;  %8128 = vmatprep.subr.bf16.mxu1 %v9985_v12 }
 0x70a   :  { %8098 = vmatpush1.bf16.msra.mxu0 %v9988_v14  ;;  %8130 = vmatpush3.bf16.msra.mxu1 %v9985_v12 }
 0x70b   :  { %8132 = vmatprep.subr.bf16.mxu0 %v9912_v4  ;;  %8164 = vmatprep.subr.bf16.mxu1 %v9916_v9 }
 0x7bf   :  { %v1441_v51 = vpop.f32.mrb[28].mxu0 }
 0x7c0   :  { %v1443_v52 = vpop.f32.mrb[29].mxu0  ;;  %v6714_v46 = vpop.f32.mrb[14].mxu1  ;;  %v1527_v62 = vrot.slane %v1441_v51, 7 }
 0x7c1   :  { %v1532_v15 = vrot.slane %v6714_v46, 1  ;;  %v1518_v16 = vpop.f32.mrb[15].mxu1  ;;  %v1535_v36 = vadd.f32 %v1443_v52, %v10050_v37 }
 0x7c2   :  { %v1531_v21 = vrot.slane %v1518_v16, 1 }
 0x7c3   :  { %v1447_v61 = vpop.f32.mrb[30].mxu0 }
 0x7c4   :  { %v1533_v56 = vsel %vm282_vm2, %v1531_v21, %v1532_v15  ;;  %v1534_v23 = vsel %vm282_vm2, %v1532_v15, %v1531_v21  ;;  %v1528_v24 = vrot.slane %v1447_v61, 7  ;;  %v1449_v25 = vpop.f32.mrb[31].mxu0  ;;  %v10500_v61 = vld [vmem:[#allocation7 + $0x8] sm:$0xff] }
 0x7c5   :  { %v1536_v27 = vadd.f32 %v1449_v25, %v10044_v30  ;;  %v1542_v38 = vmul.f32 %v10042_v28, %v1534_v23 }
 0x7c6   :  { %v1530_v29 = vsel %vm277_vm3, %v1528_v24, %v1527_v62  ;;  %v1529_v34 = vsel %vm277_vm3, %v1527_v62, %v1528_v24  ;;  %v10507_v24 = vld [vmem:[#allocation7] sm:$0xff] }
 0x7c7   :  { %v1537_v39 = vmul.f32 %v10047_v33, %v1530_v29  ;;  %v1540_v42 = vadd.f32 %v1536_v27, %v1529_v34 }
 0x7c9   :  { %v1539_v43 = vadd.f32 %v1537_v39, %v1535_v36  ;;  %v1544_v47 = vadd.f32 %v1542_v38, %v1540_v42 }
 0x7cb   :  { %v1543_v48 = vadd.f32 %v1539_v43, %v1533_v56  ;;  %9640 = vtanh.f32 %v1544_v47 }
 0x7cd   :  { %9642 = vtanh.f32 %v1543_v48 }
 0x7d5   :  { %v9641_v57 = vpop.eup %9640 }
 0x7d6   :  { %v1548_v30 = vadd.f32 %v9641_v57, %v10398_v10 }
 0x7d7   :  { %v9643_v58 = vpop.eup %9642 }
 0x7d8   :  { %v1547_v1 = vadd.f32 %v9643_v58, %v10401_v53  ;;  %v1550_v2 = vmul.f32 0.020833334, %v1548_v30 }
 0x7da   :  { %v1549_v3 = vmul.f32 0.020833334, %v1547_v1  ;;  %v10456_v5 = vadd.f32 %v1550_v2, %v10234_v55 }
 0x7dc   :  { %v10453_v37 = vadd.f32 %v1549_v3, %v10231_v20 }
 0x7de   :  { %1618 = vmatmul.mubr.f32.vlgmr.msra.gmra.mrb[32].mxu0 %v10453_v37  ;;  %6747 = vmatprep.mubr.f32.mxu1 %v10453_v37 }
 0x7df   :  { %6748 = vmatmul.mubr.f32.vlgmr.msra.gmra.mrb[16].mxu1 %v10456_v5  ;;  %1623 = vmatprep.mubr.f32.mxu0 %v9847_v0 }
 0x7e0   :  { %8134 = vmatpush1.bf16.msra.mxu0 %v9914_v8  ;;  %8166 = vmatpush3.bf16.msra.mxu1 %v9916_v9 }
 0x7e1   :  { %8136 = vmatprep.subr.bf16.mxu0 %v9919_v13  ;;  %8168 = vmatprep.subr.bf16.mxu1 %v9925_v18 }
 0x7e2   :  { %1624 = vmatmul.mubr.f32.gmra.mrb[34].mxu0 %v10456_v5 }
 0x7e3   :  { %1793 = vmatprep.mubr.f32.mxu0 %v9847_v0 }
 0x7e4   :  { %8138 = vmatpush1.bf16.msra.mxu0 %v9923_v17  ;;  %8170 = vmatpush3.bf16.msra.mxu1 %v9925_v18 }
 0x7e5   :  { %8140 = vmatprep.subr.bf16.mxu0 %v9929_v22  ;;  %8172 = vmatprep.subr.bf16.mxu1 %v9932_v26 }
 0x7e8   :  { %8142 = vmatpush1.bf16.msra.mxu0 %v9935_v31  ;;  %8174 = vmatpush3.bf16.msra.mxu1 %v9932_v26 }
 0x7e9   :  { %8144 = vmatprep.subr.bf16.mxu0 %v9939_v32  ;;  %8176 = vmatprep.subr.bf16.mxu1 %v9942_v35 }
 0x7ec   :  { %8146 = vmatpush1.bf16.msra.mxu0 %v9945_v40  ;;  %8178 = vmatpush3.bf16.msra.mxu1 %v9942_v35 }
 0x7ed   :  { %8148 = vmatprep.subr.bf16.mxu0 %v9949_v41  ;;  %8180 = vmatprep.subr.bf16.mxu1 %v9952_v44 }
 0x7f0   :  { %8150 = vmatpush1.bf16.msra.mxu0 %v9955_v49  ;;  %8182 = vmatpush3.bf16.msra.mxu1 %v9952_v44 }
 0x7f1   :  { %8152 = vmatprep.subr.bf16.mxu0 %v9959_v50  ;;  %8184 = vmatprep.subr.bf16.mxu1 %v9964_v54 }
 0x7f4   :  { %8154 = vmatpush1.bf16.msra.mxu0 %v9968_v59  ;;  %8186 = vmatpush3.bf16.msra.mxu1 %v9964_v54 }
 0x7f5   :  { %8156 = vmatprep.subr.bf16.mxu0 %v9972_v60  ;;  %8188 = vmatprep.subr.bf16.mxu1 %v9975_v63 }
 0x7f8   :  { %8158 = vmatpush1.bf16.msra.mxu0 %v9978_v6  ;;  %8190 = vmatpush3.bf16.msra.mxu1 %v9975_v63 }
 0x7f9   :  { %8160 = vmatprep.subr.bf16.mxu0 %v9982_v7  ;;  %8192 = vmatprep.subr.bf16.mxu1 %v9985_v12 }
 0x7fc   :  { %8162 = vmatpush1.bf16.msra.mxu0 %v9988_v14  ;;  %8194 = vmatpush3.bf16.msra.mxu1 %v9985_v12 }
 0x7fd   :  { %8196 = vmatprep.subr.bf16.mxu0 %v9912_v4  ;;  %8228 = vmatprep.subr.bf16.mxu1 %v9916_v9 }
 0x8b1   :  { %v1619_v20 = vpop.f32.mrb[32].mxu0 }
 0x8b2   :  { %v1621_v55 = vpop.f32.mrb[33].mxu0  ;;  %v6749_v10 = vpop.f32.mrb[16].mxu1  ;;  %v1705_v52 = vrot.slane %v1619_v20, 7 }
 0x8b3   :  { %v1710_v11 = vrot.slane %v6749_v10, 1  ;;  %v1696_v53 = vpop.f32.mrb[17].mxu1  ;;  %v1713_v25 = vadd.f32 %v10507_v24, %v1621_v55 }
 0x8b4   :  { %v1709_v45 = vrot.slane %v1696_v53, 1 }
 0x8b5   :  { %v1625_v51 = vpop.f32.mrb[34].mxu0 }
 0x8b6   :  { %v1711_v46 = vsel %vm282_vm2, %v1709_v45, %v1710_v11  ;;  %v1712_v15 = vsel %vm282_vm2, %v1710_v11, %v1709_v45  ;;  %v1706_v16 = vrot.slane %v1625_v51, 7  ;;  %v1627_v21 = vpop.f32.mrb[35].mxu0 }
 0x8b7   :  { %v1714_v62 = vadd.f32 %v10500_v61, %v1627_v21  ;;  %v1720_v27 = vmul.f32 %v10042_v28, %v1712_v15 }
 0x8b8   :  { %v1708_v56 = vsel %vm277_vm3, %v1706_v16, %v1705_v52  ;;  %v1707_v23 = vsel %vm277_vm3, %v1705_v52, %v1706_v16 }
 0x8b9   :  { %v1715_v29 = vmul.f32 %v10047_v33, %v1708_v56  ;;  %v1718_v34 = vadd.f32 %v1714_v62, %v1707_v23 }
 0x8bb   :  { %v1717_v36 = vadd.f32 %v1715_v29, %v1713_v25  ;;  %v1722_v38 = vadd.f32 %v1720_v27, %v1718_v34 }
 0x8bd   :  { %v1721_v39 = vadd.f32 %v1717_v36, %v1711_v46  ;;  %9644 = vtanh.f32 %v1722_v38 }
 0x8bf   :  { %9646 = vtanh.f32 %v1721_v39 }
 0x8c7   :  { %v10512_v42 = vpop.eup %9644 }
 0x8c8   :  { %v1726_v47 = vmul.f32 0.0625, %v10512_v42 }
 0x8c9   :  { %v10514_v43 = vpop.eup %9646 }
 0x8ca   :  { %v1725_v48 = vmul.f32 0.0625, %v10514_v43  ;;  %v1728_v30 = vadd.f32 %v1726_v47, %v10456_v5 }
 0x8cc   :  { %v1727_v57 = vadd.f32 %v1725_v48, %v10453_v37 }
 0x8ce   :  { %1794 = vmatmul.mubr.f32.vlgmr.msra.gmra.mrb[36].mxu0 %v1727_v57  ;;  %6782 = vmatprep.mubr.f32.mxu1 %v1727_v57 }
 0x8cf   :  { %6783 = vmatmul.mubr.f32.vlgmr.msra.gmra.mrb[18].mxu1 %v1728_v30  ;;  %1799 = vmatprep.mubr.f32.mxu0 %v9847_v0 }
 0x8d0   :  { %8198 = vmatpush1.bf16.msra.mxu0 %v9914_v8  ;;  %8230 = vmatpush3.bf16.msra.mxu1 %v9916_v9 }
 0x8d1   :  { %8200 = vmatprep.subr.bf16.mxu0 %v9919_v13  ;;  %8232 = vmatprep.subr.bf16.mxu1 %v9925_v18 }
 0x8d2   :  { %1800 = vmatmul.mubr.f32.gmra.mrb[38].mxu0 %v1728_v30 }
 0x8d3   :  { %1973 = vmatprep.mubr.f32.mxu0 %v9847_v0 }
 0x8d4   :  { %8202 = vmatpush1.bf16.msra.mxu0 %v9923_v17  ;;  %8234 = vmatpush3.bf16.msra.mxu1 %v9925_v18 }
 0x8d5   :  { %8204 = vmatprep.subr.bf16.mxu0 %v9929_v22  ;;  %8236 = vmatprep.subr.bf16.mxu1 %v9932_v26 }
 0x8d8   :  { %8206 = vmatpush1.bf16.msra.mxu0 %v9935_v31  ;;  %8238 = vmatpush3.bf16.msra.mxu1 %v9932_v26 }
 0x8d9   :  { %8208 = vmatprep.subr.bf16.mxu0 %v9939_v32  ;;  %8240 = vmatprep.subr.bf16.mxu1 %v9942_v35 }
 0x8dc   :  { %8210 = vmatpush1.bf16.msra.mxu0 %v9945_v40  ;;  %8242 = vmatpush3.bf16.msra.mxu1 %v9942_v35 }
 0x8dd   :  { %8212 = vmatprep.subr.bf16.mxu0 %v9949_v41  ;;  %8244 = vmatprep.subr.bf16.mxu1 %v9952_v44 }
 0x8e0   :  { %8214 = vmatpush1.bf16.msra.mxu0 %v9955_v49  ;;  %8246 = vmatpush3.bf16.msra.mxu1 %v9952_v44 }
 0x8e1   :  { %8216 = vmatprep.subr.bf16.mxu0 %v9959_v50  ;;  %8248 = vmatprep.subr.bf16.mxu1 %v9964_v54 }
 0x8e4   :  { %8218 = vmatpush1.bf16.msra.mxu0 %v9968_v59  ;;  %8250 = vmatpush3.bf16.msra.mxu1 %v9964_v54 }
 0x8e5   :  { %8220 = vmatprep.subr.bf16.mxu0 %v9972_v60  ;;  %8252 = vmatprep.subr.bf16.mxu1 %v9975_v63 }
 0x8e8   :  { %8222 = vmatpush1.bf16.msra.mxu0 %v9978_v6  ;;  %8254 = vmatpush3.bf16.msra.mxu1 %v9975_v63 }
 0x8e9   :  { %8224 = vmatprep.subr.bf16.mxu0 %v9982_v7  ;;  %8256 = vmatprep.subr.bf16.mxu1 %v9985_v12 }
 0x8ec   :  { %8226 = vmatpush1.bf16.msra.mxu0 %v9988_v14  ;;  %8258 = vmatpush3.bf16.msra.mxu1 %v9985_v12 }
 0x8ed   :  { %8260 = vmatprep.subr.bf16.mxu0 %v9912_v4  ;;  %8292 = vmatprep.subr.bf16.mxu1 %v9916_v9 }
 0x9a1   :  { %v1795_v58 = vpop.f32.mrb[36].mxu0 }
 0x9a2   :  { %v1797_v1 = vpop.f32.mrb[37].mxu0  ;;  %v6784_v2 = vpop.f32.mrb[18].mxu1  ;;  %v1881_v11 = vrot.slane %v1795_v58, 7 }
 0x9a3   :  { %v1886_v3 = vrot.slane %v6784_v2, 1  ;;  %v1872_v20 = vpop.f32.mrb[19].mxu1  ;;  %v1889_v21 = vadd.f32 %v10507_v24, %v1797_v1 }
 0x9a4   :  { %v1885_v55 = vrot.slane %v1872_v20, 1 }
 0x9a5   :  { %v1801_v10 = vpop.f32.mrb[38].mxu0 }
 0x9a6   :  { %v1887_v53 = vsel %vm282_vm2, %v1885_v55, %v1886_v3  ;;  %v1888_v45 = vsel %vm282_vm2, %v1886_v3, %v1885_v55  ;;  %v1882_v51 = vrot.slane %v1801_v10, 7  ;;  %v1803_v52 = vpop.f32.mrb[39].mxu0 }
 0x9a7   :  { %v1890_v46 = vadd.f32 %v10500_v61, %v1803_v52  ;;  %v1896_v62 = vmul.f32 %v10042_v28, %v1888_v45 }
 0x9a8   :  { %v1884_v15 = vsel %vm277_vm3, %v1882_v51, %v1881_v11  ;;  %v1883_v16 = vsel %vm277_vm3, %v1881_v11, %v1882_v51 }
 0x9a9   :  { %v1891_v56 = vmul.f32 %v10047_v33, %v1884_v15  ;;  %v1894_v23 = vadd.f32 %v1890_v46, %v1883_v16 }
 0x9ab   :  { %v1893_v25 = vadd.f32 %v1891_v56, %v1889_v21  ;;  %v1898_v27 = vadd.f32 %v1896_v62, %v1894_v23 }
 0x9ad   :  { %v1897_v29 = vadd.f32 %v1893_v25, %v1887_v53  ;;  %9648 = vtanh.f32 %v1898_v27 }
 0x9af   :  { %9650 = vtanh.f32 %v1897_v29 }
 0x9b7   :  { %v10566_v34 = vpop.eup %9648 }
 0x9b8   :  { %v1906_v38 = vmul.f32 0.0625, %v10566_v34  ;;  %v1902_v27 = vmul.f32 2.0, %v10566_v34 }
 0x9b9   :  { %v10568_v36 = vpop.eup %9650 }
 0x9ba   :  { %v1905_v39 = vmul.f32 0.0625, %v10568_v36  ;;  %v1908_v48 = vadd.f32 %v1906_v38, %v10456_v5  ;;  %v1901_v29 = vmul.f32 2.0, %v10568_v36 }
 0x9bc   :  { %v1907_v47 = vadd.f32 %v1905_v39, %v10453_v37  ;;  %v1904_v39 = vadd.f32 %v10512_v42, %v1902_v27 }
 0x9be   :  { %1974 = vmatmul.mubr.f32.vlgmr.msra.gmra.mrb[40].mxu0 %v1907_v47  ;;  %6817 = vmatprep.mubr.f32.mxu1 %v1907_v47 }
 0x9bf   :  { %6818 = vmatmul.mubr.f32.vlgmr.msra.gmra.mrb[20].mxu1 %v1908_v48  ;;  %1979 = vmatprep.mubr.f32.mxu0 %v9847_v0 }
 0x9c0   :  { %8262 = vmatpush1.bf16.msra.mxu0 %v9914_v8  ;;  %8294 = vmatpush3.bf16.msra.mxu1 %v9916_v9 }
 0x9c1   :  { %8264 = vmatprep.subr.bf16.mxu0 %v9919_v13  ;;  %8296 = vmatprep.subr.bf16.mxu1 %v9925_v18 }
 0x9c2   :  { %1980 = vmatmul.mubr.f32.gmra.mrb[42].mxu0 %v1908_v48 }
 0x9c3   :  { %2153 = vmatprep.mubr.f32.mxu0 %v9847_v0 }
 0x9c4   :  { %8266 = vmatpush1.bf16.msra.mxu0 %v9923_v17  ;;  %8298 = vmatpush3.bf16.msra.mxu1 %v9925_v18 }
 0x9c5   :  { %8268 = vmatprep.subr.bf16.mxu0 %v9929_v22  ;;  %8300 = vmatprep.subr.bf16.mxu1 %v9932_v26 }
 0x9c8   :  { %8270 = vmatpush1.bf16.msra.mxu0 %v9935_v31  ;;  %8302 = vmatpush3.bf16.msra.mxu1 %v9932_v26 }
 0x9c9   :  { %8272 = vmatprep.subr.bf16.mxu0 %v9939_v32  ;;  %8304 = vmatprep.subr.bf16.mxu1 %v9942_v35 }
 0x9cc   :  { %8274 = vmatpush1.bf16.msra.mxu0 %v9945_v40  ;;  %8306 = vmatpush3.bf16.msra.mxu1 %v9942_v35 }
 0x9cd   :  { %8276 = vmatprep.subr.bf16.mxu0 %v9949_v41  ;;  %8308 = vmatprep.subr.bf16.mxu1 %v9952_v44 }
 0x9d0   :  { %8278 = vmatpush1.bf16.msra.mxu0 %v9955_v49  ;;  %8310 = vmatpush3.bf16.msra.mxu1 %v9952_v44 }
 0x9d1   :  { %8280 = vmatprep.subr.bf16.mxu0 %v9959_v50  ;;  %8312 = vmatprep.subr.bf16.mxu1 %v9964_v54 }
 0x9d4   :  { %8282 = vmatpush1.bf16.msra.mxu0 %v9968_v59  ;;  %8314 = vmatpush3.bf16.msra.mxu1 %v9964_v54 }
 0x9d5   :  { %8284 = vmatprep.subr.bf16.mxu0 %v9972_v60  ;;  %8316 = vmatprep.subr.bf16.mxu1 %v9975_v63 }
 0x9d8   :  { %8286 = vmatpush1.bf16.msra.mxu0 %v9978_v6  ;;  %8318 = vmatpush3.bf16.msra.mxu1 %v9975_v63 }
 0x9d9   :  { %8288 = vmatprep.subr.bf16.mxu0 %v9982_v7  ;;  %8320 = vmatprep.subr.bf16.mxu1 %v9985_v12 }
 0x9dc   :  { %8290 = vmatpush1.bf16.msra.mxu0 %v9988_v14  ;;  %8322 = vmatpush3.bf16.msra.mxu1 %v9985_v12 }
 0x9dd   :  { %8324 = vmatprep.subr.bf16.mxu0 %v9912_v4  ;;  %8356 = vmatprep.subr.bf16.mxu1 %v9916_v9 }
 0xa91   :  { %v1975_v57 = vpop.f32.mrb[40].mxu0 }
 0xa92   :  { %v1977_v30 = vpop.f32.mrb[41].mxu0  ;;  %v6819_v58 = vpop.f32.mrb[20].mxu1  ;;  %v2061_v55 = vrot.slane %v1975_v57, 7 }
 0xa93   :  { %v2066_v1 = vrot.slane %v6819_v58, 1  ;;  %v2052_v2 = vpop.f32.mrb[21].mxu1  ;;  %v2069_v15 = vadd.f32 %v10507_v24, %v1977_v30  ;;  %v1903_v30 = vadd.f32 %v10514_v43, %v1901_v29 }
 0xa94   :  { %v2065_v3 = vrot.slane %v2052_v2, 1 }
 0xa95   :  { %v1981_v20 = vpop.f32.mrb[42].mxu0 }
 0xa96   :  { %v2067_v10 = vsel %vm282_vm2, %v2065_v3, %v2066_v1  ;;  %v2068_v11 = vsel %vm282_vm2, %v2066_v1, %v2065_v3  ;;  %v2062_v53 = vrot.slane %v1981_v20, 7  ;;  %v1983_v45 = vpop.f32.mrb[43].mxu0 }
 0xa97   :  { %v2070_v51 = vadd.f32 %v10500_v61, %v1983_v45  ;;  %v2076_v16 = vmul.f32 %v10042_v28, %v2068_v11 }
 0xa98   :  { %v2064_v52 = vsel %vm277_vm3, %v2062_v53, %v2061_v55  ;;  %v2063_v46 = vsel %vm277_vm3, %v2061_v55, %v2062_v53 }
 0xa99   :  { %v2071_v21 = vmul.f32 %v10047_v33, %v2064_v52  ;;  %v2074_v62 = vadd.f32 %v2070_v51, %v2063_v46 }
 0xa9b   :  { %v2073_v56 = vadd.f32 %v2071_v21, %v2069_v15  ;;  %v2078_v23 = vadd.f32 %v2076_v16, %v2074_v62 }
 0xa9d   :  { %v2077_v25 = vadd.f32 %v2073_v56, %v2067_v10  ;;  %9652 = vtanh.f32 %v2078_v23 }
 0xa9f   :  { %9654 = vtanh.f32 %v2077_v25 }
 0xaa7   :  { %v9653_v38 = vpop.eup %9652 }
 0xaa8   :  { %v2082_v47 = vmul.f32 2.0, %v9653_v38  ;;  %v2086_v57 = vmul.f32 0.125, %v9653_v38 }
 0xaa9   :  { %v9655_v48 = vpop.eup %9654 }
 0xaaa   :  { %v2081_v58 = vmul.f32 2.0, %v9655_v48  ;;  %v2085_v1 = vmul.f32 0.125, %v9655_v48  ;;  %v10624_v2 = vadd.f32 %v2082_v47, %v1904_v39  ;;  %v2088_v34 = vadd.f32 %v2086_v57, %v10456_v5 }
 0xaac   :  { %v2087_v3 = vadd.f32 %v2085_v1, %v10453_v37  ;;  %v10627_v20 = vadd.f32 %v2081_v58, %v1903_v30 }
 0xaae   :  { %2154 = vmatmul.mubr.f32.vlgmr.msra.gmra.mrb[44].mxu0 %v2087_v3  ;;  %6852 = vmatprep.mubr.f32.mxu1 %v2087_v3 }
 0xaaf   :  { %6853 = vmatmul.mubr.f32.vlgmr.msra.gmra.mrb[22].mxu1 %v2088_v34  ;;  %2159 = vmatprep.mubr.f32.mxu0 %v9847_v0 }
 0xab0   :  { %8326 = vmatpush1.bf16.msra.mxu0 %v9914_v8  ;;  %8358 = vmatpush3.bf16.msra.mxu1 %v9916_v9 }
 0xab1   :  { %8328 = vmatprep.subr.bf16.mxu0 %v9919_v13  ;;  %8360 = vmatprep.subr.bf16.mxu1 %v9925_v18 }
 0xab2   :  { %2160 = vmatmul.mubr.f32.gmra.mrb[46].mxu0 %v2088_v34 }
 0xab3   :  { %2331 = vmatprep.mubr.f32.mxu0 %v9847_v0 }
 0xab4   :  { %8330 = vmatpush1.bf16.msra.mxu0 %v9923_v17  ;;  %8362 = vmatpush3.bf16.msra.mxu1 %v9925_v18 }
 0xab5   :  { %8332 = vmatprep.subr.bf16.mxu0 %v9929_v22  ;;  %8364 = vmatprep.subr.bf16.mxu1 %v9932_v26 }
 0xab8   :  { %8334 = vmatpush1.bf16.msra.mxu0 %v9935_v31  ;;  %8366 = vmatpush3.bf16.msra.mxu1 %v9932_v26 }
 0xab9   :  { %8336 = vmatprep.subr.bf16.mxu0 %v9939_v32  ;;  %8368 = vmatprep.subr.bf16.mxu1 %v9942_v35 }
 0xabc   :  { %8338 = vmatpush1.bf16.msra.mxu0 %v9945_v40  ;;  %8370 = vmatpush3.bf16.msra.mxu1 %v9942_v35 }
 0xabd   :  { %8340 = vmatprep.subr.bf16.mxu0 %v9949_v41  ;;  %8372 = vmatprep.subr.bf16.mxu1 %v9952_v44 }
 0xac0   :  { %8342 = vmatpush1.bf16.msra.mxu0 %v9955_v49  ;;  %8374 = vmatpush3.bf16.msra.mxu1 %v9952_v44 }
 0xac1   :  { %8344 = vmatprep.subr.bf16.mxu0 %v9959_v50  ;;  %8376 = vmatprep.subr.bf16.mxu1 %v9964_v54 }
 0xac4   :  { %8346 = vmatpush1.bf16.msra.mxu0 %v9968_v59  ;;  %8378 = vmatpush3.bf16.msra.mxu1 %v9964_v54 }
 0xac5   :  { %8348 = vmatprep.subr.bf16.mxu0 %v9972_v60  ;;  %8380 = vmatprep.subr.bf16.mxu1 %v9975_v63 }
 0xac8   :  { %8350 = vmatpush1.bf16.msra.mxu0 %v9978_v6  ;;  %8382 = vmatpush3.bf16.msra.mxu1 %v9975_v63 }
 0xac9   :  { %8352 = vmatprep.subr.bf16.mxu0 %v9982_v7  ;;  %8384 = vmatprep.subr.bf16.mxu1 %v9985_v12 }
 0xacc   :  { %8354 = vmatpush1.bf16.msra.mxu0 %v9988_v14  ;;  %8386 = vmatpush3.bf16.msra.mxu1 %v9985_v12 }
 0xacd   :  { %8388 = vmatprep.subr.bf16.mxu0 %v9912_v4  ;;  %8420 = vmatprep.subr.bf16.mxu1 %v9916_v9 }
 0xb81   :  { %v2155_v42 = vpop.f32.mrb[44].mxu0 }
 0xb82   :  { %v2157_v43 = vpop.f32.mrb[45].mxu0  ;;  %v6854_v36 = vpop.f32.mrb[22].mxu1  ;;  %v2241_v45 = vrot.slane %v2155_v42, 7 }
 0xb83   :  { %v2246_v55 = vrot.slane %v6854_v36, 1  ;;  %v2232_v10 = vpop.f32.mrb[23].mxu1  ;;  %v2249_v56 = vadd.f32 %v10507_v24, %v2157_v43 }
 0xb84   :  { %v2245_v11 = vrot.slane %v2232_v10, 1 }
 0xb85   :  { %v2161_v53 = vpop.f32.mrb[46].mxu0 }
 0xb86   :  { %v2247_v51 = vsel %vm282_vm2, %v2245_v11, %v2246_v55  ;;  %v2248_v52 = vsel %vm282_vm2, %v2246_v55, %v2245_v11  ;;  %v2242_v46 = vrot.slane %v2161_v53, 7  ;;  %v2163_v15 = vpop.f32.mrb[47].mxu0 }
 0xb87   :  { %v2250_v16 = vadd.f32 %v10500_v61, %v2163_v15  ;;  %v2256_v23 = vmul.f32 %v10042_v28, %v2248_v52 }
 0xb88   :  { %v2244_v21 = vsel %vm277_vm3, %v2242_v46, %v2241_v45  ;;  %v2243_v62 = vsel %vm277_vm3, %v2241_v45, %v2242_v46 }
 0xb89   :  { %v2251_v25 = vmul.f32 %v10047_v33, %v2244_v21  ;;  %v2254_v27 = vadd.f32 %v2250_v16, %v2243_v62 }
 0xb8b   :  { %v2253_v29 = vadd.f32 %v2251_v25, %v2249_v56  ;;  %v2258_v38 = vadd.f32 %v2256_v23, %v2254_v27 }
 0xb8d   :  { %v2257_v39 = vadd.f32 %v2253_v29, %v2247_v51  ;;  %9656 = vtanh.f32 %v2258_v38 }
 0xb8f   :  { %9658 = vtanh.f32 %v2257_v39 }
 0xb97   :  { %v9657_v47 = vpop.eup %9656 }
 0xb98   :  { %v2262_v48 = vadd.f32 %v9657_v47, %v10624_v2 }
 0xb99   :  { %v9659_v57 = vpop.eup %9658 }
 0xb9a   :  { %v2261_v30 = vadd.f32 %v9659_v57, %v10627_v20  ;;  %v2264_v58 = vmul.f32 0.020833334, %v2262_v48 }
 0xb9c   :  { %v2263_v1 = vmul.f32 0.020833334, %v2261_v30  ;;  %v10682_v34 = vadd.f32 %v2264_v58, %v10456_v5 }
 0xb9e   :  { %v10679_v3 = vadd.f32 %v2263_v1, %v10453_v37 }
 0xba0   :  { %2332 = vmatmul.mubr.f32.vlgmr.msra.gmra.mrb[48].mxu0 %v10679_v3  ;;  %6887 = vmatprep.mubr.f32.mxu1 %v10679_v3 }
 0xba1   :  { %6888 = vmatmul.mubr.f32.vlgmr.msra.gmra.mrb[24].mxu1 %v10682_v34  ;;  %2337 = vmatprep.mubr.f32.mxu0 %v9847_v0 }
 0xba2   :  { %8390 = vmatpush1.bf16.msra.mxu0 %v9914_v8  ;;  %8422 = vmatpush3.bf16.msra.mxu1 %v9916_v9 }
 0xba3   :  { %8392 = vmatprep.subr.bf16.mxu0 %v9919_v13  ;;  %8424 = vmatprep.subr.bf16.mxu1 %v9925_v18 }
 0xba4   :  { %2338 = vmatmul.mubr.f32.gmra.mrb[50].mxu0 %v10682_v34 }
 0xba5   :  { %2507 = vmatprep.mubr.f32.mxu0 %v9847_v0 }
 0xba6   :  { %8394 = vmatpush1.bf16.msra.mxu0 %v9923_v17  ;;  %8426 = vmatpush3.bf16.msra.mxu1 %v9925_v18 }
 0xba7   :  { %8396 = vmatprep.subr.bf16.mxu0 %v9929_v22  ;;  %8428 = vmatprep.subr.bf16.mxu1 %v9932_v26 }
 0xbaa   :  { %8398 = vmatpush1.bf16.msra.mxu0 %v9935_v31  ;;  %8430 = vmatpush3.bf16.msra.mxu1 %v9932_v26 }
 0xbab   :  { %8400 = vmatprep.subr.bf16.mxu0 %v9939_v32  ;;  %8432 = vmatprep.subr.bf16.mxu1 %v9942_v35 }
 0xbae   :  { %8402 = vmatpush1.bf16.msra.mxu0 %v9945_v40  ;;  %8434 = vmatpush3.bf16.msra.mxu1 %v9942_v35 }
 0xbaf   :  { %8404 = vmatprep.subr.bf16.mxu0 %v9949_v41  ;;  %8436 = vmatprep.subr.bf16.mxu1 %v9952_v44 }
 0xbb2   :  { %8406 = vmatpush1.bf16.msra.mxu0 %v9955_v49  ;;  %8438 = vmatpush3.bf16.msra.mxu1 %v9952_v44 }
 0xbb3   :  { %8408 = vmatprep.subr.bf16.mxu0 %v9959_v50  ;;  %8440 = vmatprep.subr.bf16.mxu1 %v9964_v54 }
 0xbb6   :  { %8410 = vmatpush1.bf16.msra.mxu0 %v9968_v59  ;;  %8442 = vmatpush3.bf16.msra.mxu1 %v9964_v54 }
 0xbb7   :  { %8412 = vmatprep.subr.bf16.mxu0 %v9972_v60  ;;  %8444 = vmatprep.subr.bf16.mxu1 %v9975_v63 }
 0xbba   :  { %8414 = vmatpush1.bf16.msra.mxu0 %v9978_v6  ;;  %8446 = vmatpush3.bf16.msra.mxu1 %v9975_v63 }
 0xbbb   :  { %8416 = vmatprep.subr.bf16.mxu0 %v9982_v7  ;;  %8448 = vmatprep.subr.bf16.mxu1 %v9985_v12 }
 0xbbe   :  { %8418 = vmatpush1.bf16.msra.mxu0 %v9988_v14  ;;  %8450 = vmatpush3.bf16.msra.mxu1 %v9985_v12 }
 0xbbf   :  { %8452 = vmatprep.subr.bf16.mxu0 %v9912_v4  ;;  %8484 = vmatprep.subr.bf16.mxu1 %v9916_v9 }
 0xc73   :  { %v2333_v37 = vpop.f32.mrb[48].mxu0 }
 0xc74   :  { %v2335_v5 = vpop.f32.mrb[49].mxu0  ;;  %v6889_v2 = vpop.f32.mrb[24].mxu1  ;;  %v2419_v55 = vrot.slane %v2333_v37, 7 }
 0xc75   :  { %v2424_v20 = vrot.slane %v6889_v2, 1  ;;  %v2410_v42 = vpop.f32.mrb[25].mxu1  ;;  %v2427_v15 = vadd.f32 %v10507_v24, %v2335_v5 }
 0xc76   :  { %v2423_v43 = vrot.slane %v2410_v42, 1 }
 0xc77   :  { %v2339_v36 = vpop.f32.mrb[50].mxu0 }
 0xc78   :  { %v2425_v10 = vsel %vm282_vm2, %v2423_v43, %v2424_v20  ;;  %v2426_v11 = vsel %vm282_vm2, %v2424_v20, %v2423_v43  ;;  %v2420_v53 = vrot.slane %v2339_v36, 7  ;;  %v2341_v45 = vpop.f32.mrb[51].mxu0 }
 0xc79   :  { %v2428_v51 = vadd.f32 %v10500_v61, %v2341_v45  ;;  %v2434_v16 = vmul.f32 %v10042_v28, %v2426_v11 }
 0xc7a   :  { %v2422_v52 = vsel %vm277_vm3, %v2420_v53, %v2419_v55  ;;  %v2421_v46 = vsel %vm277_vm3, %v2419_v55, %v2420_v53 }
 0xc7b   :  { %v2429_v21 = vmul.f32 %v10047_v33, %v2422_v52  ;;  %v2432_v62 = vadd.f32 %v2428_v51, %v2421_v46 }
 0xc7d   :  { %v2431_v56 = vadd.f32 %v2429_v21, %v2427_v15  ;;  %v2436_v23 = vadd.f32 %v2434_v16, %v2432_v62 }
 0xc7f   :  { %v2435_v25 = vadd.f32 %v2431_v56, %v2425_v10  ;;  %9660 = vtanh.f32 %v2436_v23 }
 0xc81   :  { %9662 = vtanh.f32 %v2435_v25 }
 0xc89   :  { %v10734_v27 = vpop.eup %9660 }
 0xc8a   :  { %v2440_v38 = vmul.f32 0.0625, %v10734_v27 }
 0xc8b   :  { %v10736_v29 = vpop.eup %9662 }
 0xc8c   :  { %v2439_v39 = vmul.f32 0.0625, %v10736_v29  ;;  %v2442_v48 = vadd.f32 %v2440_v38, %v10682_v34 }
 0xc8e   :  { %v2441_v47 = vadd.f32 %v2439_v39, %v10679_v3 }
 0xc90   :  { %2508 = vmatmul.mubr.f32.vlgmr.msra.gmra.mrb[52].mxu0 %v2441_v47  ;;  %6922 = vmatprep.mubr.f32.mxu1 %v2441_v47 }
 0xc91   :  { %6923 = vmatmul.mubr.f32.vlgmr.msra.gmra.mrb[26].mxu1 %v2442_v48  ;;  %2513 = vmatprep.mubr.f32.mxu0 %v9847_v0 }
 0xc92   :  { %8454 = vmatpush1.bf16.msra.mxu0 %v9914_v8  ;;  %8486 = vmatpush3.bf16.msra.mxu1 %v9916_v9 }
 0xc93   :  { %8456 = vmatprep.subr.bf16.mxu0 %v9919_v13  ;;  %8488 = vmatprep.subr.bf16.mxu1 %v9925_v18 }
 0xc94   :  { %2514 = vmatmul.mubr.f32.gmra.mrb[54].mxu0 %v2442_v48 }
 0xc95   :  { %2687 = vmatprep.mubr.f32.mxu0 %v9847_v0 }
 0xc96   :  { %8458 = vmatpush1.bf16.msra.mxu0 %v9923_v17  ;;  %8490 = vmatpush3.bf16.msra.mxu1 %v9925_v18 }
 0xc97   :  { %8460 = vmatprep.subr.bf16.mxu0 %v9929_v22  ;;  %8492 = vmatprep.subr.bf16.mxu1 %v9932_v26 }
 0xc9a   :  { %8462 = vmatpush1.bf16.msra.mxu0 %v9935_v31  ;;  %8494 = vmatpush3.bf16.msra.mxu1 %v9932_v26 }
 0xc9b   :  { %8464 = vmatprep.subr.bf16.mxu0 %v9939_v32  ;;  %8496 = vmatprep.subr.bf16.mxu1 %v9942_v35 }
 0xc9e   :  { %8466 = vmatpush1.bf16.msra.mxu0 %v9945_v40  ;;  %8498 = vmatpush3.bf16.msra.mxu1 %v9942_v35 }
 0xc9f   :  { %8468 = vmatprep.subr.bf16.mxu0 %v9949_v41  ;;  %8500 = vmatprep.subr.bf16.mxu1 %v9952_v44 }
 0xca2   :  { %8470 = vmatpush1.bf16.msra.mxu0 %v9955_v49  ;;  %8502 = vmatpush3.bf16.msra.mxu1 %v9952_v44 }
 0xca3   :  { %8472 = vmatprep.subr.bf16.mxu0 %v9959_v50  ;;  %8504 = vmatprep.subr.bf16.mxu1 %v9964_v54 }
 0xca6   :  { %8474 = vmatpush1.bf16.msra.mxu0 %v9968_v59  ;;  %8506 = vmatpush3.bf16.msra.mxu1 %v9964_v54 }
 0xca7   :  { %8476 = vmatprep.subr.bf16.mxu0 %v9972_v60  ;;  %8508 = vmatprep.subr.bf16.mxu1 %v9975_v63 }
 0xcaa   :  { %8478 = vmatpush1.bf16.msra.mxu0 %v9978_v6  ;;  %8510 = vmatpush3.bf16.msra.mxu1 %v9975_v63 }
 0xcab   :  { %8480 = vmatprep.subr.bf16.mxu0 %v9982_v7  ;;  %8512 = vmatprep.subr.bf16.mxu1 %v9985_v12 }
 0xcae   :  { %8482 = vmatpush1.bf16.msra.mxu0 %v9988_v14  ;;  %8514 = vmatpush3.bf16.msra.mxu1 %v9985_v12 }
 0xcaf   :  { %8516 = vmatprep.subr.bf16.mxu0 %v9912_v4  ;;  %8548 = vmatprep.subr.bf16.mxu1 %v9916_v9 }
 0xd63   :  { %v2509_v57 = vpop.f32.mrb[52].mxu0 }
 0xd64   :  { %v2511_v30 = vpop.f32.mrb[53].mxu0  ;;  %v6924_v58 = vpop.f32.mrb[26].mxu1  ;;  %v2595_v20 = vrot.slane %v2509_v57, 7 }
 0xd65   :  { %v2600_v1 = vrot.slane %v6924_v58, 1  ;;  %v2586_v37 = vpop.f32.mrb[27].mxu1  ;;  %v2603_v45 = vadd.f32 %v10507_v24, %v2511_v30 }
 0xd66   :  { %v2599_v5 = vrot.slane %v2586_v37, 1 }
 0xd67   :  { %v2515_v2 = vpop.f32.mrb[54].mxu0 }
 0xd68   :  { %v2601_v42 = vsel %vm282_vm2, %v2599_v5, %v2600_v1  ;;  %v2602_v43 = vsel %vm282_vm2, %v2600_v1, %v2599_v5  ;;  %v2596_v36 = vrot.slane %v2515_v2, 7  ;;  %v2517_v55 = vpop.f32.mrb[55].mxu0 }
 0xd69   :  { %v2604_v10 = vadd.f32 %v10500_v61, %v2517_v55  ;;  %v2610_v51 = vmul.f32 %v10042_v28, %v2602_v43 }
 0xd6a   :  { %v2598_v11 = vsel %vm277_vm3, %v2596_v36, %v2595_v20  ;;  %v2597_v53 = vsel %vm277_vm3, %v2595_v20, %v2596_v36 }
 0xd6b   :  { %v2605_v52 = vmul.f32 %v10047_v33, %v2598_v11  ;;  %v2608_v46 = vadd.f32 %v2604_v10, %v2597_v53 }
 0xd6d   :  { %v2607_v15 = vadd.f32 %v2605_v52, %v2603_v45  ;;  %v2612_v16 = vadd.f32 %v2610_v51, %v2608_v46 }
 0xd6f   :  { %v2611_v21 = vadd.f32 %v2607_v15, %v2601_v42  ;;  %9664 = vtanh.f32 %v2612_v16 }
 0xd71   :  { %9666 = vtanh.f32 %v2611_v21 }
 0xd79   :  { %v10788_v62 = vpop.eup %9664 }
 0xd7a   :  { %v2620_v23 = vmul.f32 0.0625, %v10788_v62  ;;  %v2616_v16 = vmul.f32 2.0, %v10788_v62 }
 0xd7b   :  { %v10790_v56 = vpop.eup %9666 }
 0xd7c   :  { %v2619_v25 = vmul.f32 0.0625, %v10790_v56  ;;  %v2622_v39 = vadd.f32 %v2620_v23, %v10682_v34  ;;  %v2615_v21 = vmul.f32 2.0, %v10790_v56 }
 0xd7e   :  { %v2621_v38 = vadd.f32 %v2619_v25, %v10679_v3  ;;  %v2618_v25 = vadd.f32 %v10734_v27, %v2616_v16 }
 0xd80   :  { %2688 = vmatmul.mubr.f32.vlgmr.msra.gmra.mrb[56].mxu0 %v2621_v38  ;;  %6957 = vmatprep.mubr.f32.mxu1 %v2621_v38 }
 0xd81   :  { %6958 = vmatmul.mubr.f32.vlgmr.msra.gmra.mrb[28].mxu1 %v2622_v39  ;;  %2693 = vmatprep.mubr.f32.mxu0 %v9847_v0 }
 0xd82   :  { %8518 = vmatpush1.bf16.msra.mxu0 %v9914_v8  ;;  %8550 = vmatpush3.bf16.msra.mxu1 %v9916_v9 }
 0xd83   :  { %8520 = vmatprep.subr.bf16.mxu0 %v9919_v13  ;;  %8552 = vmatprep.subr.bf16.mxu1 %v9925_v18 }
 0xd84   :  { %2694 = vmatmul.mubr.f32.gmra.mrb[58].mxu0 %v2622_v39 }
 0xd85   :  { %2867 = vmatprep.mubr.f32.mxu0 %v9847_v0 }
 0xd86   :  { %8522 = vmatpush1.bf16.msra.mxu0 %v9923_v17  ;;  %8554 = vmatpush3.bf16.msra.mxu1 %v9925_v18 }
 0xd87   :  { %8524 = vmatprep.subr.bf16.mxu0 %v9929_v22  ;;  %8556 = vmatprep.subr.bf16.mxu1 %v9932_v26 }
 0xd8a   :  { %8526 = vmatpush1.bf16.msra.mxu0 %v9935_v31  ;;  %8558 = vmatpush3.bf16.msra.mxu1 %v9932_v26 }
 0xd8b   :  { %8528 = vmatprep.subr.bf16.mxu0 %v9939_v32  ;;  %8560 = vmatprep.subr.bf16.mxu1 %v9942_v35 }
 0xd8e   :  { %8530 = vmatpush1.bf16.msra.mxu0 %v9945_v40  ;;  %8562 = vmatpush3.bf16.msra.mxu1 %v9942_v35 }
 0xd8f   :  { %8532 = vmatprep.subr.bf16.mxu0 %v9949_v41  ;;  %8564 = vmatprep.subr.bf16.mxu1 %v9952_v44 }
 0xd92   :  { %8534 = vmatpush1.bf16.msra.mxu0 %v9955_v49  ;;  %8566 = vmatpush3.bf16.msra.mxu1 %v9952_v44 }
 0xd93   :  { %8536 = vmatprep.subr.bf16.mxu0 %v9959_v50  ;;  %8568 = vmatprep.subr.bf16.mxu1 %v9964_v54 }
 0xd96   :  { %8538 = vmatpush1.bf16.msra.mxu0 %v9968_v59  ;;  %8570 = vmatpush3.bf16.msra.mxu1 %v9964_v54 }
 0xd97   :  { %8540 = vmatprep.subr.bf16.mxu0 %v9972_v60  ;;  %8572 = vmatprep.subr.bf16.mxu1 %v9975_v63 }
 0xd9a   :  { %8542 = vmatpush1.bf16.msra.mxu0 %v9978_v6  ;;  %8574 = vmatpush3.bf16.msra.mxu1 %v9975_v63 }
 0xd9b   :  { %8544 = vmatprep.subr.bf16.mxu0 %v9982_v7  ;;  %8576 = vmatprep.subr.bf16.mxu1 %v9985_v12 }
 0xd9e   :  { %8546 = vmatpush1.bf16.msra.mxu0 %v9988_v14  ;;  %8578 = vmatpush3.bf16.msra.mxu1 %v9985_v12 }
 0xd9f   :  { %8580 = vmatprep.subr.bf16.mxu0 %v9912_v4  ;;  %8612 = vmatprep.subr.bf16.mxu1 %v9916_v9 }
 0xe53   :  { %v2689_v47 = vpop.f32.mrb[56].mxu0 }
 0xe54   :  { %v2691_v48 = vpop.f32.mrb[57].mxu0  ;;  %v6959_v57 = vpop.f32.mrb[28].mxu1  ;;  %v2775_v5 = vrot.slane %v2689_v47, 7 }
 0xe55   :  { %v2780_v30 = vrot.slane %v6959_v57, 1  ;;  %v2766_v58 = vpop.f32.mrb[29].mxu1  ;;  %v2783_v11 = vadd.f32 %v10507_v24, %v2691_v48  ;;  %v2617_v48 = vadd.f32 %v10736_v29, %v2615_v21 }
 0xe56   :  { %v2779_v1 = vrot.slane %v2766_v58, 1 }
 0xe57   :  { %v2695_v37 = vpop.f32.mrb[58].mxu0 }
 0xe58   :  { %v2781_v2 = vsel %vm282_vm2, %v2779_v1, %v2780_v30  ;;  %v2782_v20 = vsel %vm282_vm2, %v2780_v30, %v2779_v1  ;;  %v2776_v42 = vrot.slane %v2695_v37, 7  ;;  %v2697_v43 = vpop.f32.mrb[59].mxu0 }
 0xe59   :  { %v2784_v36 = vadd.f32 %v10500_v61, %v2697_v43  ;;  %v2790_v53 = vmul.f32 %v10042_v28, %v2782_v20 }
 0xe5a   :  { %v2778_v55 = vsel %vm277_vm3, %v2776_v42, %v2775_v5  ;;  %v2777_v10 = vsel %vm277_vm3, %v2775_v5, %v2776_v42 }
 0xe5b   :  { %v2785_v45 = vmul.f32 %v10047_v33, %v2778_v55  ;;  %v2788_v51 = vadd.f32 %v2784_v36, %v2777_v10 }
 0xe5d   :  { %v2787_v52 = vadd.f32 %v2785_v45, %v2783_v11  ;;  %v2792_v46 = vadd.f32 %v2790_v53, %v2788_v51 }
 0xe5f   :  { %v2791_v15 = vadd.f32 %v2787_v52, %v2781_v2  ;;  %9668 = vtanh.f32 %v2792_v46 }
 0xe61   :  { %9670 = vtanh.f32 %v2791_v15 }
 0xe69   :  { %v9669_v23 = vpop.eup %9668 }
 0xe6a   :  { %v2796_v38 = vmul.f32 2.0, %v9669_v23  ;;  %v2800_v47 = vmul.f32 0.125, %v9669_v23 }
 0xe6b   :  { %v9671_v39 = vpop.eup %9670 }
 0xe6c   :  { %v2795_v57 = vmul.f32 2.0, %v9671_v39  ;;  %v2799_v30 = vmul.f32 0.125, %v9671_v39  ;;  %v10846_v58 = vadd.f32 %v2796_v38, %v2618_v25  ;;  %v2802_v62 = vadd.f32 %v2800_v47, %v10682_v34 }
 0xe6e   :  { %v2801_v1 = vadd.f32 %v2799_v30, %v10679_v3  ;;  %v10849_v37 = vadd.f32 %v2795_v57, %v2617_v48 }
 0xe70   :  { %2868 = vmatmul.mubr.f32.vlgmr.msra.gmra.mrb[60].mxu0 %v2801_v1  ;;  %6992 = vmatprep.mubr.f32.mxu1 %v2801_v1 }
 0xe71   :  { %6993 = vmatmul.mubr.f32.vlgmr.msra.gmra.mrb[30].mxu1 %v2802_v62  ;;  %2873 = vmatprep.mubr.f32.mxu0 %v9847_v0 }
 0xe72   :  { %8582 = vmatpush1.bf16.msra.mxu0 %v9914_v8  ;;  %8614 = vmatpush3.bf16.msra.mxu1 %v9916_v9 }
 0xe73   :  { %8584 = vmatprep.subr.bf16.mxu0 %v9919_v13  ;;  %8616 = vmatprep.subr.bf16.mxu1 %v9925_v18 }
 0xe74   :  { %2874 = vmatmul.mubr.f32.gmra.mrb[62].mxu0 %v2802_v62 }
 0xe75   :  { %3045 = vmatprep.mubr.f32.mxu0 %v9847_v0 }
 0xe76   :  { %8586 = vmatpush1.bf16.msra.mxu0 %v9923_v17  ;;  %8618 = vmatpush3.bf16.msra.mxu1 %v9925_v18 }
 0xe77   :  { %8588 = vmatprep.subr.bf16.mxu0 %v9929_v22  ;;  %8620 = vmatprep.subr.bf16.mxu1 %v9932_v26 }
 0xe7a   :  { %8590 = vmatpush1.bf16.msra.mxu0 %v9935_v31  ;;  %8622 = vmatpush3.bf16.msra.mxu1 %v9932_v26 }
 0xe7b   :  { %8592 = vmatprep.subr.bf16.mxu0 %v9939_v32  ;;  %8624 = vmatprep.subr.bf16.mxu1 %v9942_v35 }
 0xe7e   :  { %8594 = vmatpush1.bf16.msra.mxu0 %v9945_v40  ;;  %8626 = vmatpush3.bf16.msra.mxu1 %v9942_v35 }
 0xe7f   :  { %8596 = vmatprep.subr.bf16.mxu0 %v9949_v41  ;;  %8628 = vmatprep.subr.bf16.mxu1 %v9952_v44 }
 0xe82   :  { %8598 = vmatpush1.bf16.msra.mxu0 %v9955_v49  ;;  %8630 = vmatpush3.bf16.msra.mxu1 %v9952_v44 }
 0xe83   :  { %8600 = vmatprep.subr.bf16.mxu0 %v9959_v50  ;;  %8632 = vmatprep.subr.bf16.mxu1 %v9964_v54 }
 0xe86   :  { %8602 = vmatpush1.bf16.msra.mxu0 %v9968_v59  ;;  %8634 = vmatpush3.bf16.msra.mxu1 %v9964_v54 }
 0xe87   :  { %8604 = vmatprep.subr.bf16.mxu0 %v9972_v60  ;;  %8636 = vmatprep.subr.bf16.mxu1 %v9975_v63 }
 0xe8a   :  { %8606 = vmatpush1.bf16.msra.mxu0 %v9978_v6  ;;  %8638 = vmatpush3.bf16.msra.mxu1 %v9975_v63 }
 0xe8b   :  { %8608 = vmatprep.subr.bf16.mxu0 %v9982_v7  ;;  %8640 = vmatprep.subr.bf16.mxu1 %v9985_v12 }
 0xe8e   :  { %8610 = vmatpush1.bf16.msra.mxu0 %v9988_v14  ;;  %8642 = vmatpush3.bf16.msra.mxu1 %v9985_v12 }
 0xe8f   :  { %8644 = vmatprep.subr.bf16.mxu0 %v9912_v4  ;;  %8676 = vmatprep.subr.bf16.mxu1 %v9916_v9 }
 0xf43   :  { %v2869_v27 = vpop.f32.mrb[60].mxu0 }
 0xf44   :  { %v2871_v29 = vpop.f32.mrb[61].mxu0  ;;  %v6994_v56 = vpop.f32.mrb[30].mxu1  ;;  %v2955_v43 = vrot.slane %v2869_v27, 7 }
 0xf45   :  { %v2960_v5 = vrot.slane %v6994_v56, 1  ;;  %v2946_v2 = vpop.f32.mrb[31].mxu1  ;;  %v2963_v52 = vadd.f32 %v10507_v24, %v2871_v29 }
 0xf46   :  { %v2959_v20 = vrot.slane %v2946_v2, 1 }
 0xf47   :  { %v2875_v42 = vpop.f32.mrb[62].mxu0 }
 0xf48   :  { %v2961_v36 = vsel %vm282_vm2, %v2959_v20, %v2960_v5  ;;  %v2962_v55 = vsel %vm282_vm2, %v2960_v5, %v2959_v20  ;;  %v2956_v10 = vrot.slane %v2875_v42, 7  ;;  %v2877_v11 = vpop.f32.mrb[63].mxu0  ;;  %v10948_v42 = vld [vmem:[#allocation7 + $0x8] sm:$0xff] }
 0xf49   :  { %v2964_v53 = vadd.f32 %v10500_v61, %v2877_v11  ;;  %v2970_v46 = vmul.f32 %v10042_v28, %v2962_v55 }
 0xf4a   :  { %v2958_v45 = vsel %vm277_vm3, %v2956_v10, %v2955_v43  ;;  %v2957_v51 = vsel %vm277_vm3, %v2955_v43, %v2956_v10  ;;  %v10955_v10 = vld [vmem:[#allocation7] sm:$0xff] }
 0xf4b   :  { %v2965_v15 = vmul.f32 %v10047_v33, %v2958_v45  ;;  %v2968_v16 = vadd.f32 %v2964_v53, %v2957_v51 }
 0xf4d   :  { %v2967_v21 = vadd.f32 %v2965_v15, %v2963_v52  ;;  %v2972_v23 = vadd.f32 %v2970_v46, %v2968_v16 }
 0xf4f   :  { %v2971_v25 = vadd.f32 %v2967_v21, %v2961_v36  ;;  %9672 = vtanh.f32 %v2972_v23 }
 0xf51   :  { %9674 = vtanh.f32 %v2971_v25 }
 0xf59   :  { %v9673_v38 = vpop.eup %9672 }
 0xf5a   :  { %v2976_v61 = vadd.f32 %v9673_v38, %v10846_v58 }
 0xf5b   :  { %v9675_v39 = vpop.eup %9674 }
 0xf5c   :  { %v2975_v47 = vadd.f32 %v9675_v39, %v10849_v37  ;;  %v2978_v48 = vmul.f32 0.020833334, %v2976_v61 }
 0xf5e   :  { %v2977_v57 = vmul.f32 0.020833334, %v2975_v47  ;;  %v10904_v30 = vadd.f32 %v2978_v48, %v10682_v34 }
 0xf60   :  { %v10901_v24 = vadd.f32 %v2977_v57, %v10679_v3 }
 0xf62   :  { %3046 = vmatmul.mubr.f32.vlgmr.msra.gmra.mrb[64].mxu0 %v10901_v24  ;;  %7027 = vmatprep.mubr.f32.mxu1 %v10901_v24 }
 0xf63   :  { %7028 = vmatmul.mubr.f32.vlgmr.msra.gmra.mrb[32].mxu1 %v10904_v30  ;;  %3051 = vmatprep.mubr.f32.mxu0 %v9847_v0 }
 0xf64   :  { %8646 = vmatpush1.bf16.msra.mxu0 %v9914_v8  ;;  %8678 = vmatpush3.bf16.msra.mxu1 %v9916_v9 }
 0xf65   :  { %8648 = vmatprep.subr.bf16.mxu0 %v9919_v13  ;;  %8680 = vmatprep.subr.bf16.mxu1 %v9925_v18 }
 0xf66   :  { %3052 = vmatmul.mubr.f32.gmra.mrb[66].mxu0 %v10904_v30 }
 0xf67   :  { %3221 = vmatprep.mubr.f32.mxu0 %v9847_v0 }
 0xf68   :  { %8650 = vmatpush1.bf16.msra.mxu0 %v9923_v17  ;;  %8682 = vmatpush3.bf16.msra.mxu1 %v9925_v18 }
 0xf69   :  { %8652 = vmatprep.subr.bf16.mxu0 %v9929_v22  ;;  %8684 = vmatprep.subr.bf16.mxu1 %v9932_v26 }
 0xf6c   :  { %8654 = vmatpush1.bf16.msra.mxu0 %v9935_v31  ;;  %8686 = vmatpush3.bf16.msra.mxu1 %v9932_v26 }
 0xf6d   :  { %8656 = vmatprep.subr.bf16.mxu0 %v9939_v32  ;;  %8688 = vmatprep.subr.bf16.mxu1 %v9942_v35 }
 0xf70   :  { %8658 = vmatpush1.bf16.msra.mxu0 %v9945_v40  ;;  %8690 = vmatpush3.bf16.msra.mxu1 %v9942_v35 }
 0xf71   :  { %8660 = vmatprep.subr.bf16.mxu0 %v9949_v41  ;;  %8692 = vmatprep.subr.bf16.mxu1 %v9952_v44 }
 0xf74   :  { %8662 = vmatpush1.bf16.msra.mxu0 %v9955_v49  ;;  %8694 = vmatpush3.bf16.msra.mxu1 %v9952_v44 }
 0xf75   :  { %8664 = vmatprep.subr.bf16.mxu0 %v9959_v50  ;;  %8696 = vmatprep.subr.bf16.mxu1 %v9964_v54 }
 0xf78   :  { %8666 = vmatpush1.bf16.msra.mxu0 %v9968_v59  ;;  %8698 = vmatpush3.bf16.msra.mxu1 %v9964_v54 }
 0xf79   :  { %8668 = vmatprep.subr.bf16.mxu0 %v9972_v60  ;;  %8700 = vmatprep.subr.bf16.mxu1 %v9975_v63 }
 0xf7c   :  { %8670 = vmatpush1.bf16.msra.mxu0 %v9978_v6  ;;  %8702 = vmatpush3.bf16.msra.mxu1 %v9975_v63 }
 0xf7d   :  { %8672 = vmatprep.subr.bf16.mxu0 %v9982_v7  ;;  %8704 = vmatprep.subr.bf16.mxu1 %v9985_v12 }
 0xf80   :  { %8674 = vmatpush1.bf16.msra.mxu0 %v9988_v14  ;;  %8706 = vmatpush3.bf16.msra.mxu1 %v9985_v12 }
 0xf81   :  { %8708 = vmatprep.subr.bf16.mxu0 %v9912_v4  ;;  %8740 = vmatprep.subr.bf16.mxu1 %v9916_v9 }
0x1035   :  { %v3047_v3 = vpop.f32.mrb[64].mxu0 }
0x1036   :  { %v3049_v34 = vpop.f32.mrb[65].mxu0  ;;  %v7029_v58 = vpop.f32.mrb[32].mxu1  ;;  %v3133_v29 = vrot.slane %v3047_v3, 7 }
0x1037   :  { %v3138_v1 = vrot.slane %v7029_v58, 1  ;;  %v3124_v37 = vpop.f32.mrb[33].mxu1  ;;  %v3141_v11 = vadd.f32 %v10955_v10, %v3049_v34 }
0x1038   :  { %v3137_v62 = vrot.slane %v3124_v37, 1 }
0x1039   :  { %v3053_v27 = vpop.f32.mrb[66].mxu0 }
0x103a   :  { %v3139_v56 = vsel %vm282_vm2, %v3137_v62, %v3138_v1  ;;  %v3140_v5 = vsel %vm282_vm2, %v3138_v1, %v3137_v62  ;;  %v3134_v2 = vrot.slane %v3053_v27, 7  ;;  %v3055_v20 = vpop.f32.mrb[67].mxu0 }
0x103b   :  { %v3142_v43 = vadd.f32 %v10948_v42, %v3055_v20  ;;  %v3148_v53 = vmul.f32 %v10042_v28, %v3140_v5 }
0x103c   :  { %v3136_v36 = vsel %vm277_vm3, %v3134_v2, %v3133_v29  ;;  %v3135_v55 = vsel %vm277_vm3, %v3133_v29, %v3134_v2 }
0x103d   :  { %v3143_v45 = vmul.f32 %v10047_v33, %v3136_v36  ;;  %v3146_v51 = vadd.f32 %v3142_v43, %v3135_v55 }
0x103f   :  { %v3145_v52 = vadd.f32 %v3143_v45, %v3141_v11  ;;  %v3150_v46 = vadd.f32 %v3148_v53, %v3146_v51 }
0x1041   :  { %v3149_v15 = vadd.f32 %v3145_v52, %v3139_v56  ;;  %9676 = vtanh.f32 %v3150_v46 }
0x1043   :  { %9678 = vtanh.f32 %v3149_v15 }
0x104b   :  { %v10960_v16 = vpop.eup %9676 }
0x104c   :  { %v3154_v23 = vmul.f32 0.0625, %v10960_v16 }
0x104d   :  { %v10962_v21 = vpop.eup %9678 }
0x104e   :  { %v3153_v25 = vmul.f32 0.0625, %v10962_v21  ;;  %v3156_v61 = vadd.f32 %v3154_v23, %v10904_v30 }
0x1050   :  { %v3155_v38 = vadd.f32 %v3153_v25, %v10901_v24 }
0x1052   :  { %3222 = vmatmul.mubr.f32.vlgmr.msra.gmra.mrb[68].mxu0 %v3155_v38  ;;  %7062 = vmatprep.mubr.f32.mxu1 %v3155_v38 }
0x1053   :  { %7063 = vmatmul.mubr.f32.vlgmr.msra.gmra.mrb[34].mxu1 %v3156_v61  ;;  %3227 = vmatprep.mubr.f32.mxu0 %v9847_v0 }
0x1054   :  { %8710 = vmatpush1.bf16.msra.mxu0 %v9914_v8  ;;  %8742 = vmatpush3.bf16.msra.mxu1 %v9916_v9 }
0x1055   :  { %8712 = vmatprep.subr.bf16.mxu0 %v9919_v13  ;;  %8744 = vmatprep.subr.bf16.mxu1 %v9925_v18 }
0x1056   :  { %3228 = vmatmul.mubr.f32.gmra.mrb[70].mxu0 %v3156_v61 }
0x1057   :  { %3401 = vmatprep.mubr.f32.mxu0 %v9847_v0 }
0x1058   :  { %8714 = vmatpush1.bf16.msra.mxu0 %v9923_v17  ;;  %8746 = vmatpush3.bf16.msra.mxu1 %v9925_v18 }
0x1059   :  { %8716 = vmatprep.subr.bf16.mxu0 %v9929_v22  ;;  %8748 = vmatprep.subr.bf16.mxu1 %v9932_v26 }
0x105c   :  { %8718 = vmatpush1.bf16.msra.mxu0 %v9935_v31  ;;  %8750 = vmatpush3.bf16.msra.mxu1 %v9932_v26 }
0x105d   :  { %8720 = vmatprep.subr.bf16.mxu0 %v9939_v32  ;;  %8752 = vmatprep.subr.bf16.mxu1 %v9942_v35 }
0x1060   :  { %8722 = vmatpush1.bf16.msra.mxu0 %v9945_v40  ;;  %8754 = vmatpush3.bf16.msra.mxu1 %v9942_v35 }
0x1061   :  { %8724 = vmatprep.subr.bf16.mxu0 %v9949_v41  ;;  %8756 = vmatprep.subr.bf16.mxu1 %v9952_v44 }
0x1064   :  { %8726 = vmatpush1.bf16.msra.mxu0 %v9955_v49  ;;  %8758 = vmatpush3.bf16.msra.mxu1 %v9952_v44 }
0x1065   :  { %8728 = vmatprep.subr.bf16.mxu0 %v9959_v50  ;;  %8760 = vmatprep.subr.bf16.mxu1 %v9964_v54 }
0x1068   :  { %8730 = vmatpush1.bf16.msra.mxu0 %v9968_v59  ;;  %8762 = vmatpush3.bf16.msra.mxu1 %v9964_v54 }
0x1069   :  { %8732 = vmatprep.subr.bf16.mxu0 %v9972_v60  ;;  %8764 = vmatprep.subr.bf16.mxu1 %v9975_v63 }
0x106c   :  { %8734 = vmatpush1.bf16.msra.mxu0 %v9978_v6  ;;  %8766 = vmatpush3.bf16.msra.mxu1 %v9975_v63 }
0x106d   :  { %8736 = vmatprep.subr.bf16.mxu0 %v9982_v7  ;;  %8768 = vmatprep.subr.bf16.mxu1 %v9985_v12 }
0x1070   :  { %8738 = vmatpush1.bf16.msra.mxu0 %v9988_v14  ;;  %8770 = vmatpush3.bf16.msra.mxu1 %v9985_v12 }
0x1071   :  { %8772 = vmatprep.subr.bf16.mxu0 %v9912_v4  ;;  %8804 = vmatprep.subr.bf16.mxu1 %v9916_v9 }
0x1125   :  { %v3223_v39 = vpop.f32.mrb[68].mxu0 }
0x1126   :  { %v3225_v47 = vpop.f32.mrb[69].mxu0  ;;  %v7064_v48 = vpop.f32.mrb[34].mxu1  ;;  %v3309_v1 = vrot.slane %v3223_v39, 7 }
0x1127   :  { %v3314_v57 = vrot.slane %v7064_v48, 1  ;;  %v3300_v3 = vpop.f32.mrb[35].mxu1  ;;  %v3317_v20 = vadd.f32 %v10955_v10, %v3225_v47 }
0x1128   :  { %v3313_v34 = vrot.slane %v3300_v3, 1 }
0x1129   :  { %v3229_v58 = vpop.f32.mrb[70].mxu0 }
0x112a   :  { %v3315_v37 = vsel %vm282_vm2, %v3313_v34, %v3314_v57  ;;  %v3316_v62 = vsel %vm282_vm2, %v3314_v57, %v3313_v34  ;;  %v3310_v27 = vrot.slane %v3229_v58, 7  ;;  %v3231_v29 = vpop.f32.mrb[71].mxu0 }
0x112b   :  { %v3318_v56 = vadd.f32 %v10948_v42, %v3231_v29  ;;  %v3324_v43 = vmul.f32 %v10042_v28, %v3316_v62 }
0x112c   :  { %v3312_v5 = vsel %vm277_vm3, %v3310_v27, %v3309_v1  ;;  %v3311_v2 = vsel %vm277_vm3, %v3309_v1, %v3310_v27 }
0x112d   :  { %v3319_v36 = vmul.f32 %v10047_v33, %v3312_v5  ;;  %v3322_v55 = vadd.f32 %v3318_v56, %v3311_v2 }
0x112f   :  { %v3321_v11 = vadd.f32 %v3319_v36, %v3317_v20  ;;  %v3326_v53 = vadd.f32 %v3324_v43, %v3322_v55 }
0x1131   :  { %v3325_v45 = vadd.f32 %v3321_v11, %v3315_v37  ;;  %9680 = vtanh.f32 %v3326_v53 }
0x1133   :  { %9682 = vtanh.f32 %v3325_v45 }
0x113b   :  { %v11014_v51 = vpop.eup %9680 }
0x113c   :  { %v3334_v46 = vmul.f32 0.0625, %v11014_v51  ;;  %v3330_v53 = vmul.f32 2.0, %v11014_v51 }
0x113d   :  { %v11016_v52 = vpop.eup %9682 }
0x113e   :  { %v3333_v15 = vmul.f32 0.0625, %v11016_v52  ;;  %v3336_v25 = vadd.f32 %v3334_v46, %v10904_v30  ;;  %v3329_v45 = vmul.f32 2.0, %v11016_v52 }
0x1140   :  { %v3335_v23 = vadd.f32 %v3333_v15, %v10901_v24  ;;  %v3332_v15 = vadd.f32 %v10960_v16, %v3330_v53 }
0x1142   :  { %3402 = vmatmul.mubr.f32.vlgmr.msra.gmra.mrb[72].mxu0 %v3335_v23  ;;  %7097 = vmatprep.mubr.f32.mxu1 %v3335_v23 }
0x1143   :  { %7098 = vmatmul.mubr.f32.vlgmr.msra.gmra.mrb[36].mxu1 %v3336_v25  ;;  %3407 = vmatprep.mubr.f32.mxu0 %v9847_v0 }
0x1144   :  { %8774 = vmatpush1.bf16.msra.mxu0 %v9914_v8  ;;  %8806 = vmatpush3.bf16.msra.mxu1 %v9916_v9 }
0x1145   :  { %8776 = vmatprep.subr.bf16.mxu0 %v9919_v13  ;;  %8808 = vmatprep.subr.bf16.mxu1 %v9925_v18 }
0x1146   :  { %3408 = vmatmul.mubr.f32.gmra.mrb[74].mxu0 %v3336_v25 }
0x1147   :  { %3581 = vmatprep.mubr.f32.mxu0 %v9847_v0 }
0x1148   :  { %8778 = vmatpush1.bf16.msra.mxu0 %v9923_v17  ;;  %8810 = vmatpush3.bf16.msra.mxu1 %v9925_v18 }
0x1149   :  { %8780 = vmatprep.subr.bf16.mxu0 %v9929_v22  ;;  %8812 = vmatprep.subr.bf16.mxu1 %v9932_v26 }
0x114c   :  { %8782 = vmatpush1.bf16.msra.mxu0 %v9935_v31  ;;  %8814 = vmatpush3.bf16.msra.mxu1 %v9932_v26 }
0x114d   :  { %8784 = vmatprep.subr.bf16.mxu0 %v9939_v32  ;;  %8816 = vmatprep.subr.bf16.mxu1 %v9942_v35 }
0x1150   :  { %8786 = vmatpush1.bf16.msra.mxu0 %v9945_v40  ;;  %8818 = vmatpush3.bf16.msra.mxu1 %v9942_v35 }
0x1151   :  { %8788 = vmatprep.subr.bf16.mxu0 %v9949_v41  ;;  %8820 = vmatprep.subr.bf16.mxu1 %v9952_v44 }
0x1154   :  { %8790 = vmatpush1.bf16.msra.mxu0 %v9955_v49  ;;  %8822 = vmatpush3.bf16.msra.mxu1 %v9952_v44 }
0x1155   :  { %8792 = vmatprep.subr.bf16.mxu0 %v9959_v50  ;;  %8824 = vmatprep.subr.bf16.mxu1 %v9964_v54 }
0x1158   :  { %8794 = vmatpush1.bf16.msra.mxu0 %v9968_v59  ;;  %8826 = vmatpush3.bf16.msra.mxu1 %v9964_v54 }
0x1159   :  { %8796 = vmatprep.subr.bf16.mxu0 %v9972_v60  ;;  %8828 = vmatprep.subr.bf16.mxu1 %v9975_v63 }
0x115c   :  { %8798 = vmatpush1.bf16.msra.mxu0 %v9978_v6  ;;  %8830 = vmatpush3.bf16.msra.mxu1 %v9975_v63 }
0x115d   :  { %8800 = vmatprep.subr.bf16.mxu0 %v9982_v7  ;;  %8832 = vmatprep.subr.bf16.mxu1 %v9985_v12 }
0x1160   :  { %8802 = vmatpush1.bf16.msra.mxu0 %v9988_v14  ;;  %8834 = vmatpush3.bf16.msra.mxu1 %v9985_v12 }
0x1161   :  { %8836 = vmatprep.subr.bf16.mxu0 %v9912_v4  ;;  %8868 = vmatprep.subr.bf16.mxu1 %v9916_v9 }
0x1215   :  { %v3403_v38 = vpop.f32.mrb[72].mxu0 }
0x1216   :  { %v3405_v61 = vpop.f32.mrb[73].mxu0  ;;  %v7099_v39 = vpop.f32.mrb[36].mxu1  ;;  %v3489_v34 = vrot.slane %v3403_v38, 7 }
0x1217   :  { %v3494_v47 = vrot.slane %v7099_v39, 1  ;;  %v3480_v48 = vpop.f32.mrb[37].mxu1  ;;  %v3497_v5 = vadd.f32 %v10955_v10, %v3405_v61  ;;  %v3331_v61 = vadd.f32 %v10962_v21, %v3329_v45 }
0x1218   :  { %v3493_v57 = vrot.slane %v3480_v48, 1 }
0x1219   :  { %v3409_v3 = vpop.f32.mrb[74].mxu0 }
0x121a   :  { %v3495_v58 = vsel %vm282_vm2, %v3493_v57, %v3494_v47  ;;  %v3496_v1 = vsel %vm282_vm2, %v3494_v47, %v3493_v57  ;;  %v3490_v37 = vrot.slane %v3409_v3, 7  ;;  %v3411_v62 = vpop.f32.mrb[75].mxu0 }
0x121b   :  { %v3498_v27 = vadd.f32 %v10948_v42, %v3411_v62  ;;  %v3504_v2 = vmul.f32 %v10042_v28, %v3496_v1 }
0x121c   :  { %v3492_v29 = vsel %vm277_vm3, %v3490_v37, %v3489_v34  ;;  %v3491_v56 = vsel %vm277_vm3, %v3489_v34, %v3490_v37 }
0x121d   :  { %v3499_v20 = vmul.f32 %v10047_v33, %v3492_v29  ;;  %v3502_v43 = vadd.f32 %v3498_v27, %v3491_v56 }
0x121f   :  { %v3501_v36 = vadd.f32 %v3499_v20, %v3497_v5  ;;  %v3506_v55 = vadd.f32 %v3504_v2, %v3502_v43 }
0x1221   :  { %v3505_v11 = vadd.f32 %v3501_v36, %v3495_v58  ;;  %9684 = vtanh.f32 %v3506_v55 }
0x1223   :  { %9686 = vtanh.f32 %v3505_v11 }
0x122b   :  { %v9685_v46 = vpop.eup %9684 }
0x122c   :  { %v3510_v23 = vmul.f32 2.0, %v9685_v46  ;;  %v3514_v38 = vmul.f32 0.125, %v9685_v46 }
0x122d   :  { %v9687_v25 = vpop.eup %9686 }
0x122e   :  { %v3509_v39 = vmul.f32 2.0, %v9687_v25  ;;  %v3513_v47 = vmul.f32 0.125, %v9687_v25  ;;  %v11072_v48 = vadd.f32 %v3510_v23, %v3332_v15  ;;  %v3516_v51 = vadd.f32 %v3514_v38, %v10904_v30 }
0x1230   :  { %v3515_v57 = vadd.f32 %v3513_v47, %v10901_v24  ;;  %v11075_v3 = vadd.f32 %v3509_v39, %v3331_v61 }
0x1232   :  { %3582 = vmatmul.mubr.f32.vlgmr.msra.gmra.mrb[76].mxu0 %v3515_v57  ;;  %7132 = vmatprep.mubr.f32.mxu1 %v3515_v57 }
0x1233   :  { %7133 = vmatmul.mubr.f32.vlgmr.msra.gmra.mrb[38].mxu1 %v3516_v51  ;;  %3587 = vmatprep.mubr.f32.mxu0 %v9847_v0 }
0x1234   :  { %8838 = vmatpush1.bf16.msra.mxu0 %v9914_v8  ;;  %8870 = vmatpush3.bf16.msra.mxu1 %v9916_v9 }
0x1235   :  { %8840 = vmatprep.subr.bf16.mxu0 %v9919_v13  ;;  %8872 = vmatprep.subr.bf16.mxu1 %v9925_v18 }
0x1236   :  { %3588 = vmatmul.mubr.f32.gmra.mrb[78].mxu0 %v3516_v51 }
0x1237   :  { %3759 = vmatprep.mubr.f32.mxu0 %v9847_v0 }
0x1238   :  { %8842 = vmatpush1.bf16.msra.mxu0 %v9923_v17  ;;  %8874 = vmatpush3.bf16.msra.mxu1 %v9925_v18 }
0x1239   :  { %8844 = vmatprep.subr.bf16.mxu0 %v9929_v22  ;;  %8876 = vmatprep.subr.bf16.mxu1 %v9932_v26 }
0x123c   :  { %8846 = vmatpush1.bf16.msra.mxu0 %v9935_v31  ;;  %8878 = vmatpush3.bf16.msra.mxu1 %v9932_v26 }
0x123d   :  { %8848 = vmatprep.subr.bf16.mxu0 %v9939_v32  ;;  %8880 = vmatprep.subr.bf16.mxu1 %v9942_v35 }
0x1240   :  { %8850 = vmatpush1.bf16.msra.mxu0 %v9945_v40  ;;  %8882 = vmatpush3.bf16.msra.mxu1 %v9942_v35 }
0x1241   :  { %8852 = vmatprep.subr.bf16.mxu0 %v9949_v41  ;;  %8884 = vmatprep.subr.bf16.mxu1 %v9952_v44 }
0x1244   :  { %8854 = vmatpush1.bf16.msra.mxu0 %v9955_v49  ;;  %8886 = vmatpush3.bf16.msra.mxu1 %v9952_v44 }
0x1245   :  { %8856 = vmatprep.subr.bf16.mxu0 %v9959_v50  ;;  %8888 = vmatprep.subr.bf16.mxu1 %v9964_v54 }
0x1248   :  { %8858 = vmatpush1.bf16.msra.mxu0 %v9968_v59  ;;  %8890 = vmatpush3.bf16.msra.mxu1 %v9964_v54 }
0x1249   :  { %8860 = vmatprep.subr.bf16.mxu0 %v9972_v60  ;;  %8892 = vmatprep.subr.bf16.mxu1 %v9975_v63 }
0x124c   :  { %8862 = vmatpush1.bf16.msra.mxu0 %v9978_v6  ;;  %8894 = vmatpush3.bf16.msra.mxu1 %v9975_v63 }
0x124d   :  { %8864 = vmatprep.subr.bf16.mxu0 %v9982_v7  ;;  %8896 = vmatprep.subr.bf16.mxu1 %v9985_v12 }
0x1250   :  { %8866 = vmatpush1.bf16.msra.mxu0 %v9988_v14  ;;  %8898 = vmatpush3.bf16.msra.mxu1 %v9985_v12 }
0x1251   :  { %8900 = vmatprep.subr.bf16.mxu0 %v9912_v4  ;;  %8932 = vmatprep.subr.bf16.mxu1 %v9916_v9 }
0x1305   :  { %v3583_v16 = vpop.f32.mrb[76].mxu0 }
0x1306   :  { %v3585_v21 = vpop.f32.mrb[77].mxu0  ;;  %v7134_v52 = vpop.f32.mrb[38].mxu1  ;;  %v3669_v62 = vrot.slane %v3583_v16, 7 }
0x1307   :  { %v3674_v34 = vrot.slane %v7134_v52, 1  ;;  %v3660_v58 = vpop.f32.mrb[39].mxu1  ;;  %v3677_v36 = vadd.f32 %v10955_v10, %v3585_v21 }
0x1308   :  { %v3673_v1 = vrot.slane %v3660_v58, 1 }
0x1309   :  { %v3589_v37 = vpop.f32.mrb[78].mxu0 }
0x130a   :  { %v3675_v27 = vsel %vm282_vm2, %v3673_v1, %v3674_v34  ;;  %v3676_v29 = vsel %vm282_vm2, %v3674_v34, %v3673_v1  ;;  %v3670_v56 = vrot.slane %v3589_v37, 7  ;;  %v3591_v5 = vpop.f32.mrb[79].mxu0 }
0x130b   :  { %v3678_v2 = vadd.f32 %v10948_v42, %v3591_v5  ;;  %v3684_v55 = vmul.f32 %v10042_v28, %v3676_v29 }
0x130c   :  { %v3672_v20 = vsel %vm277_vm3, %v3670_v56, %v3669_v62  ;;  %v3671_v43 = vsel %vm277_vm3, %v3669_v62, %v3670_v56 }
0x130d   :  { %v3679_v11 = vmul.f32 %v10047_v33, %v3672_v20  ;;  %v3682_v53 = vadd.f32 %v3678_v2, %v3671_v43 }
0x130f   :  { %v3681_v45 = vadd.f32 %v3679_v11, %v3677_v36  ;;  %v3686_v46 = vadd.f32 %v3684_v55, %v3682_v53 }
0x1311   :  { %v3685_v15 = vadd.f32 %v3681_v45, %v3675_v27  ;;  %9688 = vtanh.f32 %v3686_v46 }
0x1313   :  { %9690 = vtanh.f32 %v3685_v15 }
0x131b   :  { %v9689_v23 = vpop.eup %9688 }
0x131c   :  { %v3690_v25 = vadd.f32 %v9689_v23, %v11072_v48 }
0x131d   :  { %v9691_v38 = vpop.eup %9690 }
0x131e   :  { %v3689_v61 = vadd.f32 %v9691_v38, %v11075_v3  ;;  %v3692_v39 = vmul.f32 0.020833334, %v3690_v25 }
0x1320   :  { %v3691_v47 = vmul.f32 0.020833334, %v3689_v61  ;;  %v11130_v51 = vadd.f32 %v3692_v39, %v10904_v30 }
0x1322   :  { %v11127_v57 = vadd.f32 %v3691_v47, %v10901_v24 }
0x1324   :  { %3760 = vmatmul.mubr.f32.vlgmr.msra.gmra.mrb[80].mxu0 %v11127_v57  ;;  %7167 = vmatprep.mubr.f32.mxu1 %v11127_v57 }
0x1325   :  { %7168 = vmatmul.mubr.f32.vlgmr.msra.gmra.mrb[40].mxu1 %v11130_v51  ;;  %3765 = vmatprep.mubr.f32.mxu0 %v9847_v0 }
0x1326   :  { %8902 = vmatpush1.bf16.msra.mxu0 %v9914_v8  ;;  %8934 = vmatpush3.bf16.msra.mxu1 %v9916_v9 }
0x1327   :  { %8904 = vmatprep.subr.bf16.mxu0 %v9919_v13  ;;  %8936 = vmatprep.subr.bf16.mxu1 %v9925_v18 }
0x1328   :  { %3766 = vmatmul.mubr.f32.gmra.mrb[82].mxu0 %v11130_v51 }
0x1329   :  { %3935 = vmatprep.mubr.f32.mxu0 %v9847_v0 }
0x132a   :  { %8906 = vmatpush1.bf16.msra.mxu0 %v9923_v17  ;;  %8938 = vmatpush3.bf16.msra.mxu1 %v9925_v18 }
0x132b   :  { %8908 = vmatprep.subr.bf16.mxu0 %v9929_v22  ;;  %8940 = vmatprep.subr.bf16.mxu1 %v9932_v26 }
0x132e   :  { %8910 = vmatpush1.bf16.msra.mxu0 %v9935_v31  ;;  %8942 = vmatpush3.bf16.msra.mxu1 %v9932_v26 }
0x132f   :  { %8912 = vmatprep.subr.bf16.mxu0 %v9939_v32  ;;  %8944 = vmatprep.subr.bf16.mxu1 %v9942_v35 }
0x1332   :  { %8914 = vmatpush1.bf16.msra.mxu0 %v9945_v40  ;;  %8946 = vmatpush3.bf16.msra.mxu1 %v9942_v35 }
0x1333   :  { %8916 = vmatprep.subr.bf16.mxu0 %v9949_v41  ;;  %8948 = vmatprep.subr.bf16.mxu1 %v9952_v44 }
0x1336   :  { %8918 = vmatpush1.bf16.msra.mxu0 %v9955_v49  ;;  %8950 = vmatpush3.bf16.msra.mxu1 %v9952_v44 }
0x1337   :  { %8920 = vmatprep.subr.bf16.mxu0 %v9959_v50  ;;  %8952 = vmatprep.subr.bf16.mxu1 %v9964_v54 }
0x133a   :  { %8922 = vmatpush1.bf16.msra.mxu0 %v9968_v59  ;;  %8954 = vmatpush3.bf16.msra.mxu1 %v9964_v54 }
0x133b   :  { %8924 = vmatprep.subr.bf16.mxu0 %v9972_v60  ;;  %8956 = vmatprep.subr.bf16.mxu1 %v9975_v63 }
0x133e   :  { %8926 = vmatpush1.bf16.msra.mxu0 %v9978_v6  ;;  %8958 = vmatpush3.bf16.msra.mxu1 %v9975_v63 }
0x133f   :  { %8928 = vmatprep.subr.bf16.mxu0 %v9982_v7  ;;  %8960 = vmatprep.subr.bf16.mxu1 %v9985_v12 }
0x1342   :  { %8930 = vmatpush1.bf16.msra.mxu0 %v9988_v14  ;;  %8962 = vmatpush3.bf16.msra.mxu1 %v9985_v12 }
0x1343   :  { %8964 = vmatprep.subr.bf16.mxu0 %v9912_v4  ;;  %8996 = vmatprep.subr.bf16.mxu1 %v9916_v9 }
0x13f7   :  { %v3761_v24 = vpop.f32.mrb[80].mxu0 }
0x13f8   :  { %v3763_v30 = vpop.f32.mrb[81].mxu0  ;;  %v7169_v48 = vpop.f32.mrb[40].mxu1  ;;  %v3847_v34 = vrot.slane %v3761_v24, 7 }
0x13f9   :  { %v3852_v3 = vrot.slane %v7169_v48, 1  ;;  %v3838_v16 = vpop.f32.mrb[41].mxu1  ;;  %v3855_v5 = vadd.f32 %v10955_v10, %v3763_v30 }
0x13fa   :  { %v3851_v21 = vrot.slane %v3838_v16, 1 }
0x13fb   :  { %v3767_v52 = vpop.f32.mrb[82].mxu0 }
0x13fc   :  { %v3853_v58 = vsel %vm282_vm2, %v3851_v21, %v3852_v3  ;;  %v3854_v1 = vsel %vm282_vm2, %v3852_v3, %v3851_v21  ;;  %v3848_v37 = vrot.slane %v3767_v52, 7  ;;  %v3769_v62 = vpop.f32.mrb[83].mxu0 }
0x13fd   :  { %v3856_v27 = vadd.f32 %v10948_v42, %v3769_v62  ;;  %v3862_v2 = vmul.f32 %v10042_v28, %v3854_v1 }
0x13fe   :  { %v3850_v29 = vsel %vm277_vm3, %v3848_v37, %v3847_v34  ;;  %v3849_v56 = vsel %vm277_vm3, %v3847_v34, %v3848_v37 }
0x13ff   :  { %v3857_v20 = vmul.f32 %v10047_v33, %v3850_v29  ;;  %v3860_v43 = vadd.f32 %v3856_v27, %v3849_v56 }
0x1401   :  { %v3859_v36 = vadd.f32 %v3857_v20, %v3855_v5  ;;  %v3864_v55 = vadd.f32 %v3862_v2, %v3860_v43 }
0x1403   :  { %v3863_v11 = vadd.f32 %v3859_v36, %v3853_v58  ;;  %9692 = vtanh.f32 %v3864_v55 }
0x1405   :  { %9694 = vtanh.f32 %v3863_v11 }
0x140d   :  { %v11182_v53 = vpop.eup %9692 }
0x140e   :  { %v3868_v46 = vmul.f32 0.0625, %v11182_v53 }
0x140f   :  { %v11184_v45 = vpop.eup %9694 }
0x1410   :  { %v3867_v15 = vmul.f32 0.0625, %v11184_v45  ;;  %v3870_v25 = vadd.f32 %v3868_v46, %v11130_v51 }
0x1412   :  { %v3869_v23 = vadd.f32 %v3867_v15, %v11127_v57 }
0x1414   :  { %3936 = vmatmul.mubr.f32.vlgmr.msra.gmra.mrb[84].mxu0 %v3869_v23  ;;  %7202 = vmatprep.mubr.f32.mxu1 %v3869_v23 }
0x1415   :  { %7203 = vmatmul.mubr.f32.vlgmr.msra.gmra.mrb[42].mxu1 %v3870_v25  ;;  %3941 = vmatprep.mubr.f32.mxu0 %v9847_v0 }
0x1416   :  { %8966 = vmatpush1.bf16.msra.mxu0 %v9914_v8  ;;  %8998 = vmatpush3.bf16.msra.mxu1 %v9916_v9 }
0x1417   :  { %8968 = vmatprep.subr.bf16.mxu0 %v9919_v13  ;;  %9000 = vmatprep.subr.bf16.mxu1 %v9925_v18 }
0x1418   :  { %3942 = vmatmul.mubr.f32.gmra.mrb[86].mxu0 %v3870_v25 }
0x1419   :  { %4115 = vmatprep.mubr.f32.mxu0 %v9847_v0 }
0x141a   :  { %8970 = vmatpush1.bf16.msra.mxu0 %v9923_v17  ;;  %9002 = vmatpush3.bf16.msra.mxu1 %v9925_v18 }
0x141b   :  { %8972 = vmatprep.subr.bf16.mxu0 %v9929_v22  ;;  %9004 = vmatprep.subr.bf16.mxu1 %v9932_v26 }
0x141e   :  { %8974 = vmatpush1.bf16.msra.mxu0 %v9935_v31  ;;  %9006 = vmatpush3.bf16.msra.mxu1 %v9932_v26 }
0x141f   :  { %8976 = vmatprep.subr.bf16.mxu0 %v9939_v32  ;;  %9008 = vmatprep.subr.bf16.mxu1 %v9942_v35 }
0x1422   :  { %8978 = vmatpush1.bf16.msra.mxu0 %v9945_v40  ;;  %9010 = vmatpush3.bf16.msra.mxu1 %v9942_v35 }
0x1423   :  { %8980 = vmatprep.subr.bf16.mxu0 %v9949_v41  ;;  %9012 = vmatprep.subr.bf16.mxu1 %v9952_v44 }
0x1426   :  { %8982 = vmatpush1.bf16.msra.mxu0 %v9955_v49  ;;  %9014 = vmatpush3.bf16.msra.mxu1 %v9952_v44 }
0x1427   :  { %8984 = vmatprep.subr.bf16.mxu0 %v9959_v50  ;;  %9016 = vmatprep.subr.bf16.mxu1 %v9964_v54 }
0x142a   :  { %8986 = vmatpush1.bf16.msra.mxu0 %v9968_v59  ;;  %9018 = vmatpush3.bf16.msra.mxu1 %v9964_v54 }
0x142b   :  { %8988 = vmatprep.subr.bf16.mxu0 %v9972_v60  ;;  %9020 = vmatprep.subr.bf16.mxu1 %v9975_v63 }
0x142e   :  { %8990 = vmatpush1.bf16.msra.mxu0 %v9978_v6  ;;  %9022 = vmatpush3.bf16.msra.mxu1 %v9975_v63 }
0x142f   :  { %8992 = vmatprep.subr.bf16.mxu0 %v9982_v7  ;;  %9024 = vmatprep.subr.bf16.mxu1 %v9985_v12 }
0x1432   :  { %8994 = vmatpush1.bf16.msra.mxu0 %v9988_v14  ;;  %9026 = vmatpush3.bf16.msra.mxu1 %v9985_v12 }
0x1433   :  { %9028 = vmatprep.subr.bf16.mxu0 %v9912_v4  ;;  %9060 = vmatprep.subr.bf16.mxu1 %v9916_v9 }
0x14e7   :  { %v3937_v38 = vpop.f32.mrb[84].mxu0 }
0x14e8   :  { %v3939_v61 = vpop.f32.mrb[85].mxu0  ;;  %v7204_v39 = vpop.f32.mrb[42].mxu1  ;;  %v4023_v3 = vrot.slane %v3937_v38, 7 }
0x14e9   :  { %v4028_v47 = vrot.slane %v7204_v39, 1  ;;  %v4014_v24 = vpop.f32.mrb[43].mxu1  ;;  %v4031_v62 = vadd.f32 %v10955_v10, %v3939_v61 }
0x14ea   :  { %v4027_v30 = vrot.slane %v4014_v24, 1 }
0x14eb   :  { %v3943_v48 = vpop.f32.mrb[86].mxu0 }
0x14ec   :  { %v4029_v16 = vsel %vm282_vm2, %v4027_v30, %v4028_v47  ;;  %v4030_v21 = vsel %vm282_vm2, %v4028_v47, %v4027_v30  ;;  %v4024_v52 = vrot.slane %v3943_v48, 7  ;;  %v3945_v34 = vpop.f32.mrb[87].mxu0 }
0x14ed   :  { %v4032_v58 = vadd.f32 %v10948_v42, %v3945_v34  ;;  %v4038_v27 = vmul.f32 %v10042_v28, %v4030_v21 }
0x14ee   :  { %v4026_v1 = vsel %vm277_vm3, %v4024_v52, %v4023_v3  ;;  %v4025_v37 = vsel %vm277_vm3, %v4023_v3, %v4024_v52 }
0x14ef   :  { %v4033_v29 = vmul.f32 %v10047_v33, %v4026_v1  ;;  %v4036_v56 = vadd.f32 %v4032_v58, %v4025_v37 }
0x14f1   :  { %v4035_v5 = vadd.f32 %v4033_v29, %v4031_v62  ;;  %v4040_v2 = vadd.f32 %v4038_v27, %v4036_v56 }
0x14f3   :  { %v4039_v20 = vadd.f32 %v4035_v5, %v4029_v16  ;;  %9696 = vtanh.f32 %v4040_v2 }
0x14f5   :  { %9698 = vtanh.f32 %v4039_v20 }
0x14fd   :  { %v11236_v43 = vpop.eup %9696 }
0x14fe   :  { %v4048_v55 = vmul.f32 0.0625, %v11236_v43  ;;  %v4044_v2 = vmul.f32 2.0, %v11236_v43 }
0x14ff   :  { %v11238_v36 = vpop.eup %9698 }
0x1500   :  { %v4047_v11 = vmul.f32 0.0625, %v11238_v36  ;;  %v4050_v15 = vadd.f32 %v4048_v55, %v11130_v51  ;;  %v4043_v20 = vmul.f32 2.0, %v11238_v36 }
0x1502   :  { %v4049_v46 = vadd.f32 %v4047_v11, %v11127_v57  ;;  %v4046_v11 = vadd.f32 %v11182_v53, %v4044_v2 }
0x1504   :  { %4116 = vmatmul.mubr.f32.vlgmr.msra.gmra.mrb[88].mxu0 %v4049_v46  ;;  %7237 = vmatprep.mubr.f32.mxu1 %v4049_v46 }
0x1505   :  { %7238 = vmatmul.mubr.f32.vlgmr.msra.gmra.mrb[44].mxu1 %v4050_v15  ;;  %4121 = vmatprep.mubr.f32.mxu0 %v9847_v0 }
0x1506   :  { %9030 = vmatpush1.bf16.msra.mxu0 %v9914_v8  ;;  %9062 = vmatpush3.bf16.msra.mxu1 %v9916_v9 }
0x1507   :  { %9032 = vmatprep.subr.bf16.mxu0 %v9919_v13  ;;  %9064 = vmatprep.subr.bf16.mxu1 %v9925_v18 }
0x1508   :  { %4122 = vmatmul.mubr.f32.gmra.mrb[90].mxu0 %v4050_v15 }
0x1509   :  { %4295 = vmatprep.mubr.f32.mxu0 %v9847_v0 }
0x150a   :  { %9034 = vmatpush1.bf16.msra.mxu0 %v9923_v17  ;;  %9066 = vmatpush3.bf16.msra.mxu1 %v9925_v18 }
0x150b   :  { %9036 = vmatprep.subr.bf16.mxu0 %v9929_v22  ;;  %9068 = vmatprep.subr.bf16.mxu1 %v9932_v26 }
0x150e   :  { %9038 = vmatpush1.bf16.msra.mxu0 %v9935_v31  ;;  %9070 = vmatpush3.bf16.msra.mxu1 %v9932_v26 }
0x150f   :  { %9040 = vmatprep.subr.bf16.mxu0 %v9939_v32  ;;  %9072 = vmatprep.subr.bf16.mxu1 %v9942_v35 }
0x1512   :  { %9042 = vmatpush1.bf16.msra.mxu0 %v9945_v40  ;;  %9074 = vmatpush3.bf16.msra.mxu1 %v9942_v35 }
0x1513   :  { %9044 = vmatprep.subr.bf16.mxu0 %v9949_v41  ;;  %9076 = vmatprep.subr.bf16.mxu1 %v9952_v44 }
0x1516   :  { %9046 = vmatpush1.bf16.msra.mxu0 %v9955_v49  ;;  %9078 = vmatpush3.bf16.msra.mxu1 %v9952_v44 }
0x1517   :  { %9048 = vmatprep.subr.bf16.mxu0 %v9959_v50  ;;  %9080 = vmatprep.subr.bf16.mxu1 %v9964_v54 }
0x151a   :  { %9050 = vmatpush1.bf16.msra.mxu0 %v9968_v59  ;;  %9082 = vmatpush3.bf16.msra.mxu1 %v9964_v54 }
0x151b   :  { %9052 = vmatprep.subr.bf16.mxu0 %v9972_v60  ;;  %9084 = vmatprep.subr.bf16.mxu1 %v9975_v63 }
0x151e   :  { %9054 = vmatpush1.bf16.msra.mxu0 %v9978_v6  ;;  %9086 = vmatpush3.bf16.msra.mxu1 %v9975_v63 }
0x151f   :  { %9056 = vmatprep.subr.bf16.mxu0 %v9982_v7  ;;  %9088 = vmatprep.subr.bf16.mxu1 %v9985_v12 }
0x1522   :  { %9058 = vmatpush1.bf16.msra.mxu0 %v9988_v14  ;;  %9090 = vmatpush3.bf16.msra.mxu1 %v9985_v12 }
0x1523   :  { %9092 = vmatprep.subr.bf16.mxu0 %v9912_v4  ;;  %9124 = vmatprep.subr.bf16.mxu1 %v9916_v9 }
0x15d7   :  { %v4117_v23 = vpop.f32.mrb[88].mxu0 }
0x15d8   :  { %v4119_v25 = vpop.f32.mrb[89].mxu0  ;;  %v7239_v38 = vpop.f32.mrb[44].mxu1  ;;  %v4203_v30 = vrot.slane %v4117_v23, 7 }
0x15d9   :  { %v4208_v61 = vrot.slane %v7239_v38, 1  ;;  %v4194_v39 = vpop.f32.mrb[45].mxu1  ;;  %v4211_v1 = vadd.f32 %v10955_v10, %v4119_v25  ;;  %v4045_v25 = vadd.f32 %v11184_v45, %v4043_v20 }
0x15da   :  { %v4207_v47 = vrot.slane %v4194_v39, 1 }
0x15db   :  { %v4123_v24 = vpop.f32.mrb[90].mxu0 }
0x15dc   :  { %v4209_v48 = vsel %vm282_vm2, %v4207_v47, %v4208_v61  ;;  %v4210_v3 = vsel %vm282_vm2, %v4208_v61, %v4207_v47  ;;  %v4204_v16 = vrot.slane %v4123_v24, 7  ;;  %v4125_v21 = vpop.f32.mrb[91].mxu0 }
0x15dd   :  { %v4212_v52 = vadd.f32 %v10948_v42, %v4125_v21  ;;  %v4218_v37 = vmul.f32 %v10042_v28, %v4210_v3 }
0x15de   :  { %v4206_v34 = vsel %vm277_vm3, %v4204_v16, %v4203_v30  ;;  %v4205_v58 = vsel %vm277_vm3, %v4203_v30, %v4204_v16 }
0x15df   :  { %v4213_v62 = vmul.f32 %v10047_v33, %v4206_v34  ;;  %v4216_v27 = vadd.f32 %v4212_v52, %v4205_v58 }
0x15e1   :  { %v4215_v29 = vadd.f32 %v4213_v62, %v4211_v1  ;;  %v4220_v56 = vadd.f32 %v4218_v37, %v4216_v27 }
0x15e3   :  { %v4219_v5 = vadd.f32 %v4215_v29, %v4209_v48  ;;  %9700 = vtanh.f32 %v4220_v56 }
0x15e5   :  { %9702 = vtanh.f32 %v4219_v5 }
0x15ed   :  { %v9701_v55 = vpop.eup %9700 }
0x15ee   :  { %v4224_v46 = vmul.f32 2.0, %v9701_v55  ;;  %v4228_v23 = vmul.f32 0.125, %v9701_v55 }
0x15ef   :  { %v9703_v15 = vpop.eup %9702 }
0x15f0   :  { %v4223_v38 = vmul.f32 2.0, %v9703_v15  ;;  %v4227_v61 = vmul.f32 0.125, %v9703_v15  ;;  %v11294_v39 = vadd.f32 %v4224_v46, %v4046_v11  ;;  %v4230_v43 = vadd.f32 %v4228_v23, %v11130_v51 }
0x15f2   :  { %v4229_v47 = vadd.f32 %v4227_v61, %v11127_v57  ;;  %v11297_v24 = vadd.f32 %v4223_v38, %v4045_v25 }
0x15f4   :  { %4296 = vmatmul.mubr.f32.vlgmr.msra.gmra.mrb[92].mxu0 %v4229_v47  ;;  %7272 = vmatprep.mubr.f32.mxu1 %v4229_v47 }
0x15f5   :  { %7273 = vmatmul.mubr.f32.vlgmr.msra.gmra.mrb[46].mxu1 %v4230_v43  ;;  %4301 = vmatprep.mubr.f32.mxu0 %v9847_v0 }
0x15f6   :  { %9094 = vmatpush1.bf16.msra.mxu0 %v9914_v8  ;;  %9126 = vmatpush3.bf16.msra.mxu1 %v9916_v9 }
0x15f7   :  { %9096 = vmatprep.subr.bf16.mxu0 %v9919_v13  ;;  %9128 = vmatprep.subr.bf16.mxu1 %v9925_v18 }
0x15f8   :  { %4302 = vmatmul.mubr.f32.gmra.mrb[94].mxu0 %v4230_v43 }
0x15f9   :  { %4473 = vmatprep.mubr.f32.mxu0 %v9847_v0 }
0x15fa   :  { %9098 = vmatpush1.bf16.msra.mxu0 %v9923_v17  ;;  %9130 = vmatpush3.bf16.msra.mxu1 %v9925_v18 }
0x15fb   :  { %9100 = vmatprep.subr.bf16.mxu0 %v9929_v22  ;;  %9132 = vmatprep.subr.bf16.mxu1 %v9932_v26 }
0x15fe   :  { %9102 = vmatpush1.bf16.msra.mxu0 %v9935_v31  ;;  %9134 = vmatpush3.bf16.msra.mxu1 %v9932_v26 }
0x15ff   :  { %9104 = vmatprep.subr.bf16.mxu0 %v9939_v32  ;;  %9136 = vmatprep.subr.bf16.mxu1 %v9942_v35 }
0x1602   :  { %9106 = vmatpush1.bf16.msra.mxu0 %v9945_v40  ;;  %9138 = vmatpush3.bf16.msra.mxu1 %v9942_v35 }
0x1603   :  { %9108 = vmatprep.subr.bf16.mxu0 %v9949_v41  ;;  %9140 = vmatprep.subr.bf16.mxu1 %v9952_v44 }
0x1606   :  { %9110 = vmatpush1.bf16.msra.mxu0 %v9955_v49  ;;  %9142 = vmatpush3.bf16.msra.mxu1 %v9952_v44 }
0x1607   :  { %9112 = vmatprep.subr.bf16.mxu0 %v9959_v50  ;;  %9144 = vmatprep.subr.bf16.mxu1 %v9964_v54 }
0x160a   :  { %9114 = vmatpush1.bf16.msra.mxu0 %v9968_v59  ;;  %9146 = vmatpush3.bf16.msra.mxu1 %v9964_v54 }
0x160b   :  { %9116 = vmatprep.subr.bf16.mxu0 %v9972_v60  ;;  %9148 = vmatprep.subr.bf16.mxu1 %v9975_v63 }
0x160e   :  { %9118 = vmatpush1.bf16.msra.mxu0 %v9978_v6  ;;  %9150 = vmatpush3.bf16.msra.mxu1 %v9975_v63 }
0x160f   :  { %9120 = vmatprep.subr.bf16.mxu0 %v9982_v7  ;;  %9152 = vmatprep.subr.bf16.mxu1 %v9985_v12 }
0x1612   :  { %9122 = vmatpush1.bf16.msra.mxu0 %v9988_v14  ;;  %9154 = vmatpush3.bf16.msra.mxu1 %v9985_v12 }
0x1613   :  { %9156 = vmatprep.subr.bf16.mxu0 %v9912_v4  ;;  %9188 = vmatprep.subr.bf16.mxu1 %v9916_v9 }
0x16c7   :  { %v4297_v53 = vpop.f32.mrb[92].mxu0 }
0x16c8   :  { %v4299_v45 = vpop.f32.mrb[93].mxu0  ;;  %v7274_v36 = vpop.f32.mrb[46].mxu1  ;;  %v4383_v21 = vrot.slane %v4297_v53, 7 }
0x16c9   :  { %v4388_v30 = vrot.slane %v7274_v36, 1  ;;  %v4374_v48 = vpop.f32.mrb[47].mxu1  ;;  %v4391_v29 = vadd.f32 %v10955_v10, %v4299_v45 }
0x16ca   :  { %v4387_v3 = vrot.slane %v4374_v48, 1 }
0x16cb   :  { %v4303_v16 = vpop.f32.mrb[94].mxu0 }
0x16cc   :  { %v4389_v52 = vsel %vm282_vm2, %v4387_v3, %v4388_v30  ;;  %v4390_v34 = vsel %vm282_vm2, %v4388_v30, %v4387_v3  ;;  %v4384_v58 = vrot.slane %v4303_v16, 7  ;;  %v4305_v1 = vpop.f32.mrb[95].mxu0  ;;  %v11396_v16 = vld [vmem:[#allocation7 + $0x8] sm:$0xff] }
0x16cd   :  { %v4392_v37 = vadd.f32 %v10948_v42, %v4305_v1  ;;  %v4398_v56 = vmul.f32 %v10042_v28, %v4390_v34 }
0x16ce   :  { %v4386_v62 = vsel %vm277_vm3, %v4384_v58, %v4383_v21  ;;  %v4385_v27 = vsel %vm277_vm3, %v4383_v21, %v4384_v58  ;;  %v11403_v58 = vld [vmem:[#allocation7] sm:$0xff] }
0x16cf   :  { %v4393_v5 = vmul.f32 %v10047_v33, %v4386_v62  ;;  %v4396_v2 = vadd.f32 %v4392_v37, %v4385_v27 }
0x16d1   :  { %v4395_v20 = vadd.f32 %v4393_v5, %v4391_v29  ;;  %v4400_v55 = vadd.f32 %v4398_v56, %v4396_v2 }
0x16d3   :  { %v4399_v11 = vadd.f32 %v4395_v20, %v4389_v52  ;;  %9704 = vtanh.f32 %v4400_v55 }
0x16d5   :  { %9706 = vtanh.f32 %v4399_v11 }
0x16dd   :  { %v9705_v46 = vpop.eup %9704 }
0x16de   :  { %v4404_v42 = vadd.f32 %v9705_v46, %v11294_v39 }
0x16df   :  { %v9707_v15 = vpop.eup %9706 }
0x16e0   :  { %v4403_v23 = vadd.f32 %v9707_v15, %v11297_v24  ;;  %v4406_v25 = vmul.f32 0.020833334, %v4404_v42 }
0x16e2   :  { %v4405_v38 = vmul.f32 0.020833334, %v4403_v23  ;;  %v11352_v61 = vadd.f32 %v4406_v25, %v11130_v51 }
0x16e4   :  { %v11349_v10 = vadd.f32 %v4405_v38, %v11127_v57 }
0x16e6   :  { %4474 = vmatmul.mubr.f32.vlgmr.msra.gmra.mrb[96].mxu0 %v11349_v10  ;;  %7307 = vmatprep.mubr.f32.mxu1 %v11349_v10 }
0x16e7   :  { %7308 = vmatmul.mubr.f32.vlgmr.msra.gmra.mrb[48].mxu1 %v11352_v61  ;;  %4479 = vmatprep.mubr.f32.mxu0 %v9847_v0 }
0x16e8   :  { %9158 = vmatpush1.bf16.msra.mxu0 %v9914_v8  ;;  %9190 = vmatpush3.bf16.msra.mxu1 %v9916_v9 }
0x16e9   :  { %9160 = vmatprep.subr.bf16.mxu0 %v9919_v13  ;;  %9192 = vmatprep.subr.bf16.mxu1 %v9925_v18 }
0x16ea   :  { %4480 = vmatmul.mubr.f32.gmra.mrb[98].mxu0 %v11352_v61 }
0x16eb   :  { %4649 = vmatprep.mubr.f32.mxu0 %v9847_v0 }
0x16ec   :  { %9162 = vmatpush1.bf16.msra.mxu0 %v9923_v17  ;;  %9194 = vmatpush3.bf16.msra.mxu1 %v9925_v18 }
0x16ed   :  { %9164 = vmatprep.subr.bf16.mxu0 %v9929_v22  ;;  %9196 = vmatprep.subr.bf16.mxu1 %v9932_v26 }
0x16f0   :  { %9166 = vmatpush1.bf16.msra.mxu0 %v9935_v31  ;;  %9198 = vmatpush3.bf16.msra.mxu1 %v9932_v26 }
0x16f1   :  { %9168 = vmatprep.subr.bf16.mxu0 %v9939_v32  ;;  %9200 = vmatprep.subr.bf16.mxu1 %v9942_v35 }
0x16f4   :  { %9170 = vmatpush1.bf16.msra.mxu0 %v9945_v40  ;;  %9202 = vmatpush3.bf16.msra.mxu1 %v9942_v35 }
0x16f5   :  { %9172 = vmatprep.subr.bf16.mxu0 %v9949_v41  ;;  %9204 = vmatprep.subr.bf16.mxu1 %v9952_v44 }
0x16f8   :  { %9174 = vmatpush1.bf16.msra.mxu0 %v9955_v49  ;;  %9206 = vmatpush3.bf16.msra.mxu1 %v9952_v44 }
0x16f9   :  { %9176 = vmatprep.subr.bf16.mxu0 %v9959_v50  ;;  %9208 = vmatprep.subr.bf16.mxu1 %v9964_v54 }
0x16fc   :  { %9178 = vmatpush1.bf16.msra.mxu0 %v9968_v59  ;;  %9210 = vmatpush3.bf16.msra.mxu1 %v9964_v54 }
0x16fd   :  { %9180 = vmatprep.subr.bf16.mxu0 %v9972_v60  ;;  %9212 = vmatprep.subr.bf16.mxu1 %v9975_v63 }
0x1700   :  { %9182 = vmatpush1.bf16.msra.mxu0 %v9978_v6  ;;  %9214 = vmatpush3.bf16.msra.mxu1 %v9975_v63 }
0x1701   :  { %9184 = vmatprep.subr.bf16.mxu0 %v9982_v7  ;;  %9216 = vmatprep.subr.bf16.mxu1 %v9985_v12 }
0x1704   :  { %9186 = vmatpush1.bf16.msra.mxu0 %v9988_v14  ;;  %9218 = vmatpush3.bf16.msra.mxu1 %v9985_v12 }
0x1705   :  { %9220 = vmatprep.subr.bf16.mxu0 %v9912_v4  ;;  %9252 = vmatprep.subr.bf16.mxu1 %v9916_v9 }
0x17b9   :  { %v4475_v57 = vpop.f32.mrb[96].mxu0 }
0x17ba   :  { %v4477_v51 = vpop.f32.mrb[97].mxu0  ;;  %v7309_v39 = vpop.f32.mrb[48].mxu1  ;;  %v4561_v45 = vrot.slane %v4475_v57, 7 }
0x17bb   :  { %v4566_v47 = vrot.slane %v7309_v39, 1  ;;  %v4552_v24 = vpop.f32.mrb[49].mxu1  ;;  %v4569_v1 = vadd.f32 %v11403_v58, %v4477_v51 }
0x17bc   :  { %v4565_v43 = vrot.slane %v4552_v24, 1 }
0x17bd   :  { %v4481_v53 = vpop.f32.mrb[98].mxu0 }
0x17be   :  { %v4567_v36 = vsel %vm282_vm2, %v4565_v43, %v4566_v47  ;;  %v4568_v30 = vsel %vm282_vm2, %v4566_v47, %v4565_v43  ;;  %v4562_v48 = vrot.slane %v4481_v53, 7  ;;  %v4483_v3 = vpop.f32.mrb[99].mxu0 }
0x17bf   :  { %v4570_v21 = vadd.f32 %v11396_v16, %v4483_v3  ;;  %v4576_v37 = vmul.f32 %v10042_v28, %v4568_v30 }
0x17c0   :  { %v4564_v52 = vsel %vm277_vm3, %v4562_v48, %v4561_v45  ;;  %v4563_v34 = vsel %vm277_vm3, %v4561_v45, %v4562_v48 }
0x17c1   :  { %v4571_v62 = vmul.f32 %v10047_v33, %v4564_v52  ;;  %v4574_v27 = vadd.f32 %v4570_v21, %v4563_v34 }
0x17c3   :  { %v4573_v29 = vadd.f32 %v4571_v62, %v4569_v1  ;;  %v4578_v56 = vadd.f32 %v4576_v37, %v4574_v27 }
0x17c5   :  { %v4577_v5 = vadd.f32 %v4573_v29, %v4567_v36  ;;  %9708 = vtanh.f32 %v4578_v56 }
0x17c7   :  { %9710 = vtanh.f32 %v4577_v5 }
0x17cf   :  { %v11408_v2 = vpop.eup %9708 }
0x17d0   :  { %v4582_v55 = vmul.f32 0.0625, %v11408_v2 }
0x17d1   :  { %v11410_v20 = vpop.eup %9710 }
0x17d2   :  { %v4581_v11 = vmul.f32 0.0625, %v11410_v20  ;;  %v4584_v42 = vadd.f32 %v4582_v55, %v11352_v61 }
0x17d4   :  { %v4583_v46 = vadd.f32 %v4581_v11, %v11349_v10 }
0x17d6   :  { %4650 = vmatmul.mubr.f32.vlgmr.msra.gmra.mrb[100].mxu0 %v4583_v46  ;;  %7342 = vmatprep.mubr.f32.mxu1 %v4583_v46 }
0x17d7   :  { %7343 = vmatmul.mubr.f32.vlgmr.msra.gmra.mrb[50].mxu1 %v4584_v42  ;;  %4655 = vmatprep.mubr.f32.mxu0 %v9847_v0 }
0x17d8   :  { %9222 = vmatpush1.bf16.msra.mxu0 %v9914_v8  ;;  %9254 = vmatpush3.bf16.msra.mxu1 %v9916_v9 }
0x17d9   :  { %9224 = vmatprep.subr.bf16.mxu0 %v9919_v13  ;;  %9256 = vmatprep.subr.bf16.mxu1 %v9925_v18 }
0x17da   :  { %4656 = vmatmul.mubr.f32.gmra.mrb[102].mxu0 %v4584_v42 }
0x17db   :  { %4829 = vmatprep.mubr.f32.mxu0 %v9847_v0 }
0x17dc   :  { %9226 = vmatpush1.bf16.msra.mxu0 %v9923_v17  ;;  %9258 = vmatpush3.bf16.msra.mxu1 %v9925_v18 }
0x17dd   :  { %9228 = vmatprep.subr.bf16.mxu0 %v9929_v22  ;;  %9260 = vmatprep.subr.bf16.mxu1 %v9932_v26 }
0x17e0   :  { %9230 = vmatpush1.bf16.msra.mxu0 %v9935_v31  ;;  %9262 = vmatpush3.bf16.msra.mxu1 %v9932_v26 }
0x17e1   :  { %9232 = vmatprep.subr.bf16.mxu0 %v9939_v32  ;;  %9264 = vmatprep.subr.bf16.mxu1 %v9942_v35 }
0x17e4   :  { %9234 = vmatpush1.bf16.msra.mxu0 %v9945_v40  ;;  %9266 = vmatpush3.bf16.msra.mxu1 %v9942_v35 }
0x17e5   :  { %9236 = vmatprep.subr.bf16.mxu0 %v9949_v41  ;;  %9268 = vmatprep.subr.bf16.mxu1 %v9952_v44 }
0x17e8   :  { %9238 = vmatpush1.bf16.msra.mxu0 %v9955_v49  ;;  %9270 = vmatpush3.bf16.msra.mxu1 %v9952_v44 }
0x17e9   :  { %9240 = vmatprep.subr.bf16.mxu0 %v9959_v50  ;;  %9272 = vmatprep.subr.bf16.mxu1 %v9964_v54 }
0x17ec   :  { %9242 = vmatpush1.bf16.msra.mxu0 %v9968_v59  ;;  %9274 = vmatpush3.bf16.msra.mxu1 %v9964_v54 }
0x17ed   :  { %9244 = vmatprep.subr.bf16.mxu0 %v9972_v60  ;;  %9276 = vmatprep.subr.bf16.mxu1 %v9975_v63 }
0x17f0   :  { %9246 = vmatpush1.bf16.msra.mxu0 %v9978_v6  ;;  %9278 = vmatpush3.bf16.msra.mxu1 %v9975_v63 }
0x17f1   :  { %9248 = vmatprep.subr.bf16.mxu0 %v9982_v7  ;;  %9280 = vmatprep.subr.bf16.mxu1 %v9985_v12 }
0x17f4   :  { %9250 = vmatpush1.bf16.msra.mxu0 %v9988_v14  ;;  %9282 = vmatpush3.bf16.msra.mxu1 %v9985_v12 }
0x17f5   :  { %9284 = vmatprep.subr.bf16.mxu0 %v9912_v4  ;;  %9316 = vmatprep.subr.bf16.mxu1 %v9916_v9 }
0x18a9   :  { %v4651_v15 = vpop.f32.mrb[100].mxu0 }
0x18aa   :  { %v4653_v23 = vpop.f32.mrb[101].mxu0  ;;  %v7344_v25 = vpop.f32.mrb[50].mxu1  ;;  %v4737_v47 = vrot.slane %v4651_v15, 7 }
0x18ab   :  { %v4742_v38 = vrot.slane %v7344_v25, 1  ;;  %v4728_v57 = vpop.f32.mrb[51].mxu1  ;;  %v4745_v3 = vadd.f32 %v11403_v58, %v4653_v23 }
0x18ac   :  { %v4741_v51 = vrot.slane %v4728_v57, 1 }
0x18ad   :  { %v4657_v39 = vpop.f32.mrb[102].mxu0 }
0x18ae   :  { %v4743_v24 = vsel %vm282_vm2, %v4741_v51, %v4742_v38  ;;  %v4744_v43 = vsel %vm282_vm2, %v4742_v38, %v4741_v51  ;;  %v4738_v53 = vrot.slane %v4657_v39, 7  ;;  %v4659_v45 = vpop.f32.mrb[103].mxu0 }
0x18af   :  { %v4746_v36 = vadd.f32 %v11396_v16, %v4659_v45  ;;  %v4752_v21 = vmul.f32 %v10042_v28, %v4744_v43 }
0x18b0   :  { %v4740_v30 = vsel %vm277_vm3, %v4738_v53, %v4737_v47  ;;  %v4739_v48 = vsel %vm277_vm3, %v4737_v47, %v4738_v53 }
0x18b1   :  { %v4747_v52 = vmul.f32 %v10047_v33, %v4740_v30  ;;  %v4750_v34 = vadd.f32 %v4746_v36, %v4739_v48 }
0x18b3   :  { %v4749_v1 = vadd.f32 %v4747_v52, %v4745_v3  ;;  %v4754_v37 = vadd.f32 %v4752_v21, %v4750_v34 }
0x18b5   :  { %v4753_v62 = vadd.f32 %v4749_v1, %v4743_v24  ;;  %9712 = vtanh.f32 %v4754_v37 }
0x18b7   :  { %9714 = vtanh.f32 %v4753_v62 }
0x18bf   :  { %v11462_v27 = vpop.eup %9712 }
0x18c0   :  { %v4762_v56 = vmul.f32 0.0625, %v11462_v27  ;;  %v4758_v37 = vmul.f32 2.0, %v11462_v27 }
0x18c1   :  { %v11464_v29 = vpop.eup %9714 }
0x18c2   :  { %v4761_v5 = vmul.f32 0.0625, %v11464_v29  ;;  %v4764_v11 = vadd.f32 %v4762_v56, %v11352_v61  ;;  %v4757_v62 = vmul.f32 2.0, %v11464_v29 }
0x18c4   :  { %v4763_v55 = vadd.f32 %v4761_v5, %v11349_v10  ;;  %v4760_v5 = vadd.f32 %v11408_v2, %v4758_v37 }
0x18c6   :  { %4830 = vmatmul.mubr.f32.vlgmr.msra.gmra.mrb[104].mxu0 %v4763_v55  ;;  %7377 = vmatprep.mubr.f32.mxu1 %v4763_v55 }
0x18c7   :  { %7378 = vmatmul.mubr.f32.vlgmr.msra.gmra.mrb[52].mxu1 %v4764_v11  ;;  %4835 = vmatprep.mubr.f32.mxu0 %v9847_v0 }
0x18c8   :  { %9286 = vmatpush1.bf16.msra.mxu0 %v9914_v8  ;;  %9318 = vmatpush3.bf16.msra.mxu1 %v9916_v9 }
0x18c9   :  { %9288 = vmatprep.subr.bf16.mxu0 %v9919_v13  ;;  %9320 = vmatprep.subr.bf16.mxu1 %v9925_v18 }
0x18ca   :  { %4836 = vmatmul.mubr.f32.gmra.mrb[106].mxu0 %v4764_v11 }
0x18cb   :  { %5009 = vmatprep.mubr.f32.mxu0 %v9847_v0 }
0x18cc   :  { %9290 = vmatpush1.bf16.msra.mxu0 %v9923_v17  ;;  %9322 = vmatpush3.bf16.msra.mxu1 %v9925_v18 }
0x18cd   :  { %9292 = vmatprep.subr.bf16.mxu0 %v9929_v22  ;;  %9324 = vmatprep.subr.bf16.mxu1 %v9932_v26 }
0x18d0   :  { %9294 = vmatpush1.bf16.msra.mxu0 %v9935_v31  ;;  %9326 = vmatpush3.bf16.msra.mxu1 %v9932_v26 }
0x18d1   :  { %9296 = vmatprep.subr.bf16.mxu0 %v9939_v32  ;;  %9328 = vmatprep.subr.bf16.mxu1 %v9942_v35 }
0x18d4   :  { %9298 = vmatpush1.bf16.msra.mxu0 %v9945_v40  ;;  %9330 = vmatpush3.bf16.msra.mxu1 %v9942_v35 }
0x18d5   :  { %9300 = vmatprep.subr.bf16.mxu0 %v9949_v41  ;;  %9332 = vmatprep.subr.bf16.mxu1 %v9952_v44 }
0x18d8   :  { %9302 = vmatpush1.bf16.msra.mxu0 %v9955_v49  ;;  %9334 = vmatpush3.bf16.msra.mxu1 %v9952_v44 }
0x18d9   :  { %9304 = vmatprep.subr.bf16.mxu0 %v9959_v50  ;;  %9336 = vmatprep.subr.bf16.mxu1 %v9964_v54 }
0x18dc   :  { %9306 = vmatpush1.bf16.msra.mxu0 %v9968_v59  ;;  %9338 = vmatpush3.bf16.msra.mxu1 %v9964_v54 }
0x18dd   :  { %9308 = vmatprep.subr.bf16.mxu0 %v9972_v60  ;;  %9340 = vmatprep.subr.bf16.mxu1 %v9975_v63 }
0x18e0   :  { %9310 = vmatpush1.bf16.msra.mxu0 %v9978_v6  ;;  %9342 = vmatpush3.bf16.msra.mxu1 %v9975_v63 }
0x18e1   :  { %9312 = vmatprep.subr.bf16.mxu0 %v9982_v7  ;;  %9344 = vmatprep.subr.bf16.mxu1 %v9985_v12 }
0x18e4   :  { %9314 = vmatpush1.bf16.msra.mxu0 %v9988_v14  ;;  %9346 = vmatpush3.bf16.msra.mxu1 %v9985_v12 }
0x18e5   :  { %9348 = vmatprep.subr.bf16.mxu0 %v9912_v4  ;;  %9380 = vmatprep.subr.bf16.mxu1 %v9916_v9 }
0x1999   :  { %v4831_v46 = vpop.f32.mrb[104].mxu0 }
0x199a   :  { %v4833_v42 = vpop.f32.mrb[105].mxu0  ;;  %v7379_v15 = vpop.f32.mrb[52].mxu1  ;;  %v4917_v51 = vrot.slane %v4831_v46, 7 }
0x199b   :  { %v4922_v23 = vrot.slane %v7379_v15, 1  ;;  %v4908_v25 = vpop.f32.mrb[53].mxu1  ;;  %v4925_v30 = vadd.f32 %v11403_v58, %v4833_v42  ;;  %v4759_v42 = vadd.f32 %v11410_v20, %v4757_v62 }
0x199c   :  { %v4921_v38 = vrot.slane %v4908_v25, 1 }
0x199d   :  { %v4837_v57 = vpop.f32.mrb[106].mxu0 }
0x199e   :  { %v4923_v39 = vsel %vm282_vm2, %v4921_v38, %v4922_v23  ;;  %v4924_v47 = vsel %vm282_vm2, %v4922_v23, %v4921_v38  ;;  %v4918_v24 = vrot.slane %v4837_v57, 7  ;;  %v4839_v43 = vpop.f32.mrb[107].mxu0 }
0x199f   :  { %v4926_v53 = vadd.f32 %v11396_v16, %v4839_v43  ;;  %v4932_v48 = vmul.f32 %v10042_v28, %v4924_v47 }
0x19a0   :  { %v4920_v45 = vsel %vm277_vm3, %v4918_v24, %v4917_v51  ;;  %v4919_v36 = vsel %vm277_vm3, %v4917_v51, %v4918_v24 }
0x19a1   :  { %v4927_v3 = vmul.f32 %v10047_v33, %v4920_v45  ;;  %v4930_v21 = vadd.f32 %v4926_v53, %v4919_v36 }
0x19a3   :  { %v4929_v52 = vadd.f32 %v4927_v3, %v4925_v30  ;;  %v4934_v34 = vadd.f32 %v4932_v48, %v4930_v21 }
0x19a5   :  { %v4933_v1 = vadd.f32 %v4929_v52, %v4923_v39  ;;  %9716 = vtanh.f32 %v4934_v34 }
0x19a7   :  { %9718 = vtanh.f32 %v4933_v1 }
0x19af   :  { %v9717_v56 = vpop.eup %9716 }
0x19b0   :  { %v4938_v55 = vmul.f32 2.0, %v9717_v56  ;;  %v4942_v46 = vmul.f32 0.125, %v9717_v56 }
0x19b1   :  { %v9719_v11 = vpop.eup %9718 }
0x19b2   :  { %v4937_v15 = vmul.f32 2.0, %v9719_v11  ;;  %v4941_v23 = vmul.f32 0.125, %v9719_v11  ;;  %v11520_v25 = vadd.f32 %v4938_v55, %v4760_v5  ;;  %v4944_v27 = vadd.f32 %v4942_v46, %v11352_v61 }
0x19b4   :  { %v4943_v38 = vadd.f32 %v4941_v23, %v11349_v10  ;;  %v11523_v57 = vadd.f32 %v4937_v15, %v4759_v42 }
0x19b6   :  { %5010 = vmatmul.mubr.f32.vlgmr.msra.gmra.mrb[108].mxu0 %v4943_v38  ;;  %7412 = vmatprep.mubr.f32.mxu1 %v4943_v38 }
0x19b7   :  { %7413 = vmatmul.mubr.f32.vlgmr.msra.gmra.mrb[54].mxu1 %v4944_v27  ;;  %5015 = vmatprep.mubr.f32.mxu0 %v9847_v0 }
0x19b8   :  { %9350 = vmatpush1.bf16.msra.mxu0 %v9914_v8  ;;  %9382 = vmatpush3.bf16.msra.mxu1 %v9916_v9 }
0x19b9   :  { %9352 = vmatprep.subr.bf16.mxu0 %v9919_v13  ;;  %9384 = vmatprep.subr.bf16.mxu1 %v9925_v18 }
0x19ba   :  { %5016 = vmatmul.mubr.f32.gmra.mrb[110].mxu0 %v4944_v27 }
0x19bb   :  { %5187 = vmatprep.mubr.f32.mxu0 %v9847_v0 }
0x19bc   :  { %9354 = vmatpush1.bf16.msra.mxu0 %v9923_v17  ;;  %9386 = vmatpush3.bf16.msra.mxu1 %v9925_v18 }
0x19bd   :  { %9356 = vmatprep.subr.bf16.mxu0 %v9929_v22  ;;  %9388 = vmatprep.subr.bf16.mxu1 %v9932_v26 }
0x19c0   :  { %9358 = vmatpush1.bf16.msra.mxu0 %v9935_v31  ;;  %9390 = vmatpush3.bf16.msra.mxu1 %v9932_v26 }
0x19c1   :  { %9360 = vmatprep.subr.bf16.mxu0 %v9939_v32  ;;  %9392 = vmatprep.subr.bf16.mxu1 %v9942_v35 }
0x19c4   :  { %9362 = vmatpush1.bf16.msra.mxu0 %v9945_v40  ;;  %9394 = vmatpush3.bf16.msra.mxu1 %v9942_v35 }
0x19c5   :  { %9364 = vmatprep.subr.bf16.mxu0 %v9949_v41  ;;  %9396 = vmatprep.subr.bf16.mxu1 %v9952_v44 }
0x19c8   :  { %9366 = vmatpush1.bf16.msra.mxu0 %v9955_v49  ;;  %9398 = vmatpush3.bf16.msra.mxu1 %v9952_v44 }
0x19c9   :  { %9368 = vmatprep.subr.bf16.mxu0 %v9959_v50  ;;  %9400 = vmatprep.subr.bf16.mxu1 %v9964_v54 }
0x19cc   :  { %9370 = vmatpush1.bf16.msra.mxu0 %v9968_v59  ;;  %9402 = vmatpush3.bf16.msra.mxu1 %v9964_v54 }
0x19cd   :  { %9372 = vmatprep.subr.bf16.mxu0 %v9972_v60  ;;  %9404 = vmatprep.subr.bf16.mxu1 %v9975_v63 }
0x19d0   :  { %9374 = vmatpush1.bf16.msra.mxu0 %v9978_v6  ;;  %9406 = vmatpush3.bf16.msra.mxu1 %v9975_v63 }
0x19d1   :  { %9376 = vmatprep.subr.bf16.mxu0 %v9982_v7  ;;  %9408 = vmatprep.subr.bf16.mxu1 %v9985_v12 }
0x19d4   :  { %9378 = vmatpush1.bf16.msra.mxu0 %v9988_v14  ;;  %9410 = vmatpush3.bf16.msra.mxu1 %v9985_v12 }
0x19d5   :  { %9412 = vmatprep.subr.bf16.mxu0 %v9912_v4  ;;  %9444 = vmatprep.subr.bf16.mxu1 %v9916_v9 }
0x1a89   :  { %v5011_v2 = vpop.f32.mrb[108].mxu0 }
0x1a8a   :  { %v5013_v20 = vpop.f32.mrb[109].mxu0  ;;  %v7414_v29 = vpop.f32.mrb[54].mxu1  ;;  %v5097_v43 = vrot.slane %v5011_v2, 7 }
0x1a8b   :  { %v5102_v51 = vrot.slane %v7414_v29, 1  ;;  %v5088_v39 = vpop.f32.mrb[55].mxu1  ;;  %v5105_v52 = vadd.f32 %v11403_v58, %v5013_v20 }
0x1a8c   :  { %v5101_v47 = vrot.slane %v5088_v39, 1 }
0x1a8d   :  { %v5017_v24 = vpop.f32.mrb[110].mxu0 }
0x1a8e   :  { %v5103_v53 = vsel %vm282_vm2, %v5101_v47, %v5102_v51  ;;  %v5104_v45 = vsel %vm282_vm2, %v5102_v51, %v5101_v47  ;;  %v5098_v36 = vrot.slane %v5017_v24, 7  ;;  %v5019_v30 = vpop.f32.mrb[111].mxu0 }
0x1a8f   :  { %v5106_v48 = vadd.f32 %v11396_v16, %v5019_v30  ;;  %v5112_v34 = vmul.f32 %v10042_v28, %v5104_v45 }
0x1a90   :  { %v5100_v3 = vsel %vm277_vm3, %v5098_v36, %v5097_v43  ;;  %v5099_v21 = vsel %vm277_vm3, %v5097_v43, %v5098_v36 }
0x1a91   :  { %v5107_v1 = vmul.f32 %v10047_v33, %v5100_v3  ;;  %v5110_v37 = vadd.f32 %v5106_v48, %v5099_v21 }
0x1a93   :  { %v5109_v62 = vadd.f32 %v5107_v1, %v5105_v52  ;;  %v5114_v56 = vadd.f32 %v5112_v34, %v5110_v37 }
0x1a95   :  { %v5113_v5 = vadd.f32 %v5109_v62, %v5103_v53  ;;  %9720 = vtanh.f32 %v5114_v56 }
0x1a97   :  { %9722 = vtanh.f32 %v5113_v5 }
0x1a9f   :  { %v9721_v55 = vpop.eup %9720 }
0x1aa0   :  { %v5118_v11 = vadd.f32 %v9721_v55, %v11520_v25 }
0x1aa1   :  { %v9723_v46 = vpop.eup %9722 }
0x1aa2   :  { %v5117_v42 = vadd.f32 %v9723_v46, %v11523_v57  ;;  %v5120_v15 = vmul.f32 0.020833334, %v5118_v11 }
0x1aa4   :  { %v5119_v23 = vmul.f32 0.020833334, %v5117_v42  ;;  %v11578_v27 = vadd.f32 %v5120_v15, %v11352_v61 }
0x1aa6   :  { %v11575_v38 = vadd.f32 %v5119_v23, %v11349_v10 }
0x1aa8   :  { %5188 = vmatmul.mubr.f32.vlgmr.msra.gmra.mrb[112].mxu0 %v11575_v38  ;;  %7447 = vmatprep.mubr.f32.mxu1 %v11575_v38 }
0x1aa9   :  { %7448 = vmatmul.mubr.f32.vlgmr.msra.gmra.mrb[56].mxu1 %v11578_v27  ;;  %5193 = vmatprep.mubr.f32.mxu0 %v9847_v0 }
0x1aaa   :  { %9414 = vmatpush1.bf16.msra.mxu0 %v9914_v8  ;;  %9446 = vmatpush3.bf16.msra.mxu1 %v9916_v9 }
0x1aab   :  { %9416 = vmatprep.subr.bf16.mxu0 %v9919_v13  ;;  %9448 = vmatprep.subr.bf16.mxu1 %v9925_v18 }
0x1aac   :  { %5194 = vmatmul.mubr.f32.gmra.mrb[114].mxu0 %v11578_v27 }
0x1aad   :  { %5363 = vmatprep.mubr.f32.mxu0 %v9847_v0 }
0x1aae   :  { %9418 = vmatpush1.bf16.msra.mxu0 %v9923_v17  ;;  %9450 = vmatpush3.bf16.msra.mxu1 %v9925_v18 }
0x1aaf   :  { %9420 = vmatprep.subr.bf16.mxu0 %v9929_v22  ;;  %9452 = vmatprep.subr.bf16.mxu1 %v9932_v26 }
0x1ab2   :  { %9422 = vmatpush1.bf16.msra.mxu0 %v9935_v31  ;;  %9454 = vmatpush3.bf16.msra.mxu1 %v9932_v26 }
0x1ab3   :  { %9424 = vmatprep.subr.bf16.mxu0 %v9939_v32  ;;  %9456 = vmatprep.subr.bf16.mxu1 %v9942_v35 }
0x1ab6   :  { %9426 = vmatpush1.bf16.msra.mxu0 %v9945_v40  ;;  %9458 = vmatpush3.bf16.msra.mxu1 %v9942_v35 }
0x1ab7   :  { %9428 = vmatprep.subr.bf16.mxu0 %v9949_v41  ;;  %9460 = vmatprep.subr.bf16.mxu1 %v9952_v44 }
0x1aba   :  { %9430 = vmatpush1.bf16.msra.mxu0 %v9955_v49  ;;  %9462 = vmatpush3.bf16.msra.mxu1 %v9952_v44 }
0x1abb   :  { %9432 = vmatprep.subr.bf16.mxu0 %v9959_v50  ;;  %9464 = vmatprep.subr.bf16.mxu1 %v9964_v54 }
0x1abe   :  { %9434 = vmatpush1.bf16.msra.mxu0 %v9968_v59  ;;  %9466 = vmatpush3.bf16.msra.mxu1 %v9964_v54 }
0x1abf   :  { %9436 = vmatprep.subr.bf16.mxu0 %v9972_v60  ;;  %9468 = vmatprep.subr.bf16.mxu1 %v9975_v63 }
0x1ac2   :  { %9438 = vmatpush1.bf16.msra.mxu0 %v9978_v6  ;;  %9470 = vmatpush3.bf16.msra.mxu1 %v9975_v63 }
0x1ac3   :  { %9440 = vmatprep.subr.bf16.mxu0 %v9982_v7  ;;  %9472 = vmatprep.subr.bf16.mxu1 %v9985_v12 }
0x1ac6   :  { %9442 = vmatpush1.bf16.msra.mxu0 %v9988_v14  ;;  %9474 = vmatpush3.bf16.msra.mxu1 %v9985_v12 }
0x1ac7   :  { %9476 = vmatprep.subr.bf16.mxu0 %v9912_v4  ;;  %9508 = vmatprep.subr.bf16.mxu1 %v9916_v9 }
0x1b7b   :  { %v5189_v10 = vpop.f32.mrb[112].mxu0 }
0x1b7c   :  { %v5191_v61 = vpop.f32.mrb[113].mxu0  ;;  %v7449_v25 = vpop.f32.mrb[56].mxu1  ;;  %v5275_v51 = vrot.slane %v5189_v10, 7 }
0x1b7d   :  { %v5280_v57 = vrot.slane %v7449_v25, 1  ;;  %v5266_v2 = vpop.f32.mrb[57].mxu1  ;;  %v5283_v30 = vadd.f32 %v11403_v58, %v5191_v61 }
0x1b7e   :  { %v5279_v20 = vrot.slane %v5266_v2, 1 }
0x1b7f   :  { %v5195_v29 = vpop.f32.mrb[114].mxu0 }
0x1b80   :  { %v5281_v39 = vsel %vm282_vm2, %v5279_v20, %v5280_v57  ;;  %v5282_v47 = vsel %vm282_vm2, %v5280_v57, %v5279_v20  ;;  %v5276_v24 = vrot.slane %v5195_v29, 7  ;;  %v5197_v43 = vpop.f32.mrb[115].mxu0 }
0x1b81   :  { %v5284_v53 = vadd.f32 %v11396_v16, %v5197_v43  ;;  %v5290_v48 = vmul.f32 %v10042_v28, %v5282_v47 }
0x1b82   :  { %v5278_v45 = vsel %vm277_vm3, %v5276_v24, %v5275_v51  ;;  %v5277_v36 = vsel %vm277_vm3, %v5275_v51, %v5276_v24 }
0x1b83   :  { %v5285_v3 = vmul.f32 %v10047_v33, %v5278_v45  ;;  %v5288_v21 = vadd.f32 %v5284_v53, %v5277_v36 }
0x1b85   :  { %v5287_v52 = vadd.f32 %v5285_v3, %v5283_v30  ;;  %v5292_v34 = vadd.f32 %v5290_v48, %v5288_v21 }
0x1b87   :  { %v5291_v1 = vadd.f32 %v5287_v52, %v5281_v39  ;;  %9724 = vtanh.f32 %v5292_v34 }
0x1b89   :  { %9726 = vtanh.f32 %v5291_v1 }
0x1b91   :  { %v11630_v37 = vpop.eup %9724 }
0x1b92   :  { %v5296_v56 = vmul.f32 0.0625, %v11630_v37 }
0x1b93   :  { %v11632_v62 = vpop.eup %9726 }
0x1b94   :  { %v5295_v5 = vmul.f32 0.0625, %v11632_v62  ;;  %v5298_v11 = vadd.f32 %v5296_v56, %v11578_v27 }
0x1b96   :  { %v5297_v55 = vadd.f32 %v5295_v5, %v11575_v38 }
0x1b98   :  { %5364 = vmatmul.mubr.f32.vlgmr.msra.gmra.mrb[116].mxu0 %v5297_v55  ;;  %7482 = vmatprep.mubr.f32.mxu1 %v5297_v55 }
0x1b99   :  { %7483 = vmatmul.mubr.f32.vlgmr.msra.gmra.mrb[58].mxu1 %v5298_v11  ;;  %5369 = vmatprep.mubr.f32.mxu0 %v9847_v0 }
0x1b9a   :  { %9478 = vmatpush1.bf16.msra.mxu0 %v9914_v8  ;;  %9510 = vmatpush3.bf16.msra.mxu1 %v9916_v9 }
0x1b9b   :  { %9480 = vmatprep.subr.bf16.mxu0 %v9919_v13  ;;  %9512 = vmatprep.subr.bf16.mxu1 %v9925_v18 }
0x1b9c   :  { %5370 = vmatmul.mubr.f32.gmra.mrb[118].mxu0 %v5298_v11 }
0x1b9d   :  { %5543 = vmatprep.mubr.f32.mxu0 %v9847_v0 }
0x1b9e   :  { %9482 = vmatpush1.bf16.msra.mxu0 %v9923_v17  ;;  %9514 = vmatpush3.bf16.msra.mxu1 %v9925_v18 }
0x1b9f   :  { %9484 = vmatprep.subr.bf16.mxu0 %v9929_v22  ;;  %9516 = vmatprep.subr.bf16.mxu1 %v9932_v26 }
0x1ba2   :  { %9486 = vmatpush1.bf16.msra.mxu0 %v9935_v31  ;;  %9518 = vmatpush3.bf16.msra.mxu1 %v9932_v26 }
0x1ba3   :  { %9488 = vmatprep.subr.bf16.mxu0 %v9939_v32  ;;  %9520 = vmatprep.subr.bf16.mxu1 %v9942_v35 }
0x1ba6   :  { %9490 = vmatpush1.bf16.msra.mxu0 %v9945_v40  ;;  %9522 = vmatpush3.bf16.msra.mxu1 %v9942_v35 }
0x1ba7   :  { %9492 = vmatprep.subr.bf16.mxu0 %v9949_v41  ;;  %9524 = vmatprep.subr.bf16.mxu1 %v9952_v44 }
0x1baa   :  { %9494 = vmatpush1.bf16.msra.mxu0 %v9955_v49  ;;  %9526 = vmatpush3.bf16.msra.mxu1 %v9952_v44 }
0x1bab   :  { %9496 = vmatprep.subr.bf16.mxu0 %v9959_v50  ;;  %9528 = vmatprep.subr.bf16.mxu1 %v9964_v54 }
0x1bae   :  { %9498 = vmatpush1.bf16.msra.mxu0 %v9968_v59  ;;  %9530 = vmatpush3.bf16.msra.mxu1 %v9964_v54 }
0x1baf   :  { %9500 = vmatprep.subr.bf16.mxu0 %v9972_v60  ;;  %9532 = vmatprep.subr.bf16.mxu1 %v9975_v63 }
0x1bb2   :  { %9502 = vmatpush1.bf16.msra.mxu0 %v9978_v6  ;;  %9534 = vmatpush3.bf16.msra.mxu1 %v9975_v63 }
0x1bb3   :  { %9504 = vmatprep.subr.bf16.mxu0 %v9982_v7  ;;  %9536 = vmatprep.subr.bf16.mxu1 %v9985_v12 }
0x1bb6   :  { %9506 = vmatpush1.bf16.msra.mxu0 %v9988_v14  ;;  %9538 = vmatpush3.bf16.msra.mxu1 %v9985_v12 }
0x1bb7   :  { %9540 = vmatprep.subr.bf16.mxu0 %v9912_v4  ;;  %9572 = vmatprep.subr.bf16.mxu1 %v9916_v9 }
0x1c6b   :  { %v5365_v46 = vpop.f32.mrb[116].mxu0 }
0x1c6c   :  { %v5367_v42 = vpop.f32.mrb[117].mxu0  ;;  %v7484_v15 = vpop.f32.mrb[58].mxu1  ;;  %v5451_v57 = vrot.slane %v5365_v46, 7 }
0x1c6d   :  { %v5456_v23 = vrot.slane %v7484_v15, 1  ;;  %v5442_v10 = vpop.f32.mrb[59].mxu1  ;;  %v5459_v24 = vadd.f32 %v11403_v58, %v5367_v42 }
0x1c6e   :  { %v5455_v61 = vrot.slane %v5442_v10, 1 }
0x1c6f   :  { %v5371_v25 = vpop.f32.mrb[118].mxu0 }
0x1c70   :  { %v5457_v2 = vsel %vm282_vm2, %v5455_v61, %v5456_v23  ;;  %v5458_v20 = vsel %vm282_vm2, %v5456_v23, %v5455_v61  ;;  %v5452_v29 = vrot.slane %v5371_v25, 7  ;;  %v5373_v51 = vpop.f32.mrb[119].mxu0 }
0x1c71   :  { %v5460_v4 = vadd.f32 %v11396_v16, %v5373_v51  ;;  %v5466_v43 = vmul.f32 %v10042_v28, %v5458_v20 }
0x1c72   :  { %v5454_v39 = vsel %vm277_vm3, %v5452_v29, %v5451_v57  ;;  %v5453_v47 = vsel %vm277_vm3, %v5451_v57, %v5452_v29 }
0x1c73   :  { %v5461_v53 = vmul.f32 %v10047_v33, %v5454_v39  ;;  %v5464_v45 = vadd.f32 %v5460_v4, %v5453_v47 }
0x1c75   :  { %v5463_v36 = vadd.f32 %v5461_v53, %v5459_v24  ;;  %v5468_v30 = vadd.f32 %v5466_v43, %v5464_v45 }
0x1c77   :  { %v5467_v48 = vadd.f32 %v5463_v36, %v5457_v2  ;;  %9728 = vtanh.f32 %v5468_v30 }
0x1c79   :  { %9730 = vtanh.f32 %v5467_v48 }
0x1c81   :  { %v11684_v3 = vpop.eup %9728 }
0x1c82   :  { %v5476_v52 = vmul.f32 0.0625, %v11684_v3 }
0x1c83   :  { %v11686_v21 = vpop.eup %9730 }
0x1c84   :  { %v5475_v34 = vmul.f32 0.0625, %v11686_v21  ;;  %v5478_v56 = vadd.f32 %v5476_v52, %v11578_v27  ;;  %v5471_v5 = vmul.f32 2.0, %v11686_v21 }
0x1c86   :  { %v5477_v1 = vadd.f32 %v5475_v34, %v11575_v38  ;;  %v5473_v10 = vadd.f32 %v11632_v62, %v5471_v5 }
0x1c88   :  { %5544 = vmatmul.mubr.f32.vlgmr.msra.gmra.mrb[120].mxu0 %v5477_v1  ;;  %7517 = vmatprep.mubr.f32.mxu1 %v5477_v1 }
0x1c89   :  { %7518 = vmatmul.mubr.f32.vlgmr.msra.gmra.mrb[60].mxu1 %v5478_v56  ;;  %5549 = vmatprep.mubr.f32.mxu0 %v9847_v0 }
0x1c8a   :  { %9542 = vmatpush1.bf16.msra.mxu0 %v9914_v8  ;;  %9574 = vmatpush3.bf16.msra.mxu1 %v9916_v9 }
0x1c8b   :  { %9544 = vmatprep.subr.bf16.mxu0 %v9919_v13  ;;  %9576 = vmatprep.subr.bf16.mxu1 %v9925_v18 }
0x1c8c   :  { %5550 = vmatmul.mubr.f32.gmra.mrb[122].mxu0 %v5478_v56 }
0x1c8d   :  { %5723 = vmatprep.mubr.f32.mxu0 %v9847_v0 }
0x1c8e   :  { %9546 = vmatpush1.bf16.msra.mxu0 %v9923_v17  ;;  %9578 = vmatpush3.bf16.msra.mxu1 %v9925_v18 }
0x1c8f   :  { %9548 = vmatprep.subr.bf16.mxu0 %v9929_v22  ;;  %9580 = vmatprep.subr.bf16.mxu1 %v9932_v26 }
0x1c92   :  { %9550 = vmatpush1.bf16.msra.mxu0 %v9935_v31  ;;  %9582 = vmatpush3.bf16.msra.mxu1 %v9932_v26 }
0x1c93   :  { %9552 = vmatprep.subr.bf16.mxu0 %v9939_v32  ;;  %9584 = vmatprep.subr.bf16.mxu1 %v9942_v35 }
0x1c96   :  { %9554 = vmatpush1.bf16.msra.mxu0 %v9945_v40  ;;  %9586 = vmatpush3.bf16.msra.mxu1 %v9942_v35 }
0x1c97   :  { %9556 = vmatprep.subr.bf16.mxu0 %v9949_v41  ;;  %9588 = vmatprep.subr.bf16.mxu1 %v9952_v44 }
0x1c9a   :  { %9558 = vmatpush1.bf16.msra.mxu0 %v9955_v49  ;;  %9590 = vmatpush3.bf16.msra.mxu1 %v9952_v44 }
0x1c9b   :  { %9560 = vmatprep.subr.bf16.mxu0 %v9959_v50  ;;  %9592 = vmatprep.subr.bf16.mxu1 %v9964_v54 }
0x1c9e   :  { %9562 = vmatpush1.bf16.msra.mxu0 %v9968_v59  ;;  %9594 = vmatpush3.bf16.msra.mxu1 %v9964_v54 }
0x1c9f   :  { %9564 = vmatprep.subr.bf16.mxu0 %v9972_v60  ;;  %9596 = vmatprep.subr.bf16.mxu1 %v9975_v63 }
0x1ca2   :  { %9566 = vmatpush1.bf16.msra.mxu0 %v9978_v6  ;;  %9598 = vmatpush3.bf16.msra.mxu1 %v9975_v63 }
0x1ca3   :  { %9568 = vmatprep.subr.bf16.mxu0 %v9982_v7  ;;  %9600 = vmatprep.subr.bf16.mxu1 %v9985_v12 }
0x1ca6   :  { %9570 = vmatpush1.bf16.msra.mxu0 %v9988_v14  ;;  %9602 = vmatpush3.bf16.msra.mxu1 %v9985_v12  ;;  %v5472_v14 = vmul.f32 2.0, %v11684_v3 }
0x1ca8   :  { %v5474_v11 = vadd.f32 %v11630_v37, %v5472_v14 }
0x1d5b   :  { %v5545_v8 = vpop.f32.mrb[120].mxu0 }
0x1d5c   :  { %v5547_v9 = vpop.f32.mrb[121].mxu0  ;;  %v7519_v13 = vpop.f32.mrb[60].mxu1  ;;  %v5631_v31 = vrot.slane %v5545_v8, 7 }
0x1d5d   :  { %v5636_v17 = vrot.slane %v7519_v13, 1  ;;  %v5622_v18 = vpop.f32.mrb[61].mxu1  ;;  %v5639_v54 = vadd.f32 %v11403_v58, %v5547_v9 }
0x1d5e   :  { %v5635_v22 = vrot.slane %v5622_v18, 1 }
0x1d5f   :  { %v5551_v26 = vpop.f32.mrb[122].mxu0 }
0x1d60   :  { %v5637_v32 = vsel %vm282_vm2, %v5635_v22, %v5636_v17  ;;  %v5638_v35 = vsel %vm282_vm2, %v5636_v17, %v5635_v22  ;;  %v5632_v40 = vrot.slane %v5551_v26, 7  ;;  %v5553_v41 = vpop.f32.mrb[123].mxu0 }
0x1d61   :  { %v5640_v44 = vadd.f32 %v11396_v16, %v5553_v41  ;;  %v5646_v59 = vmul.f32 %v10042_v28, %v5638_v35 }
0x1d62   :  { %v5634_v49 = vsel %vm277_vm3, %v5632_v40, %v5631_v31  ;;  %v5633_v50 = vsel %vm277_vm3, %v5631_v31, %v5632_v40 }
0x1d63   :  { %v5641_v60 = vmul.f32 %v10047_v33, %v5634_v49  ;;  %v5644_v63 = vadd.f32 %v5640_v44, %v5633_v50 }
0x1d65   :  { %v5643_v6 = vadd.f32 %v5641_v60, %v5639_v54  ;;  %v5648_v7 = vadd.f32 %v5646_v59, %v5644_v63 }
0x1d67   :  { %v5647_v12 = vadd.f32 %v5643_v6, %v5637_v32  ;;  %9732 = vtanh.f32 %v5648_v7 }
0x1d69   :  { %9734 = vtanh.f32 %v5647_v12 }
0x1d71   :  { %v9733_v55 = vpop.eup %9732 }
0x1d72   :  { %v5652_v46 = vmul.f32 2.0, %v9733_v55  ;;  %v5656_v15 = vmul.f32 0.125, %v9733_v55 }
0x1d73   :  { %v9735_v42 = vpop.eup %9734 }
0x1d74   :  { %v5655_v23 = vmul.f32 0.125, %v9735_v42  ;;  %v5651_v61 = vmul.f32 2.0, %v9735_v42  ;;  %v5654_v25 = vadd.f32 %v5652_v46, %v5474_v11  ;;  %v5658_v20 = vadd.f32 %v5656_v15, %v11578_v27 }
0x1d76   :  { %v5657_v57 = vadd.f32 %v5655_v23, %v11575_v38  ;;  %v5653_v2 = vadd.f32 %v5651_v61, %v5473_v10 }
0x1d78   :  { %5724 = vmatmul.mubr.f32.vlgmr.msra.gmra.mrb[124].mxu0 %v5657_v57  ;;  %7552 = vmatprep.mubr.f32.mxu1 %v5657_v57 }
0x1d79   :  { %7553 = vmatmul.mubr.f32.vlgmr.msra.gmra.mrb[62].mxu1 %v5658_v20  ;;  %5729 = vmatprep.mubr.f32.mxu0 %v9847_v0 }
0x1d7c   :  { %5730 = vmatmul.mubr.f32.gmra.mrb[126].mxu0 %v5658_v20 }
0x1e4b   :  { %v5725_v37 = vpop.f32.mrb[124].mxu0 }
0x1e4c   :  { %v5727_v29 = vpop.f32.mrb[125].mxu0  ;;  %v7554_v51 = vpop.f32.mrb[62].mxu1  ;;  %v5811_v24 = vrot.slane %v5725_v37, 7 }
0x1e4d   :  { %v5816_v4 = vrot.slane %v7554_v51, 1  ;;  %v5802_v39 = vpop.f32.mrb[63].mxu1  ;;  %v5819_v3 = vadd.f32 %v11403_v58, %v5727_v29 }
0x1e4e   :  { %v5815_v47 = vrot.slane %v5802_v39, 1 }
0x1e4f   :  { %v5731_v62 = vpop.f32.mrb[126].mxu0 }
0x1e50   :  { %v5817_v43 = vsel %vm282_vm2, %v5815_v47, %v5816_v4  ;;  %v5818_v53 = vsel %vm282_vm2, %v5816_v4, %v5815_v47  ;;  %v5812_v45 = vrot.slane %v5731_v62, 7  ;;  %v5733_v36 = vpop.f32.mrb[127].mxu0 }
0x1e51   :  { %v5820_v30 = vadd.f32 %v11396_v16, %v5733_v36  ;;  %v5826_v21 = vmul.f32 %v10042_v28, %v5818_v53 }
0x1e52   :  { %v5814_v0 = vsel %vm277_vm3, %v5812_v45, %v5811_v24  ;;  %v5813_v48 = vsel %vm277_vm3, %v5811_v24, %v5812_v45 }
0x1e53   :  { %v5821_v52 = vmul.f32 %v10047_v33, %v5814_v0  ;;  %v5824_v34 = vadd.f32 %v5820_v30, %v5813_v48 }
0x1e55   :  { %v5823_v1 = vadd.f32 %v5821_v52, %v5819_v3  ;;  %v5828_v56 = vadd.f32 %v5826_v21, %v5824_v34 }
0x1e57   :  { %v5827_v8 = vadd.f32 %v5823_v1, %v5817_v43  ;;  %9736 = vtanh.f32 %v5828_v56 }
0x1e59   :  { %9738 = vtanh.f32 %v5827_v8 }
0x1e61   :  { %v9737_v9 = vpop.eup %9736 }
0x1e62   :  { %v5832_v16 = vadd.f32 %v9737_v9, %v5654_v25 }
0x1e63   :  { %v9739_v13 = vpop.eup %9738 }
0x1e64   :  { %v5831_v17 = vadd.f32 %v9739_v13, %v5653_v2  ;;  %v5834_v18 = vmul.f32 0.020833334, %v5832_v16 }
0x1e66   :  { %v5833_v19 = vmul.f32 0.020833334, %v5831_v17  ;;  %v5836_v58 = vadd.f32 %v5834_v18, %v11578_v27 }
0x1e68   :  { %v5835_v28 = vadd.f32 %v5833_v19, %v11575_v38  ;;  %5838 = vst [vmem:[#allocation8 + $0x8] sm:$0xff] %v5836_v58 }
0x1e6a   :  { %5837 = vst [vmem:[#allocation8] sm:$0xff] %v5835_v28 }
0x1e6b   :  { %9823 = shalt.err (!%p9820_p0)
}
0x1e6c   :  { %s9824_s27 = scalar_lea.hbm %s11775_s3, 256 }
0x1e6d   :  { %p9825_p1 = scmp.ne.s32.totalorder %s11775_s3, %s9824_s27  ;;  %p9828_p2 = scmp.lt.u32.totalorder %s9824_s27, %s11775_s3 }
0x1e6f   :  { %p9830_p3 = pnand %p9828_p2, %p9825_p1 }
0x1e71   :  { %9833 = shalt.err (!%p9830_p3)
}
0x1e72   :  { %5850 = dma.vmem_to_hbm [thread:$0]  %s5845_s23, 256, %s11775_s3, [#allocation4], %s9844_s1, %s9844_s1, %s9845_s9  }
0x1e73   :  { %9838 = dma.done.wait [#allocation4], 256  }
0x1e74   :  { %9839 = vsyncadd [#allocation4], 4294967040 }
0x1e75   :  { %5854 = vsyncpa [#allocation3], 1 }
0x1e76   :  { %5855 = vsyncpa [#allocation6], 1 }
0x1e77   :  { %5856 = vsyncpa [#allocation4], 1 }

</bundles_post_ra>
